<compile_context>
chip_gen: v5e
topology: v5e:2x2
jax: 0.10.0
libtpu: 0.0.40
codegen_flags: <defaults>
</compile_context>

<pallas_src>
import jax
import jax.numpy as jnp
from jax.experimental import pallas as pl
from jax.experimental.pallas import tpu as pltpu

K_IN = 28 * 28      # 784 (flattened input; full last-dim block, no K padding needed)
HIDDEN = 512
N_OUT = 10
N_PAD = 128         # lane-dense final layer -> unmasked stores


def _round_up(x, m):
    return ((x + m - 1) // m) * m


def mlp_kernel(x_ref, w1_ref, b1_ref, w2_ref, b2_ref, w3_ref, b3_ref, o_ref):
    # x_ref : [BM, 784]     f32  (cast to bf16 in-kernel for the MXU feed)
    # w1_ref: [784, 512]    bf16   b1_ref: [1, 512] f32
    # w2_ref: [512, 512]    bf16   b2_ref: [1, 512] f32
    # w3_ref: [512, 128]    bf16   b3_ref: [1, 128] f32
    # o_ref : [BM, 128]     bf16
    x = x_ref[...].astype(jnp.bfloat16)

    h1 = jnp.dot(x, w1_ref[...], preferred_element_type=jnp.float32) + b1_ref[...]
    h1 = jnp.maximum(h1, 0.0).astype(jnp.bfloat16)   # f32 epilogue, bf16 MXU feed

    h2 = jnp.dot(h1, w2_ref[...], preferred_element_type=jnp.float32) + b2_ref[...]
    h2 = jnp.maximum(h2, 0.0).astype(jnp.bfloat16)

    logits = jnp.dot(h2, w3_ref[...], preferred_element_type=jnp.float32) + b3_ref[...]
    o_ref[...] = logits.astype(o_ref.dtype)          # bf16 writeback (halves traffic)


def prepare_params(params):
    """One-time weight prep (call once, reuse across forward passes).

    Weights -> bf16 (halves HBM traffic / VMEM residency), final layer padded
    10 -> 128 output lanes; biases kept f32 for the f32 epilogue.
    """
    w1, b1, w2, b2, w3, b3 = params
    w1p = w1.astype(jnp.bfloat16)                                              # [784, 512]
    w2p = w2.astype(jnp.bfloat16)                                              # [512, 512]
    w3p = jnp.pad(w3, ((0, 0), (0, N_PAD - N_OUT))).astype(jnp.bfloat16)       # [512, 128]
    b1p = b1.reshape(1, HIDDEN).astype(jnp.float32)
    b2p = b2.reshape(1, HIDDEN).astype(jnp.float32)
    b3p = jnp.pad(b3.reshape(1, N_OUT), ((0, 0), (0, N_PAD - N_OUT))).astype(jnp.float32)
    return (w1p, b1p, w2p, b2p, w3p, b3p)


def _choose_block_m(B, block_m_cap):
    """Adaptive batch tile: small batches pad only to 128; large batches get
    >=2 tiles (v7x megacore) capped at block_m_cap."""
    b128 = _round_up(max(B, 1), 128)
    if b128 >= 256:
        half = _round_up(-(-b128 // 2), 128)   # ceil(b128/2) rounded up to 128
        return min(block_m_cap, half)
    return min(block_m_cap, b128)              # tiny batch: one 128-row tile


def mlp_forward(x, prepared_params, *, block_m=None):
    """x: [B, 1, 28, 28] float32 (NCHW). prepared_params from prepare_params().
    Returns logits [B, 10] float32.

    block_m: optional cap on the batch tile size. Default cap 1024 (safe on
    v5e/v6e's 128 MiB and v7x's 64 MiB per-TC VMEM at the 48 MiB scoped limit).
    """
    w1p, b1p, w2p, b2p, w3p, b3p = prepared_params
    B = x.shape[0]

    if block_m is None:
        block_m = 1024
    block_m = _choose_block_m(B, block_m)

    num_tiles = pl.cdiv(B, block_m)
    b_pad = num_tiles * block_m

    # nn.Flatten (row-major, identical to torch). No K padding / bf16 staging:
    # the kernel reads f32 [BM, 784] directly (full last-dim block).
    x_flat = x.reshape(B, K_IN).astype(jnp.float32)
    if b_pad != B:
        x_flat = jnp.pad(x_flat, ((0, b_pad - B), (0, 0)))

    # Weights/biases: constant index_map -> loaded once, resident in VMEM
    # across all batch tiles. Only the x / out tiles stream (double-buffered).
    const = lambda shape: pl.BlockSpec(shape, lambda i: (0,) * len(shape))

    flops = 2 * b_pad * (K_IN * HIDDEN + HIDDEN * HIDDEN + HIDDEN * N_PAD)
    bytes_accessed = (
        x_flat.size * 4
        + (w1p.size + w2p.size + w3p.size) * 2
        + (b1p.size + b2p.size + b3p.size) * 4
        + b_pad * N_PAD * 2
    )

    out = pl.pallas_call(
        mlp_kernel,
        out_shape=jax.ShapeDtypeStruct((b_pad, N_PAD), jnp.bfloat16),
        grid=(num_tiles,),
        in_specs=[
            pl.BlockSpec((block_m, K_IN), lambda i: (i, 0)),    # x tile streams
            const((K_IN, HIDDEN)), const((1, HIDDEN)),
            const((HIDDEN, HIDDEN)), const((1, HIDDEN)),
            const((HIDDEN, N_PAD)), const((1, N_PAD)),
        ],
        out_specs=pl.BlockSpec((block_m, N_PAD), lambda i: (i, 0)),
        compiler_params=pltpu.CompilerParams(
            dimension_semantics=("parallel",),   # v7x: shard batch tiles over 2 TCs
            vmem_limit_bytes=48 * 1024 * 1024,
        ),
        cost_estimate=pl.CostEstimate(
            flops=flops, transcendentals=0, bytes_accessed=bytes_accessed),
    )(x_flat, w1p, b1p, w2p, b2p, w3p, b3p)

    return out[:B, :N_OUT].astype(jnp.float32)


def init_params(key):
    """Deterministic init matching the PyTorch layer shapes.

    Weights are stored transposed relative to torch.nn.Linear (i.e. [in, out])
    so the kernel computes x @ W + b, semantically identical to torch's
    x @ W.T + b with W of shape [out, in].
    """
    k1, k2, k3, k4, k5, k6 = jax.random.split(key, 6)

    def uniform_fan_in(k, shape, fan_in):
        bound = 1.0 / jnp.sqrt(fan_in)
        return jax.random.uniform(k, shape, jnp.float32, -bound, bound)

    w1 = uniform_fan_in(k1, (K_IN, HIDDEN), K_IN)
    b1 = uniform_fan_in(k2, (1, HIDDEN), K_IN)
    w2 = uniform_fan_in(k3, (HIDDEN, HIDDEN), HIDDEN)
    b2 = uniform_fan_in(k4, (1, HIDDEN), HIDDEN)
    w3 = uniform_fan_in(k5, (HIDDEN, N_OUT), HIDDEN)
    b3 = uniform_fan_in(k6, (1, N_OUT), HIDDEN)
    return (w1, b1, w2, b2, w3, b3)


def mlp_reference(x, params):
    """Pure-JAX reference with matching bf16 weight/activation quantization."""
    w1, b1, w2, b2, w3, b3 = params
    h = x.reshape(x.shape[0], -1).astype(jnp.bfloat16)
    h = jnp.dot(h, w1.astype(jnp.bfloat16), preferred_element_type=jnp.float32) + b1
    h = jnp.maximum(h, 0.0).astype(jnp.bfloat16)
    h = jnp.dot(h, w2.astype(jnp.bfloat16), preferred_element_type=jnp.float32) + b2
    h = jnp.maximum(h, 0.0).astype(jnp.bfloat16)
    return jnp.dot(h, w3.astype(jnp.bfloat16), preferred_element_type=jnp.float32) + b3


if __name__ == "__main__":
    key = jax.random.PRNGKey(0)
    kx, kp = jax.random.split(key)

    B = 8
    x = jax.random.normal(kx, (B, 1, 28, 28), jnp.float32)  # NCHW, like MNIST
    params = init_params(kp)

    # One-time weight prep (hoisted out of the per-call path).
    prepared = jax.block_until_ready(prepare_params(params))

    fwd = jax.jit(lambda x_, p_: mlp_forward(x_, p_))
    out = jax.block_until_ready(fwd(x, prepared))
    ref = jax.block_until_ready(mlp_reference(x, params))

    assert out.shape == (B, N_OUT)
    # bf16 logits writeback -> slightly looser tolerance than pure-f32.
    assert jnp.allclose(out, ref, atol=5e-2, rtol=5e-2), "mismatch vs reference"

    print("KERNEL_OK")
</pallas_src>

<mosaic_0001>
module attributes {stable_mosaic.version = 11 : i64} {
  func.func @mlp_kernel(%arg0: i32, %arg1: memref<128x784xf32, #tpu.memory_space<vmem>>, %arg2: memref<784x512xbf16, #tpu.memory_space<vmem>>, %arg3: memref<1x512xf32, #tpu.memory_space<vmem>>, %arg4: memref<512x512xbf16, #tpu.memory_space<vmem>>, %arg5: memref<1x512xf32, #tpu.memory_space<vmem>>, %arg6: memref<512x128xbf16, #tpu.memory_space<vmem>>, %arg7: memref<1x128xf32, #tpu.memory_space<vmem>>, %arg8: memref<128x128xbf16, #tpu.memory_space<vmem>>) attributes {dimension_semantics = [#tpu.dimension_semantics<parallel>], iteration_bounds = array<i64: 1>, scalar_prefetch = 0 : i64, scratch_operands = 0 : i64, tpu.core_type = #tpu.core_type<tc>, window_params = [{transform_indices = @transform_0, window_bounds = array<i64: 128, 784>}, {pipeline_mode = #tpu.pipeline_mode<synchronous>, transform_indices = @transform_1, window_bounds = array<i64: 784, 512>}, {pipeline_mode = #tpu.pipeline_mode<synchronous>, transform_indices = @transform_2, window_bounds = array<i64: 1, 512>}, {pipeline_mode = #tpu.pipeline_mode<synchronous>, transform_indices = @transform_3, window_bounds = array<i64: 512, 512>}, {pipeline_mode = #tpu.pipeline_mode<synchronous>, transform_indices = @transform_4, window_bounds = array<i64: 1, 512>}, {pipeline_mode = #tpu.pipeline_mode<synchronous>, transform_indices = @transform_5, window_bounds = array<i64: 512, 128>}, {pipeline_mode = #tpu.pipeline_mode<synchronous>, transform_indices = @transform_6, window_bounds = array<i64: 1, 128>}, {transform_indices = @transform_7, window_bounds = array<i64: 128, 128>}]} {
    %c0 = arith.constant 0 : index
    %c0_0 = arith.constant 0 : index
    %0 = vector.load %arg1[%c0, %c0_0] : memref<128x784xf32, #tpu.memory_space<vmem>>, vector<128x784xf32>
    %1 = arith.truncf %0 : vector<128x784xf32> to vector<128x784xbf16>
    %c0_1 = arith.constant 0 : index
    %c0_2 = arith.constant 0 : index
    %2 = vector.load %arg2[%c0_1, %c0_2] : memref<784x512xbf16, #tpu.memory_space<vmem>>, vector<784x512xbf16>
    %cst = arith.constant dense<0.000000e+00> : vector<128x512xf32>
    %3 = tpu.matmul %1, %2, %cst {dimension_numbers = #tpu.dot_dimension_numbers<[1], [0], [0], [1], [0, 0, 1, 1], [], []>} : vector<128x784xbf16>, vector<784x512xbf16>, vector<128x512xf32> -> vector<128x512xf32>
    %c0_3 = arith.constant 0 : index
    %c0_4 = arith.constant 0 : index
    %4 = vector.load %arg3[%c0_3, %c0_4] : memref<1x512xf32, #tpu.memory_space<vmem>>, vector<1x512xf32>
    %5 = vector.broadcast %4 : vector<1x512xf32> to vector<128x512xf32>
    %6 = arith.addf %3, %5 : vector<128x512xf32>
    %cst_5 = arith.constant 0.000000e+00 : f32
    %7 = vector.broadcast %cst_5 : f32 to vector<128x512xf32>
    %8 = arith.maximumf %6, %7 : vector<128x512xf32>
    %9 = arith.truncf %8 : vector<128x512xf32> to vector<128x512xbf16>
    %c0_6 = arith.constant 0 : index
    %c0_7 = arith.constant 0 : index
    %10 = vector.load %arg4[%c0_6, %c0_7] : memref<512x512xbf16, #tpu.memory_space<vmem>>, vector<512x512xbf16>
    %cst_8 = arith.constant dense<0.000000e+00> : vector<128x512xf32>
    %11 = tpu.matmul %9, %10, %cst_8 {dimension_numbers = #tpu.dot_dimension_numbers<[1], [0], [0], [1], [0, 0, 1, 1], [], []>} : vector<128x512xbf16>, vector<512x512xbf16>, vector<128x512xf32> -> vector<128x512xf32>
    %c0_9 = arith.constant 0 : index
    %c0_10 = arith.constant 0 : index
    %12 = vector.load %arg5[%c0_9, %c0_10] : memref<1x512xf32, #tpu.memory_space<vmem>>, vector<1x512xf32>
    %13 = vector.broadcast %12 : vector<1x512xf32> to vector<128x512xf32>
    %14 = arith.addf %11, %13 : vector<128x512xf32>
    %cst_11 = arith.constant 0.000000e+00 : f32
    %15 = vector.broadcast %cst_11 : f32 to vector<128x512xf32>
    %16 = arith.maximumf %14, %15 : vector<128x512xf32>
    %17 = arith.truncf %16 : vector<128x512xf32> to vector<128x512xbf16>
    %c0_12 = arith.constant 0 : index
    %c0_13 = arith.constant 0 : index
    %18 = vector.load %arg6[%c0_12, %c0_13] : memref<512x128xbf16, #tpu.memory_space<vmem>>, vector<512x128xbf16>
    %cst_14 = arith.constant dense<0.000000e+00> : vector<128x128xf32>
    %19 = tpu.matmul %17, %18, %cst_14 {dimension_numbers = #tpu.dot_dimension_numbers<[1], [0], [0], [1], [0, 0, 1, 1], [], []>} : vector<128x512xbf16>, vector<512x128xbf16>, vector<128x128xf32> -> vector<128x128xf32>
    %c0_15 = arith.constant 0 : index
    %c0_16 = arith.constant 0 : index
    %20 = vector.load %arg7[%c0_15, %c0_16] : memref<1x128xf32, #tpu.memory_space<vmem>>, vector<1x128xf32>
    %21 = vector.broadcast %20 : vector<1x128xf32> to vector<128x128xf32>
    %22 = arith.addf %19, %21 : vector<128x128xf32>
    %23 = arith.truncf %22 : vector<128x128xf32> to vector<128x128xbf16>
    %c0_17 = arith.constant 0 : index
    %c0_18 = arith.constant 0 : index
    %24 = vector.load %arg8[%c0_17, %c0_18] : memref<128x128xbf16, #tpu.memory_space<vmem>>, vector<128x128xbf16>
    tpu.vector_store %arg8[%c0_17, %c0_18], %23 {strides = array<i32>} : memref<128x128xbf16, #tpu.memory_space<vmem>>, vector<128x128xbf16>,
    return
  }
  func.func @transform_0(%arg0: i32) -> (i32, i32) {
    %c0_i32 = arith.constant 0 : i32
    %c0_i32_0 = arith.constant 0 : i32
    return %arg0, %c0_i32 : i32, i32
  }
  func.func @transform_1(%arg0: i32) -> (i32, i32) {
    %c0_i32 = arith.constant 0 : i32
    %c0_i32_0 = arith.constant 0 : i32
    %c0_i32_1 = arith.constant 0 : i32
    return %c0_i32, %c0_i32_0 : i32, i32
  }
  func.func @transform_2(%arg0: i32) -> (i32, i32) {
    %c0_i32 = arith.constant 0 : i32
    %c0_i32_0 = arith.constant 0 : i32
    %c0_i32_1 = arith.constant 0 : i32
    return %c0_i32, %c0_i32_0 : i32, i32
  }
  func.func @transform_3(%arg0: i32) -> (i32, i32) {
    %c0_i32 = arith.constant 0 : i32
    %c0_i32_0 = arith.constant 0 : i32
    %c0_i32_1 = arith.constant 0 : i32
    return %c0_i32, %c0_i32_0 : i32, i32
  }
  func.func @transform_4(%arg0: i32) -> (i32, i32) {
    %c0_i32 = arith.constant 0 : i32
    %c0_i32_0 = arith.constant 0 : i32
    %c0_i32_1 = arith.constant 0 : i32
    return %c0_i32, %c0_i32_0 : i32, i32
  }
  func.func @transform_5(%arg0: i32) -> (i32, i32) {
    %c0_i32 = arith.constant 0 : i32
    %c0_i32_0 = arith.constant 0 : i32
    %c0_i32_1 = arith.constant 0 : i32
    return %c0_i32, %c0_i32_0 : i32, i32
  }
  func.func @transform_6(%arg0: i32) -> (i32, i32) {
    %c0_i32 = arith.constant 0 : i32
    %c0_i32_0 = arith.constant 0 : i32
    %c0_i32_1 = arith.constant 0 : i32
    return %c0_i32, %c0_i32_0 : i32, i32
  }
  func.func @transform_7(%arg0: i32) -> (i32, i32) {
    %c0_i32 = arith.constant 0 : i32
    %c0_i32_0 = arith.constant 0 : i32
    return %arg0, %c0_i32 : i32, i32
  }
}

</mosaic_0001>

<bundles_post_ra>
// kernel: _lambda_.1
= control target key start
LH: loop header
LB: loop body
LE: loop exit
PB: predicated region body
PF: predicated region fallthrough
CT: control target
= control target key end

     0   :  { %12 = vsyncpa [#allocation3], 0  ;;  %s9691_s0 = inlined_call_operand.vmem [shape: f32[128,784], index: 0, kind: input, shape index: {}]   ;;  %s9692_s1 = inlined_call_operand.vmem [shape: bf16[784,512], index: 1, kind: input, shape index: {}]   ;;  %s9693_s2 = inlined_call_operand.vmem [shape: f32[1,512], index: 2, kind: input, shape index: {}]   ;;  %s9694_s3 = inlined_call_operand.hbm [shape: bf16[512,512], index: 3, kind: input, shape index: {}]   ;;  %s9695_s4 = inlined_call_operand.vmem [shape: f32[1,512], index: 4, kind: input, shape index: {}]   ;;  %s9696_s5 = inlined_call_operand.hbm [shape: bf16[512,128], index: 5, kind: input, shape index: {}]   ;;  %s9697_s6 = inlined_call_operand.vmem [shape: f32[1,128], index: 6, kind: input, shape index: {}]   ;;  %s9698_s7 = inlined_call_operand.vmem [shape: bf16[128,128], index: 7, kind: output, shape index: {}]  }
   0x1   :  { %s24_s26 = sshll.u32 %s9694_s3, 4  ;;  %s25_s26 = int_to_ptr.hbm [resolvable:$true] %s24_s26 }
   0x2   :  { %13 = vsyncpa [#allocation5], 0  ;;  %s6979_s27 = smov [#allocation2]   ;;  %s39_s8 = sshll.u32 %s9696_s5, 4  ;;  %s40_s8 = int_to_ptr.hbm [resolvable:$true] %s39_s8 }
   0x3   :  { %s26_s28 = sshll.u32 %s6979_s27, 4  ;;  %s6980_s9 = smov 256   ;;  %s27_s28 = int_to_ptr.vmem [resolvable:$true] %s26_s28 }
   0x4   :  { %s6981_s10 = smov 16   ;;  %s6982_s11 = smov [#allocation4]  }
   0x5   :  { %32 = dma.hbm_to_vmem [thread:$0]  %s25_s26, 16384, %s27_s28, [#allocation3], %s6980_s9, %s6980_s9, %s6981_s10  }
   0x6   :  { %s41_s12 = sshll.u32 %s6982_s11, 4  ;;  %s6983_s13 = smov 64   ;;  %s42_s12 = int_to_ptr.vmem [resolvable:$true] %s41_s12 }
   0x7   :  { %s6984_s14 = smov 4  }
   0x8   :  { %47 = dma.hbm_to_vmem [thread:$0]  %s40_s8, 4096, %s42_s12, [#allocation5], %s6983_s13, %s6983_s13, %s6984_s14  }
   0x9   :  { %6975 = dma.done.wait [#allocation3], 16384  }
   0xa   :  { %6976 = vsyncadd [#allocation3], 4294950912 }
   0xb   :  { %6977 = dma.done.wait [#allocation5], 4096  }
   0xc   :  { %6978 = vsyncadd [#allocation5], 4294963200  ;;  %v5172_v0 = vld [vmem:[%s9692_s1 + $0xe0] sm:$0xf]  ;;  %v6544_v1 = vld [vmem:[%s9692_s1 + $0xec] sm:$0xf0] }
   0xd   :  { %v5300_v2 = vld [vmem:[%s9692_s1 + $0x1e0] sm:$0xf]  ;;  %v5173_v3 = vor.u32 %v6544_v1, %v5172_v0  ;;  %v6576_v4 = vld [vmem:[%s9692_s1 + $0x1ec] sm:$0xf0]  ;;  %vm1413_vm0 = vcmask 130048  }
   0xe   :  { %v5428_v5 = vld [vmem:[%s9692_s1 + $0x2e0] sm:$0xf]  ;;  %v6608_v6 = vld [vmem:[%s9692_s1 + $0x2ec] sm:$0xf0]  ;;  %v5301_v7 = vor.u32 %v6576_v4, %v5300_v2 }
   0xf   :  { %v5429_v8 = vor.u32 %v6608_v6, %v5428_v5  ;;  %v5556_v9 = vld [vmem:[%s9692_s1 + $0x3e0] sm:$0xf]  ;;  %v6640_v10 = vld [vmem:[%s9692_s1 + $0x3ec] sm:$0xf0]  ;;  %1438 = vmatpush.bf16.msra.mxu0 %v5173_v3 }
  0x10   :  { %v5156_v11 = vld [vmem:[%s9692_s1 + $0xc0] sm:$0xf]  ;;  %v5557_v12 = vor.u32 %v6640_v10, %v5556_v9  ;;  %v6540_v13 = vld [vmem:[%s9692_s1 + $0xcc] sm:$0xf0]  ;;  %1487 = vmatpush.bf16.msra.mxu1 %v5301_v7 }
  0x11   :  { %v5284_v14 = vld [vmem:[%s9692_s1 + $0x1c0] sm:$0xf]  ;;  %v6572_v15 = vld [vmem:[%s9692_s1 + $0x1cc] sm:$0xf0]  ;;  %1536 = vmatpush.bf16.msra.mxu2 %v5429_v8  ;;  %v5157_v16 = vor.u32 %v6540_v13, %v5156_v11 }
  0x12   :  { %v5285_v17 = vor.u32 %v6572_v15, %v5284_v14  ;;  %v5412_v18 = vld [vmem:[%s9692_s1 + $0x2c0] sm:$0xf]  ;;  %v6604_v19 = vld [vmem:[%s9692_s1 + $0x2cc] sm:$0xf0]  ;;  %1585 = vmatpush.bf16.msra.mxu3 %v5557_v12 }
  0x13   :  { %v5540_v20 = vld [vmem:[%s9692_s1 + $0x3c0] sm:$0xf]  ;;  %v5413_v21 = vor.u32 %v6604_v19, %v5412_v18  ;;  %v6636_v22 = vld [vmem:[%s9692_s1 + $0x3cc] sm:$0xf0]  ;;  %1439 = vmatpush.bf16.msra.mxu0 %v5157_v16 }
  0x14   :  { %v5140_v23 = vld [vmem:[%s9692_s1 + $0xa0] sm:$0xf]  ;;  %v6536_v24 = vld [vmem:[%s9692_s1 + $0xac] sm:$0xf0]  ;;  %v5541_v25 = vor.u32 %v6636_v22, %v5540_v20  ;;  %1488 = vmatpush.bf16.msra.mxu1 %v5285_v17 }
  0x15   :  { %v5268_v26 = vld [vmem:[%s9692_s1 + $0x1a0] sm:$0xf]  ;;  %v6568_v27 = vld [vmem:[%s9692_s1 + $0x1ac] sm:$0xf0]  ;;  %v5141_v29 = vor.u32 %v6536_v24, %v5140_v23  ;;  %1537 = vmatpush.bf16.msra.mxu2 %v5413_v21 }
  0x16   :  { %v5396_v28 = vld [vmem:[%s9692_s1 + $0x2a0] sm:$0xf]  ;;  %v6600_v30 = vld [vmem:[%s9692_s1 + $0x2ac] sm:$0xf0]  ;;  %v5269_v33 = vor.u32 %v6568_v27, %v5268_v26  ;;  %1586 = vmatpush.bf16.msra.mxu3 %v5541_v25 }
  0x17   :  { %v5524_v31 = vld [vmem:[%s9692_s1 + $0x3a0] sm:$0xf]  ;;  %v6632_v32 = vld [vmem:[%s9692_s1 + $0x3ac] sm:$0xf0]  ;;  %v5397_v34 = vor.u32 %v6600_v30, %v5396_v28  ;;  %1440 = vmatpush.bf16.msra.mxu0 %v5141_v29  ;;  %v66_v29 = vld [vmem:[%s9691_s0 + $0x38] sm:$0xff] }
  0x18   :  { %v5124_v35 = vld [vmem:[%s9692_s1 + $0x80] sm:$0xf]  ;;  %v6532_v36 = vld [vmem:[%s9692_s1 + $0x8c] sm:$0xf0]  ;;  %v5525_v38 = vor.u32 %v6632_v32, %v5524_v31  ;;  %1489 = vmatpush.bf16.msra.mxu1 %v5269_v33  ;;  %v60_v30 = vld [vmem:[%s9691_s0 + $0x8] sm:$0xff] }
  0x19   :  { %v5252_v37 = vld [vmem:[%s9692_s1 + $0x180] sm:$0xf]  ;;  %v6564_v39 = vld [vmem:[%s9692_s1 + $0x18c] sm:$0xf0]  ;;  %v5125_v44 = vor.u32 %v6532_v36, %v5124_v35  ;;  %1538 = vmatpush.bf16.msra.mxu2 %v5397_v34  ;;  %v6542_v35 = vld [vmem:[%s9692_s1 + $0xe4] sm:$0xf] }
  0x1a   :  { %v5380_v40 = vld [vmem:[%s9692_s1 + $0x280] sm:$0xf]  ;;  %v6596_v41 = vld [vmem:[%s9692_s1 + $0x28c] sm:$0xf0]  ;;  %v5253_v45 = vor.u32 %v6564_v39, %v5252_v37  ;;  %1587 = vmatpush.bf16.msra.mxu3 %v5525_v38  ;;  %v5174_v36 = vld [vmem:[%s9692_s1 + $0xf0] sm:$0xf0] }
  0x1b   :  { %v5508_v42 = vld [vmem:[%s9692_s1 + $0x380] sm:$0xf]  ;;  %v6628_v43 = vld [vmem:[%s9692_s1 + $0x38c] sm:$0xf0]  ;;  %v5381_v46 = vor.u32 %v6596_v41, %v5380_v40  ;;  %1441 = vmatpush.bf16.msra.mxu0 %v5125_v44  ;;  %v68_v40 = vld [vmem:[%s9691_s0 + $0x48] sm:$0xff] }
  0x1c   :  { %v5108_v47 = vld [vmem:[%s9692_s1 + $0x60] sm:$0xf]  ;;  %v6528_v48 = vld [vmem:[%s9692_s1 + $0x6c] sm:$0xf0]  ;;  %v5509_v50 = vor.u32 %v6628_v43, %v5508_v42  ;;  %1490 = vmatpush.bf16.msra.mxu1 %v5253_v45  ;;  %v62_v41 = vld [vmem:[%s9691_s0 + $0x18] sm:$0xff] }
  0x1d   :  { %v5236_v49 = vld [vmem:[%s9692_s1 + $0x160] sm:$0xf]  ;;  %v6560_v51 = vld [vmem:[%s9692_s1 + $0x16c] sm:$0xf0]  ;;  %v5109_v56 = vor.u32 %v6528_v48, %v5108_v47  ;;  %1539 = vmatpush.bf16.msra.mxu2 %v5381_v46  ;;  %v5177_v48 = vor.u32 %v6542_v35, %v5174_v36  ;;  %v96_v36 = vld [vmem:[%s9691_s0 + $0x128] sm:$0xff] }
  0x1e   :  { %v5364_v52 = vld [vmem:[%s9692_s1 + $0x260] sm:$0xf]  ;;  %v6592_v53 = vld [vmem:[%s9692_s1 + $0x26c] sm:$0xf0]  ;;  %v5237_v57 = vor.u32 %v6560_v51, %v5236_v49  ;;  %1588 = vmatpush.bf16.msra.mxu3 %v5509_v50 }
  0x1f   :  { %v5492_v54 = vld [vmem:[%s9692_s1 + $0x360] sm:$0xf]  ;;  %v6624_v55 = vld [vmem:[%s9692_s1 + $0x36c] sm:$0xf0]  ;;  %v5365_v58 = vor.u32 %v6592_v53, %v5364_v52  ;;  %1442 = vmatpush.bf16.msra.mxu0 %v5109_v56  ;;  %v6538_v53 = vld [vmem:[%s9692_s1 + $0xc4] sm:$0xf] }
  0x20   :  { %v5092_v59 = vld [vmem:[%s9692_s1 + $0x40] sm:$0xf]  ;;  %v6524_v60 = vld [vmem:[%s9692_s1 + $0x4c] sm:$0xf0]  ;;  %v5493_v62 = vor.u32 %v6624_v55, %v5492_v54  ;;  %1491 = vmatpush.bf16.msra.mxu1 %v5237_v57  ;;  %v5158_v54 = vld [vmem:[%s9692_s1 + $0xd0] sm:$0xf0] }
  0x21   :  { %v5220_v61 = vld [vmem:[%s9692_s1 + $0x140] sm:$0xf]  ;;  %v6556_v63 = vld [vmem:[%s9692_s1 + $0x14c] sm:$0xf0]  ;;  %v5093_v4 = vor.u32 %v6524_v60, %v5092_v59  ;;  %1540 = vmatpush.bf16.msra.mxu2 %v5365_v58  ;;  %v5161_v60 = vor.u32 %v6538_v53, %v5158_v54 }
  0x22   :  { %v5348_v0 = vld [vmem:[%s9692_s1 + $0x240] sm:$0xf]  ;;  %v6588_v1 = vld [vmem:[%s9692_s1 + $0x24c] sm:$0xf0]  ;;  %v5221_v5 = vor.u32 %v6556_v63, %v5220_v61  ;;  %1589 = vmatpush.bf16.msra.mxu3 %v5493_v62 }
  0x23   :  { %v5476_v2 = vld [vmem:[%s9692_s1 + $0x340] sm:$0xf]  ;;  %v6620_v3 = vld [vmem:[%s9692_s1 + $0x34c] sm:$0xf0]  ;;  %v5349_v6 = vor.u32 %v6588_v1, %v5348_v0  ;;  %1443 = vmatpush.bf16.msra.mxu0 %v5093_v4  ;;  %v6534_v0 = vld [vmem:[%s9692_s1 + $0xa4] sm:$0xf] }
  0x24   :  { %v5076_v7 = vld [vmem:[%s9692_s1 + $0x20] sm:$0xf]  ;;  %v6520_v8 = vld [vmem:[%s9692_s1 + $0x2c] sm:$0xf0]  ;;  %v5477_v10 = vor.u32 %v6620_v3, %v5476_v2  ;;  %1492 = vmatpush.bf16.msra.mxu1 %v5221_v5  ;;  %v5142_v4 = vld [vmem:[%s9692_s1 + $0xb0] sm:$0xf0] }
  0x25   :  { %v5204_v9 = vld [vmem:[%s9692_s1 + $0x120] sm:$0xf]  ;;  %v6552_v11 = vld [vmem:[%s9692_s1 + $0x12c] sm:$0xf0]  ;;  %v5077_v17 = vor.u32 %v6520_v8, %v5076_v7  ;;  %1541 = vmatpush.bf16.msra.mxu2 %v5349_v6  ;;  %v5145_v5 = vor.u32 %v6534_v0, %v5142_v4 }
  0x26   :  { %v5332_v12 = vld [vmem:[%s9692_s1 + $0x220] sm:$0xf]  ;;  %v6584_v13 = vld [vmem:[%s9692_s1 + $0x22c] sm:$0xf0]  ;;  %v5205_v21 = vor.u32 %v6552_v11, %v5204_v9  ;;  %1590 = vmatpush.bf16.msra.mxu3 %v5477_v10  ;;  %v80_v11 = vld [vmem:[%s9691_s0 + $0xa8] sm:$0xff] }
  0x27   :  { %v5460_v14 = vld [vmem:[%s9692_s1 + $0x320] sm:$0xf]  ;;  %v6616_v15 = vld [vmem:[%s9692_s1 + $0x32c] sm:$0xf0]  ;;  %v5333_v22 = vor.u32 %v6584_v13, %v5332_v12  ;;  %1444 = vmatpush.bf16.msra.mxu0 %v5077_v17  ;;  %v74_v12 = vld [vmem:[%s9691_s0 + $0x78] sm:$0xff] }
  0x28   :  { %v5060_v16 = vld [vmem:[%s9692_s1] sm:$0xf]  ;;  %v6516_v18 = vld [vmem:[%s9692_s1 + $0xc] sm:$0xf0]  ;;  %v5461_v26 = vor.u32 %v6616_v15, %v5460_v14  ;;  %1493 = vmatpush.bf16.msra.mxu1 %v5205_v21  ;;  %v82_v15 = vld [vmem:[%s9691_s0 + $0xb8] sm:$0xff] }
  0x29   :  { %v5188_v19 = vld [vmem:[%s9692_s1 + $0x100] sm:$0xf]  ;;  %v6548_v20 = vld [vmem:[%s9692_s1 + $0x10c] sm:$0xf0]  ;;  %v5061_v33 = vor.u32 %v6516_v18, %v5060_v16  ;;  %1542 = vmatpush.bf16.msra.mxu2 %v5333_v22  ;;  %v76_v16 = vld [vmem:[%s9691_s0 + $0x88] sm:$0xff] }
  0x2a   :  { %v5316_v23 = vld [vmem:[%s9692_s1 + $0x200] sm:$0xf]  ;;  %v6580_v24 = vld [vmem:[%s9692_s1 + $0x20c] sm:$0xf0]  ;;  %v5189_v37 = vor.u32 %v6548_v20, %v5188_v19  ;;  %1591 = vmatpush.bf16.msra.mxu3 %v5461_v26  ;;  %v5126_v26 = vld [vmem:[%s9692_s1 + $0x90] sm:$0xf0] }
  0x2b   :  { %v5444_v25 = vld [vmem:[%s9692_s1 + $0x300] sm:$0xf]  ;;  %v6612_v27 = vld [vmem:[%s9692_s1 + $0x30c] sm:$0xf0]  ;;  %v5317_v38 = vor.u32 %v6580_v24, %v5316_v23  ;;  %1445 = vmatpush.bf16.msra.mxu0 %v5061_v33  ;;  %v6530_v24 = vld [vmem:[%s9692_s1 + $0x84] sm:$0xf] }
  0x2c   :  { %v59_v28 = vld [vmem:[%s9691_s0] sm:$0xff]  ;;  %v6708_v32 = vld [vmem:[%s9692_s1 + $0x60c] sm:$0xf0]  ;;  %v5445_v42 = vor.u32 %v6612_v27, %v5444_v25  ;;  %1494 = vmatpush.bf16.msra.mxu1 %v5189_v37  ;;  %v88_v33 = vld [vmem:[%s9691_s0 + $0xe8] sm:$0xff] }
  0x2d   :  { %v5828_v31 = vld [vmem:[%s9692_s1 + $0x600] sm:$0xf]  ;;  %v61_v39 = vld [vmem:[%s9691_s0 + $0x10] sm:$0xff]  ;;  %v7265_v47 = vpack.c.bf16 %v66_v29, %v59_v28  ;;  %1543 = vmatpush.bf16.msra.mxu2 %v5317_v38  ;;  %v5129_v29 = vor.u32 %v6530_v24, %v5126_v26  ;;  %v90_v37 = vld [vmem:[%s9691_s0 + $0xf8] sm:$0xff] }
  0x2e   :  { %v67_v34 = vld [vmem:[%s9691_s0 + $0x40] sm:$0xff]  ;;  %v69_v43 = vld [vmem:[%s9691_s0 + $0x50] sm:$0xff]  ;;  %v5829_v44 = vor.u32 %v6708_v32, %v5828_v31  ;;  %v7275_v52 = vpack.c.bf16 %v68_v40, %v61_v39  ;;  %1592 = vmatpush.bf16.msra.mxu3 %v5445_v42  ;;  %v94_v32 = vld [vmem:[%s9691_s0 + $0x118] sm:$0xff] }
  0x2f   :  { %v5684_v45 = vld [vmem:[%s9692_s1 + $0x4e0] sm:$0xf]  ;;  %v6672_v46 = vld [vmem:[%s9692_s1 + $0x4ec] sm:$0xf0]  ;;  %9784 = vst [vmem:[#allocation8_spill] sm:$0xff] %v7265_v47  ;;  %v7273_v51 = vpack.c.bf16 %v67_v34, %v60_v30  ;;  %v7283_v55 = vpack.c.bf16 %v69_v43, %v62_v41  ;;  %1446 = vmatmul.bf16.vlgmr.msra.gmra.mxu0 %v7265_v47 }
  0x30   :  { %v5812_v49 = vld [vmem:[%s9692_s1 + $0x5e0] sm:$0xf]  ;;  %v6704_v50 = vld [vmem:[%s9692_s1 + $0x5ec] sm:$0xf0]  ;;  %v5685_v56 = vor.u32 %v6672_v46, %v5684_v45  ;;  %1544 = vmatmul.bf16.vlgmr.msra.gmra.mxu2 %v7275_v52  ;;  %v6526_v45 = vld [vmem:[%s9692_s1 + $0x64] sm:$0xf] }
  0x31   :  { %9785 = vst [vmem:[#allocation9_spill] sm:$0xff] %v7273_v51  ;;  %1739 = vmatpush.bf16.msrb.mxu2 %v5829_v44  ;;  %v5813_v57 = vor.u32 %v6704_v50, %v5812_v49  ;;  %v5668_v58 = vld [vmem:[%s9692_s1 + $0x4c0] sm:$0xf]  ;;  %v6668_v59 = vld [vmem:[%s9692_s1 + $0x4cc] sm:$0xf0]  ;;  %1495 = vmatmul.bf16.vlgmr.msra.gmra.mxu1 %v7273_v51 }
  0x32   :  { %1781 = vmatpush.bf16.msrb.mxu3 %v5177_v48  ;;  %v5796_v61 = vld [vmem:[%s9692_s1 + $0x5c0] sm:$0xf]  ;;  %v6700_v62 = vld [vmem:[%s9692_s1 + $0x5cc] sm:$0xf0]  ;;  %1634 = vmatpush.bf16.msrb.mxu0 %v5685_v56  ;;  %v5669_v63 = vor.u32 %v6668_v59, %v5668_v58  ;;  %v5110_v48 = vld [vmem:[%s9692_s1 + $0x70] sm:$0xf0] }
  0x33   :  { %1593 = vmatmul.bf16.vlgmr.msra.gmra.mxu3 %v7283_v55  ;;  %1683 = vmatpush.bf16.msrb.mxu1 %v5813_v57  ;;  %v5797_v1 = vor.u32 %v6700_v62, %v5796_v61  ;;  %v5652_v2 = vld [vmem:[%s9692_s1 + $0x4a0] sm:$0xf]  ;;  %v6664_v3 = vld [vmem:[%s9692_s1 + $0x4ac] sm:$0xf0]  ;;  %v5113_v53 = vor.u32 %v6526_v45, %v5110_v48  ;;  %v108_v57 = vld [vmem:[%s9691_s0 + $0x188] sm:$0xff] }
  0x34   :  { %v5780_v6 = vld [vmem:[%s9692_s1 + $0x5a0] sm:$0xf]  ;;  %v6696_v7 = vld [vmem:[%s9692_s1 + $0x5ac] sm:$0xf0]  ;;  %v5653_v8 = vor.u32 %v6664_v3, %v5652_v2  ;;  %v102_v58 = vld [vmem:[%s9691_s0 + $0x158] sm:$0xff] }
  0x35   :  { %v5781_v9 = vor.u32 %v6696_v7, %v5780_v6  ;;  %v73_v10 = vld [vmem:[%s9691_s0 + $0x70] sm:$0xff]  ;;  %v75_v14 = vld [vmem:[%s9691_s0 + $0x80] sm:$0xff]  ;;  %v110_v61 = vld [vmem:[%s9691_s0 + $0x198] sm:$0xff] }
  0x36   :  { %1782 = vmatpush.bf16.msrb.mxu3 %v5161_v60  ;;  %1635 = vmatpush.bf16.msrb.mxu0 %v5669_v63  ;;  %v81_v13 = vld [vmem:[%s9691_s0 + $0xb0] sm:$0xff]  ;;  %v83_v17 = vld [vmem:[%s9691_s0 + $0xc0] sm:$0xff]  ;;  %v7343_v18 = vpack.c.bf16 %v80_v11, %v73_v10  ;;  %v7347_v20 = vpack.c.bf16 %v82_v15, %v75_v14  ;;  %v104_v62 = vld [vmem:[%s9691_s0 + $0x168] sm:$0xff] }
  0x37   :  { %1684 = vmatpush.bf16.msrb.mxu1 %v5797_v1  ;;  %v7345_v19 = vpack.c.bf16 %v81_v13, %v74_v12  ;;  %v7349_v21 = vpack.c.bf16 %v83_v17, %v76_v16  ;;  %v5636_v22 = vld [vmem:[%s9692_s1 + $0x480] sm:$0xf]  ;;  %v6660_v23 = vld [vmem:[%s9692_s1 + $0x48c] sm:$0xf0]  ;;  %v6522_v6 = vld [vmem:[%s9692_s1 + $0x44] sm:$0xf] }
  0x38   :  { %9786 = vst [vmem:[#allocation10_spill] sm:$0xff] %v7343_v18  ;;  %v5637_v25 = vor.u32 %v6660_v23, %v5636_v22  ;;  %v5764_v27 = vld [vmem:[%s9692_s1 + $0x580] sm:$0xf]  ;;  %v6692_v28 = vld [vmem:[%s9692_s1 + $0x58c] sm:$0xf0]  ;;  %v122_v14 = vld [vmem:[%s9691_s0 + $0x1f8] sm:$0xff] }
  0x39   :  { %9787 = vst [vmem:[#allocation11_spill] sm:$0xff] %v7345_v19  ;;  %v5765_v30 = vor.u32 %v6692_v28, %v5764_v27  ;;  %v87_v31 = vld [vmem:[%s9691_s0 + $0xe0] sm:$0xff]  ;;  %v89_v35 = vld [vmem:[%s9691_s0 + $0xf0] sm:$0xff]  ;;  %v116_v15 = vld [vmem:[%s9691_s0 + $0x1c8] sm:$0xff] }
  0x3a   :  { %1783 = vmatpush.bf16.msrb.mxu3 %v5145_v5  ;;  %1636 = vmatpush.bf16.msrb.mxu0 %v5653_v8  ;;  %v95_v34 = vld [vmem:[%s9691_s0 + $0x120] sm:$0xff]  ;;  %v97_v38 = vld [vmem:[%s9691_s0 + $0x130] sm:$0xff]  ;;  %v7397_v39 = vpack.c.bf16 %v94_v32, %v87_v31  ;;  %v7401_v41 = vpack.c.bf16 %v96_v36, %v89_v35  ;;  %v124_v22 = vld [vmem:[%s9691_s0 + $0x208] sm:$0xff] }
  0x3b   :  { %1685 = vmatpush.bf16.msrb.mxu1 %v5781_v9  ;;  %v7399_v40 = vpack.c.bf16 %v95_v34, %v88_v33  ;;  %v7403_v42 = vpack.c.bf16 %v97_v38, %v90_v37  ;;  %v5620_v43 = vld [vmem:[%s9692_s1 + $0x460] sm:$0xf]  ;;  %v6656_v44 = vld [vmem:[%s9692_s1 + $0x46c] sm:$0xf0]  ;;  %v5094_v8 = vld [vmem:[%s9692_s1 + $0x50] sm:$0xf0] }
  0x3c   :  { %9788 = vst [vmem:[#allocation12_spill] sm:$0xff] %v7397_v39  ;;  %v5621_v46 = vor.u32 %v6656_v44, %v5620_v43  ;;  %v5748_v49 = vld [vmem:[%s9692_s1 + $0x560] sm:$0xf]  ;;  %v6688_v50 = vld [vmem:[%s9692_s1 + $0x56c] sm:$0xf0]  ;;  %v5097_v11 = vor.u32 %v6522_v6, %v5094_v8  ;;  %v118_v23 = vld [vmem:[%s9691_s0 + $0x1d8] sm:$0xff] }
  0x3d   :  { %9789 = vst [vmem:[#allocation13_spill] sm:$0xff] %v7399_v40  ;;  %v5749_v54 = vor.u32 %v6688_v50, %v5748_v49  ;;  %v101_v56 = vld [vmem:[%s9691_s0 + $0x150] sm:$0xff]  ;;  %v103_v60 = vld [vmem:[%s9691_s0 + $0x160] sm:$0xff]  ;;  %v136_v43 = vld [vmem:[%s9691_s0 + $0x268] sm:$0xff] }
  0x3e   :  { %1637 = vmatpush.bf16.msrb.mxu0 %v5637_v25  ;;  %1784 = vmatpush.bf16.msrb.mxu3 %v5129_v29  ;;  %v109_v59 = vld [vmem:[%s9691_s0 + $0x190] sm:$0xff]  ;;  %v111_v63 = vld [vmem:[%s9691_s0 + $0x1a0] sm:$0xff]  ;;  %v7451_v0 = vpack.c.bf16 %v108_v57, %v101_v56  ;;  %v7455_v2 = vpack.c.bf16 %v110_v61, %v103_v60  ;;  %v130_v44 = vld [vmem:[%s9691_s0 + $0x238] sm:$0xff] }
  0x3f   :  { %1451 = vmatmul.bf16.gmra.mxu0 %v7343_v18  ;;  %1686 = vmatpush.bf16.msrb.mxu1 %v5765_v30  ;;  %v7453_v1 = vpack.c.bf16 %v109_v59, %v102_v58  ;;  %v7457_v3 = vpack.c.bf16 %v111_v63, %v104_v62  ;;  %v5604_v4 = vld [vmem:[%s9692_s1 + $0x440] sm:$0xf]  ;;  %v6652_v5 = vld [vmem:[%s9692_s1 + $0x44c] sm:$0xf0]  ;;  %v6518_v31 = vld [vmem:[%s9692_s1 + $0x24] sm:$0xf] }
  0x40   :  { %1549 = vmatmul.bf16.gmra.mxu2 %v7347_v20  ;;  %9790 = vst [vmem:[#allocation14_spill] sm:$0xff] %v7451_v0  ;;  %v5605_v7 = vor.u32 %v6652_v5, %v5604_v4  ;;  %v5732_v9 = vld [vmem:[%s9692_s1 + $0x540] sm:$0xf]  ;;  %v6684_v10 = vld [vmem:[%s9692_s1 + $0x54c] sm:$0xf0]  ;;  %v138_v48 = vld [vmem:[%s9691_s0 + $0x278] sm:$0xff] }
  0x41   :  { %1500 = vmatmul.bf16.gmra.mxu1 %v7345_v19  ;;  %9791 = vst [vmem:[#allocation15_spill] sm:$0xff] %v7453_v1  ;;  %v5733_v12 = vor.u32 %v6684_v10, %v5732_v9  ;;  %v115_v13 = vld [vmem:[%s9691_s0 + $0x1c0] sm:$0xff]  ;;  %v117_v17 = vld [vmem:[%s9691_s0 + $0x1d0] sm:$0xff]  ;;  %v132_v49 = vld [vmem:[%s9691_s0 + $0x248] sm:$0xff] }
  0x42   :  { %1638 = vmatpush.bf16.msrb.mxu0 %v5621_v46  ;;  %1785 = vmatpush.bf16.msrb.mxu3 %v5113_v53  ;;  %v123_v16 = vld [vmem:[%s9691_s0 + $0x200] sm:$0xff]  ;;  %v125_v24 = vld [vmem:[%s9691_s0 + $0x210] sm:$0xff]  ;;  %v7505_v25 = vpack.c.bf16 %v122_v14, %v115_v13  ;;  %v7509_v27 = vpack.c.bf16 %v124_v22, %v117_v17  ;;  %v150_v8 = vld [vmem:[%s9691_s0 + $0x2d8] sm:$0xff] }
  0x43   :  { %1598 = vmatmul.bf16.gmra.mxu3 %v7349_v21  ;;  %1687 = vmatpush.bf16.msrb.mxu1 %v5749_v54  ;;  %v7507_v26 = vpack.c.bf16 %v123_v16, %v116_v15  ;;  %v7511_v28 = vpack.c.bf16 %v125_v24, %v118_v23  ;;  %v5588_v29 = vld [vmem:[%s9692_s1 + $0x420] sm:$0xf]  ;;  %v6648_v30 = vld [vmem:[%s9692_s1 + $0x42c] sm:$0xf0]  ;;  %v5078_v33 = vld [vmem:[%s9692_s1 + $0x30] sm:$0xf0] }
  0x44   :  { %9792 = vst [vmem:[#allocation16_spill] sm:$0xff] %v7505_v25  ;;  %v5589_v32 = vor.u32 %v6648_v30, %v5588_v29  ;;  %v5716_v34 = vld [vmem:[%s9692_s1 + $0x520] sm:$0xf]  ;;  %v6680_v35 = vld [vmem:[%s9692_s1 + $0x52c] sm:$0xf0]  ;;  %v5081_v36 = vor.u32 %v6518_v31, %v5078_v33  ;;  %v144_v9 = vld [vmem:[%s9691_s0 + $0x2a8] sm:$0xff] }
  0x45   :  { %9793 = vst [vmem:[#allocation17_spill] sm:$0xff] %v7507_v26  ;;  %v5717_v37 = vor.u32 %v6680_v35, %v5716_v34  ;;  %v129_v38 = vld [vmem:[%s9691_s0 + $0x230] sm:$0xff]  ;;  %v131_v46 = vld [vmem:[%s9691_s0 + $0x240] sm:$0xff]  ;;  %v146_v13 = vld [vmem:[%s9691_s0 + $0x2b8] sm:$0xff] }
  0x46   :  { %1639 = vmatpush.bf16.msrb.mxu0 %v5605_v7  ;;  %1786 = vmatpush.bf16.msrb.mxu3 %v5097_v11  ;;  %v137_v45 = vld [vmem:[%s9691_s0 + $0x270] sm:$0xff]  ;;  %v139_v50 = vld [vmem:[%s9691_s0 + $0x280] sm:$0xff]  ;;  %v7559_v53 = vpack.c.bf16 %v136_v43, %v129_v38  ;;  %v7563_v56 = vpack.c.bf16 %v138_v48, %v131_v46 }
  0x47   :  { %1688 = vmatpush.bf16.msrb.mxu1 %v5733_v12  ;;  %v7561_v54 = vpack.c.bf16 %v137_v45, %v130_v44  ;;  %v7565_v57 = vpack.c.bf16 %v139_v50, %v132_v49  ;;  %v5572_v58 = vld [vmem:[%s9692_s1 + $0x400] sm:$0xf]  ;;  %v6644_v59 = vld [vmem:[%s9692_s1 + $0x40c] sm:$0xf0]  ;;  %v6514_v60 = vld [vmem:[%s9692_s1 + $0x4] sm:$0xf] }
  0x48   :  { %9794 = vst [vmem:[#allocation18_spill] sm:$0xff] %v7559_v53  ;;  %v5573_v61 = vor.u32 %v6644_v59, %v5572_v58  ;;  %v5062_v62 = vld [vmem:[%s9692_s1 + $0x10] sm:$0xf0]  ;;  %v5700_v63 = vld [vmem:[%s9692_s1 + $0x500] sm:$0xf]  ;;  %v152_v12 = vld [vmem:[%s9691_s0 + $0x2e8] sm:$0xff] }
  0x49   :  { %9795 = vst [vmem:[#allocation19_spill] sm:$0xff] %v7561_v54  ;;  %v6676_v4 = vld [vmem:[%s9692_s1 + $0x50c] sm:$0xf0]  ;;  %v5065_v5 = vor.u32 %v6514_v60, %v5062_v62  ;;  %v143_v7 = vld [vmem:[%s9691_s0 + $0x2a0] sm:$0xff]  ;;  %v5558_v24 = vld [vmem:[%s9692_s1 + $0x3f0] sm:$0xf0] }
  0x4a   :  { %1640 = vmatpush.bf16.msrb.mxu0 %v5589_v32  ;;  %1787 = vmatpush.bf16.msrb.mxu3 %v5081_v36  ;;  %v5701_v6 = vor.u32 %v6676_v4, %v5700_v63  ;;  %v151_v10 = vld [vmem:[%s9691_s0 + $0x2e0] sm:$0xff]  ;;  %v145_v11 = vld [vmem:[%s9691_s0 + $0x2b0] sm:$0xff]  ;;  %v7613_v15 = vpack.c.bf16 %v150_v8, %v143_v7  ;;  %v164_v44 = vld [vmem:[%s9691_s0 + $0x348] sm:$0xff] }
  0x4b   :  { %1689 = vmatpush.bf16.msrb.mxu1 %v5717_v37  ;;  %v153_v14 = vld [vmem:[%s9691_s0 + $0x2f0] sm:$0xff]  ;;  %v7615_v16 = vpack.c.bf16 %v151_v10, %v144_v9  ;;  %v7617_v17 = vpack.c.bf16 %v152_v12, %v145_v11  ;;  %v6638_v23 = vld [vmem:[%s9692_s1 + $0x3e4] sm:$0xf]  ;;  %v158_v45 = vld [vmem:[%s9691_s0 + $0x318] sm:$0xff] }
  0x4c   :  { %9796 = vst [vmem:[#allocation20_spill] sm:$0xff] %v7613_v15  ;;  %v7619_v22 = vpack.c.bf16 %v153_v14, %v146_v13  ;;  %v6574_v29 = vld [vmem:[%s9692_s1 + $0x1e4] sm:$0xf]  ;;  %v5561_v30 = vor.u32 %v6638_v23, %v5558_v24  ;;  %v5302_v31 = vld [vmem:[%s9692_s1 + $0x1f0] sm:$0xf0]  ;;  %v166_v49 = vld [vmem:[%s9691_s0 + $0x358] sm:$0xff] }
  0x4d   :  { %9797 = vst [vmem:[#allocation21_spill] sm:$0xff] %v7615_v16  ;;  %v6670_v32 = vld [vmem:[%s9692_s1 + $0x4e4] sm:$0xf]  ;;  %v5686_v33 = vld [vmem:[%s9692_s1 + $0x4f0] sm:$0xf0]  ;;  %v5305_v34 = vor.u32 %v6574_v29, %v5302_v31  ;;  %v160_v50 = vld [vmem:[%s9691_s0 + $0x328] sm:$0xff] }
  0x4e   :  { %1641 = vmatpush.bf16.msrb.mxu0 %v5573_v61  ;;  %1788 = vmatpush.bf16.msrb.mxu3 %v5065_v5  ;;  %v5689_v35 = vor.u32 %v6670_v32, %v5686_v33  ;;  %v6606_v36 = vld [vmem:[%s9692_s1 + $0x2e4] sm:$0xf]  ;;  %v5430_v37 = vld [vmem:[%s9692_s1 + $0x2f0] sm:$0xf0]  ;;  %v423_v12 = vld [vmem:[%s9693_s2] sm:$0xf] }
  0x4f   :  { %1456 = vmatmul.bf16.gmra.mxu0 %v7397_v39  ;;  %1690 = vmatpush.bf16.msrb.mxu1 %v5701_v6  ;;  %v5433_v38 = vor.u32 %v6606_v36, %v5430_v37  ;;  %v157_v43 = vld [vmem:[%s9691_s0 + $0x310] sm:$0xff]  ;;  %v159_v48 = vld [vmem:[%s9691_s0 + $0x320] sm:$0xff]  ;;  %v70_v29 = vld [vmem:[%s9691_s0 + $0x58] sm:$0xff]  ;;  %v7721_v31 = vperm.slane %v423_v12, 0 }
  0x50   :  { %1554 = vmatmul.bf16.gmra.mxu2 %v7401_v41  ;;  %v165_v46 = vld [vmem:[%s9691_s0 + $0x350] sm:$0xff]  ;;  %v167_v58 = vld [vmem:[%s9691_s0 + $0x360] sm:$0xff]  ;;  %v7673_v59 = vpack.c.bf16 %v164_v44, %v157_v43  ;;  %v7677_v61 = vpack.c.bf16 %v166_v49, %v159_v48 }
  0x51   :  { %1505 = vmatmul.bf16.gmra.mxu1 %v7399_v40  ;;  %1928 = vmatpush.bf16.msra.mxu2 %v5561_v30  ;;  %v7675_v60 = vpack.c.bf16 %v165_v46, %v158_v45  ;;  %v7679_v62 = vpack.c.bf16 %v167_v58, %v160_v50  ;;  %v6634_v63 = vld [vmem:[%s9692_s1 + $0x3c4] sm:$0xf]  ;;  %v5542_v4 = vld [vmem:[%s9692_s1 + $0x3d0] sm:$0xf0]  ;;  %v64_v30 = vld [vmem:[%s9691_s0 + $0x28] sm:$0xff] }
  0x52   :  { %1830 = vmatpush.bf16.msra.mxu0 %v5305_v34  ;;  %1977 = vmatpush.bf16.msra.mxu3 %v5689_v35  ;;  %9798 = vst [vmem:[#allocation22_spill] sm:$0xff] %v7673_v59  ;;  %v6570_v5 = vld [vmem:[%s9692_s1 + $0x1c4] sm:$0xf]  ;;  %v5545_v6 = vor.u32 %v6634_v63, %v5542_v4  ;;  %v5286_v7 = vld [vmem:[%s9692_s1 + $0x1d0] sm:$0xf0]  ;;  %v72_v34 = vld [vmem:[%s9691_s0 + $0x68] sm:$0xff] }
  0x53   :  { %1603 = vmatmul.bf16.gmra.mxu3 %v7403_v42  ;;  %1879 = vmatpush.bf16.msra.mxu1 %v5433_v38  ;;  %9799 = vst [vmem:[#allocation23_spill] sm:$0xff] %v7675_v60  ;;  %v6666_v8 = vld [vmem:[%s9692_s1 + $0x4c4] sm:$0xf]  ;;  %v5670_v9 = vld [vmem:[%s9692_s1 + $0x4d0] sm:$0xf0]  ;;  %v5289_v10 = vor.u32 %v6570_v5, %v5286_v7 }
  0x54   :  { %9800 = vst [vmem:[#allocation24_spill] sm:$0xff] %v7677_v61  ;;  %v5673_v11 = vor.u32 %v6666_v8, %v5670_v9  ;;  %v6602_v13 = vld [vmem:[%s9692_s1 + $0x2c4] sm:$0xf]  ;;  %v5414_v14 = vld [vmem:[%s9692_s1 + $0x2d0] sm:$0xf0] }
  0x55   :  { %9801 = vst [vmem:[#allocation25_spill] sm:$0xff] %v7679_v62  ;;  %1929 = vmatpush.bf16.msra.mxu2 %v5545_v6  ;;  %v5417_v23 = vor.u32 %v6602_v13, %v5414_v14  ;;  %v63_v24 = vld [vmem:[%s9691_s0 + $0x20] sm:$0xff]  ;;  %v65_v33 = vld [vmem:[%s9691_s0 + $0x30] sm:$0xff] }
  0x56   :  { %1831 = vmatpush.bf16.msra.mxu0 %v5289_v10  ;;  %1978 = vmatpush.bf16.msra.mxu3 %v5673_v11  ;;  %v71_v32 = vld [vmem:[%s9691_s0 + $0x60] sm:$0xff]  ;;  %v7732_v35 = vpack.c.bf16 %v70_v29, %v63_v24  ;;  %v7736_v38 = vpack.c.bf16 %v72_v34, %v65_v33  ;;  %v5526_v48 = vld [vmem:[%s9692_s1 + $0x3b0] sm:$0xf0]  ;;  %v78_v33 = vld [vmem:[%s9691_s0 + $0x98] sm:$0xff] }
  0x57   :  { %1880 = vmatpush.bf16.msra.mxu1 %v5417_v23  ;;  %v7734_v37 = vpack.c.bf16 %v71_v32, %v64_v30  ;;  %v6630_v46 = vld [vmem:[%s9692_s1 + $0x3a4] sm:$0xf]  ;;  %v5270_v58 = vld [vmem:[%s9692_s1 + $0x1b0] sm:$0xf0]  ;;  %v84_v32 = vld [vmem:[%s9691_s0 + $0xc8] sm:$0xff] }
  0x58   :  { %9802 = vst [vmem:[#allocation26_spill] sm:$0xff] %v7732_v35  ;;  %v6566_v49 = vld [vmem:[%s9692_s1 + $0x1a4] sm:$0xf]  ;;  %v5529_v50 = vor.u32 %v6630_v46, %v5526_v48  ;;  %v5654_v4 = vld [vmem:[%s9692_s1 + $0x4b0] sm:$0xf0] }
  0x59   :  { %9803 = vst [vmem:[#allocation27_spill] sm:$0xff] %v7734_v37  ;;  %v6662_v63 = vld [vmem:[%s9692_s1 + $0x4a4] sm:$0xf]  ;;  %v5273_v6 = vor.u32 %v6566_v49, %v5270_v58  ;;  %v5398_v23 = vld [vmem:[%s9692_s1 + $0x2b0] sm:$0xf0] }
  0x5a   :  { %9804 = vst [vmem:[#allocation28_spill] sm:$0xff] %v7736_v38  ;;  %v5657_v7 = vor.u32 %v6662_v63, %v5654_v4  ;;  %1930 = vmatpush.bf16.msra.mxu2 %v5529_v50  ;;  %v6598_v14 = vld [vmem:[%s9692_s1 + $0x2a4] sm:$0xf]  ;;  %v77_v30 = vld [vmem:[%s9691_s0 + $0x90] sm:$0xff] }
  0x5b   :  { %1832 = vmatpush.bf16.msra.mxu0 %v5273_v6  ;;  %v5401_v29 = vor.u32 %v6598_v14, %v5398_v23  ;;  %v85_v34 = vld [vmem:[%s9691_s0 + $0xd0] sm:$0xff] }
  0x5c   :  { %1979 = vmatpush.bf16.msra.mxu3 %v5657_v7  ;;  %v7791_v50 = vpack.c.bf16 %v85_v34, %v78_v33  ;;  %v6626_v7 = vld [vmem:[%s9692_s1 + $0x384] sm:$0xf]  ;;  %v5638_v14 = vld [vmem:[%s9692_s1 + $0x490] sm:$0xf0] }
  0x5d   :  { %1881 = vmatpush.bf16.msra.mxu1 %v5401_v29 }
  0x5e   :  { %9805 = vst [vmem:[#allocation29_spill] sm:$0xff] %v7791_v50 }
  0x5f   :  { %1461 = vmatmul.bf16.gmra.mxu0 %v7451_v0 }
  0x60   :  { %1559 = vmatmul.bf16.gmra.mxu2 %v7455_v2 }
  0x61   :  { %1510 = vmatmul.bf16.gmra.mxu1 %v7453_v1 }
  0x63   :  { %1608 = vmatmul.bf16.gmra.mxu3 %v7457_v3 }
  0x6f   :  { %1466 = vmatmul.bf16.gmra.mxu0 %v7505_v25 }
  0x70   :  { %1564 = vmatmul.bf16.gmra.mxu2 %v7509_v27 }
  0x71   :  { %1515 = vmatmul.bf16.gmra.mxu1 %v7507_v26 }
  0x73   :  { %1613 = vmatmul.bf16.gmra.mxu3 %v7511_v28 }
  0x7f   :  { %1471 = vmatmul.bf16.gmra.mxu0 %v7559_v53 }
  0x80   :  { %1569 = vmatmul.bf16.gmra.mxu2 %v7563_v56 }
  0x81   :  { %1520 = vmatmul.bf16.gmra.mxu1 %v7561_v54 }
  0x83   :  { %1618 = vmatmul.bf16.gmra.mxu3 %v7565_v57 }
  0x8f   :  { %1476 = vmatmul.bf16.gmra.mxu0 %v7613_v15 }
  0x90   :  { %1574 = vmatmul.bf16.gmra.mxu2 %v7617_v17 }
  0x91   :  { %1525 = vmatmul.bf16.gmra.mxu1 %v7615_v16 }
  0x93   :  { %1623 = vmatmul.bf16.gmra.mxu3 %v7619_v22 }
  0x9f   :  { %1481 = vmatmul.bf16.gmra.mxu0 %v7673_v59 }
  0xa0   :  { %1579 = vmatmul.bf16.gmra.mxu2 %v7677_v61 }
  0xa1   :  { %1530 = vmatmul.bf16.gmra.mxu1 %v7675_v60 }
  0xa3   :  { %1628 = vmatmul.bf16.gmra.mxu3 %v7679_v62 }
  0xac   :  { %v1447_v36 = vpop.f32.mrf.mxu0 }
  0xad   :  { %v1448_v43 = vadd.f32 %v1447_v36, %v7721_v31  ;;  %v79_v36 = vld [vmem:[%s9691_s0 + $0xa0] sm:$0xff] }
  0xae   :  { %v1496_v44 = vpop.f32.mrf.mxu1 }
  0xaf   :  { %v1497_v45 = vadd.f32 %v1496_v44, %v1448_v43  ;;  %1642 = vmatmul.bf16.vlgmr.msrb.gmra.mxu0 %v7732_v35  ;;  %v86_v43 = vld [vmem:[%s9691_s0 + $0xd8] sm:$0xff] }
  0xb0   :  { %5842 = vmatmul.msk.bf16.vlgmr.msrb.gmra.mxu2 %vm1413_vm0, %v7736_v38  ;;  %v7793_v58 = vpack.c.bf16 %v86_v43, %v79_v36 }
  0xb1   :  { %1691 = vmatmul.bf16.vlgmr.msrb.gmra.mxu1 %v7734_v37 }
  0xb2   :  { %9806 = vst [vmem:[#allocation30_spill] sm:$0xff] %v7793_v58 }
  0xb3   :  { %1789 = vmatmul.bf16.vlgmr.msrb.gmra.mxu3 %v7265_v47  ;;  %v1545_v5 = vpop.f32.mrf.mxu2 }
  0xb4   :  { %v1546_v8 = vadd.f32 %v1545_v5, %v1497_v45  ;;  %v1449_v10 = vpop.f32.mrf.mxu0  ;;  %v7789_v45 = vpack.c.bf16 %v84_v32, %v77_v30 }
  0xb5   :  { %v1450_v11 = vadd.f32 %v1449_v10, %v7721_v31 }
  0xb6   :  { %v1594_v9 = vpop.f32.mrf.mxu3  ;;  %v1498_v12 = vpop.f32.mrf.mxu1 }
  0xb7   :  { %v7763_v13 = vadd.f32 %v1594_v9, %v1546_v8  ;;  %v1499_v24 = vadd.f32 %v1498_v12, %v1450_v11  ;;  %v5510_v8 = vld [vmem:[%s9692_s1 + $0x390] sm:$0xf0]  ;;  %v6562_v9 = vld [vmem:[%s9692_s1 + $0x184] sm:$0xf] }
  0xb8   :  { %v5513_v10 = vor.u32 %v6626_v7, %v5510_v8  ;;  %v5254_v11 = vld [vmem:[%s9692_s1 + $0x190] sm:$0xf0]  ;;  %v6658_v12 = vld [vmem:[%s9692_s1 + $0x484] sm:$0xf] }
  0xb9   :  { %v5641_v29 = vor.u32 %v6658_v12, %v5638_v14  ;;  %v99_v7 = vld [vmem:[%s9691_s0 + $0x140] sm:$0xff]  ;;  %v93_v8 = vld [vmem:[%s9691_s0 + $0x110] sm:$0xff] }
  0xba   :  { %1931 = vmatpush.bf16.msra.mxu2 %v5513_v10 }
  0xbb   :  { %v1547_v44 = vpop.f32.mrf.mxu2  ;;  %1980 = vmatpush.bf16.msra.mxu3 %v5641_v29 }
  0xbc   :  { %v1548_v46 = vadd.f32 %v1547_v44, %v1499_v24  ;;  %v1452_v49 = vpop.f32.mrf.mxu0  ;;  %v5257_v24 = vor.u32 %v6562_v9, %v5254_v11  ;;  %v6594_v44 = vld [vmem:[%s9692_s1 + $0x284] sm:$0xf]  ;;  %v100_v9 = vld [vmem:[%s9691_s0 + $0x148] sm:$0xff] }
  0xbd   :  { %v1453_v63 = vadd.f32 %v1452_v49, %v7721_v31  ;;  %v7852_v29 = vpack.c.bf16 %v100_v9, %v93_v8 }
  0xbe   :  { %v1596_v48 = vpop.f32.mrf.mxu3  ;;  %v1501_v4 = vpop.f32.mrf.mxu1  ;;  %1833 = vmatpush.bf16.msra.mxu0 %v5257_v24 }
  0xbf   :  { %v7796_v5 = vadd.f32 %v1596_v48, %v1548_v46  ;;  %v1502_v6 = vadd.f32 %v1501_v4, %v1453_v63  ;;  %1647 = vmatmul.bf16.gmra.mxu0 %v7789_v45  ;;  %v5382_v46 = vld [vmem:[%s9692_s1 + $0x290] sm:$0xf0]  ;;  %v91_v63 = vld [vmem:[%s9691_s0 + $0x100] sm:$0xff]  ;;  %v98_v4 = vld [vmem:[%s9691_s0 + $0x138] sm:$0xff]  ;;  %9808 = vst [vmem:[#allocation32_spill] sm:$0xff] %v7852_v29 }
  0xc0   :  { %5843 = vmatmul.msk.bf16.gmra.mxu2 %vm1413_vm0, %v7793_v58  ;;  %v5385_v49 = vor.u32 %v6594_v44, %v5382_v46  ;;  %v7848_v11 = vpack.c.bf16 %v98_v4, %v91_v63  ;;  %v5494_v44 = vld [vmem:[%s9692_s1 + $0x370] sm:$0xf0]  ;;  %v6558_v46 = vld [vmem:[%s9692_s1 + $0x164] sm:$0xf] }
  0xc1   :  { %1696 = vmatmul.bf16.gmra.mxu1 %v7791_v50  ;;  %v6654_v63 = vld [vmem:[%s9692_s1 + $0x464] sm:$0xf]  ;;  %v5622_v4 = vld [vmem:[%s9692_s1 + $0x470] sm:$0xf0] }
  0xc2   :  { %1882 = vmatpush.bf16.msra.mxu1 %v5385_v49  ;;  %v5238_v49 = vld [vmem:[%s9692_s1 + $0x170] sm:$0xf0]  ;;  %v5625_v8 = vor.u32 %v6654_v63, %v5622_v4  ;;  %v107_v4 = vld [vmem:[%s9691_s0 + $0x180] sm:$0xff] }
  0xc3   :  { %1794 = vmatmul.bf16.gmra.mxu3 %v7343_v18  ;;  %v1550_v23 = vpop.f32.mrf.mxu2  ;;  %v113_v63 = vld [vmem:[%s9691_s0 + $0x1b0] sm:$0xff] }
  0xc4   :  { %v1551_v30 = vadd.f32 %v1550_v23, %v1502_v6  ;;  %v1454_v33 = vpop.f32.mrf.mxu0  ;;  %v92_v6 = vld [vmem:[%s9691_s0 + $0x108] sm:$0xff]  ;;  %1981 = vmatpush.bf16.msra.mxu3 %v5625_v8 }
  0xc5   :  { %v1455_v34 = vadd.f32 %v1454_v33, %v7721_v31  ;;  %v7850_v24 = vpack.c.bf16 %v99_v7, %v92_v6  ;;  %v5241_v7 = vor.u32 %v6558_v46, %v5238_v49  ;;  %v105_v46 = vld [vmem:[%s9691_s0 + $0x170] sm:$0xff]  ;;  %v106_v49 = vld [vmem:[%s9691_s0 + $0x178] sm:$0xff] }
  0xc6   :  { %v1599_v32 = vpop.f32.mrf.mxu3  ;;  %v1503_v36 = vpop.f32.mrf.mxu1 }
  0xc7   :  { %v7822_v43 = vadd.f32 %v1599_v32, %v1551_v30  ;;  %v1504_v48 = vadd.f32 %v1503_v36, %v1455_v34  ;;  %9807 = vst [vmem:[#allocation31_spill] sm:$0xff] %v7850_v24  ;;  %v6622_v36 = vld [vmem:[%s9692_s1 + $0x364] sm:$0xf]  ;;  %1834 = vmatpush.bf16.msra.mxu0 %v5241_v7 }
  0xcb   :  { %v1552_v10 = vpop.f32.mrf.mxu2 }
  0xcc   :  { %v1553_v12 = vadd.f32 %v1552_v10, %v1504_v48  ;;  %v1457_v23 = vpop.f32.mrf.mxu0  ;;  %v5497_v48 = vor.u32 %v6622_v36, %v5494_v44  ;;  %v5366_v36 = vld [vmem:[%s9692_s1 + $0x270] sm:$0xf0] }
  0xcd   :  { %v1458_v30 = vadd.f32 %v1457_v23, %v7721_v31 }
  0xce   :  { %v1601_v14 = vpop.f32.mrf.mxu3  ;;  %v1506_v32 = vpop.f32.mrf.mxu1  ;;  %1932 = vmatpush.bf16.msra.mxu2 %v5497_v48  ;;  %v112_v48 = vld [vmem:[%s9691_s0 + $0x1a8] sm:$0xff] }
  0xcf   :  { %v7855_v33 = vadd.f32 %v1601_v14, %v1553_v12  ;;  %v1507_v34 = vadd.f32 %v1506_v32, %v1458_v30  ;;  %1652 = vmatmul.bf16.gmra.mxu0 %v7848_v11  ;;  %v6590_v32 = vld [vmem:[%s9692_s1 + $0x264] sm:$0xf]  ;;  %v7907_v8 = vpack.c.bf16 %v112_v48, %v105_v46 }
  0xd0   :  { %5844 = vmatmul.msk.bf16.gmra.mxu2 %vm1413_vm0, %v7852_v29  ;;  %v6554_v46 = vld [vmem:[%s9692_s1 + $0x144] sm:$0xf] }
  0xd1   :  { %1701 = vmatmul.bf16.gmra.mxu1 %v7850_v24 }
  0xd3   :  { %1799 = vmatmul.bf16.gmra.mxu3 %v7397_v39  ;;  %v1555_v6 = vpop.f32.mrf.mxu2 }
  0xd4   :  { %v1556_v9 = vadd.f32 %v1555_v6, %v1507_v34  ;;  %v1459_v12 = vpop.f32.mrf.mxu0  ;;  %v5369_v34 = vor.u32 %v6590_v32, %v5366_v36  ;;  %v114_v6 = vld [vmem:[%s9691_s0 + $0x1b8] sm:$0xff] }
  0xd5   :  { %v1460_v14 = vadd.f32 %v1459_v12, %v7721_v31 }
  0xd6   :  { %v1604_v10 = vpop.f32.mrf.mxu3  ;;  %v1508_v23 = vpop.f32.mrf.mxu1  ;;  %1883 = vmatpush.bf16.msra.mxu1 %v5369_v34  ;;  %v5478_v34 = vld [vmem:[%s9692_s1 + $0x350] sm:$0xf0] }
  0xd7   :  { %v7881_v30 = vadd.f32 %v1604_v10, %v1556_v9  ;;  %v1509_v44 = vadd.f32 %v1508_v23, %v1460_v14  ;;  %v7909_v14 = vpack.c.bf16 %v113_v63, %v106_v49  ;;  %v7911_v23 = vpack.c.bf16 %v114_v6, %v107_v4  ;;  %v5222_v49 = vld [vmem:[%s9692_s1 + $0x150] sm:$0xf0]  ;;  %v6650_v63 = vld [vmem:[%s9692_s1 + $0x444] sm:$0xf] }
  0xd8   :  { %v5606_v4 = vld [vmem:[%s9692_s1 + $0x450] sm:$0xf0] }
  0xd9   :  { %9809 = vst [vmem:[#allocation33_spill] sm:$0xff] %v7909_v14 }
  0xda   :  { %9810 = vst [vmem:[#allocation34_spill] sm:$0xff] %v7911_v23 }
  0xdb   :  { %v1557_v7 = vpop.f32.mrf.mxu2 }
  0xdc   :  { %v1558_v9 = vadd.f32 %v1557_v7, %v1509_v44  ;;  %v1462_v12 = vpop.f32.mrf.mxu0  ;;  %v6618_v44 = vld [vmem:[%s9692_s1 + $0x344] sm:$0xf]  ;;  %v5225_v7 = vor.u32 %v6554_v46, %v5222_v49  ;;  %v5350_v46 = vld [vmem:[%s9692_s1 + $0x250] sm:$0xf0] }
  0xdd   :  { %v1463_v32 = vadd.f32 %v1462_v12, %v7721_v31  ;;  %v5481_v48 = vor.u32 %v6618_v44, %v5478_v34 }
  0xde   :  { %v1606_v10 = vpop.f32.mrf.mxu3  ;;  %v1511_v36 = vpop.f32.mrf.mxu1  ;;  %1835 = vmatpush.bf16.msra.mxu0 %v5225_v7  ;;  %v128_v7 = vld [vmem:[%s9691_s0 + $0x228] sm:$0xff] }
  0xdf   :  { %v7914_v39 = vadd.f32 %v1606_v10, %v1558_v9  ;;  %v1512_v29 = vadd.f32 %v1511_v36, %v1463_v32  ;;  %1657 = vmatmul.bf16.gmra.mxu0 %v7907_v8  ;;  %v5609_v9 = vor.u32 %v6650_v63, %v5606_v4  ;;  %1933 = vmatpush.bf16.msra.mxu2 %v5481_v48  ;;  %v119_v48 = vld [vmem:[%s9691_s0 + $0x1e0] sm:$0xff]  ;;  %v126_v63 = vld [vmem:[%s9691_s0 + $0x218] sm:$0xff]  ;;  %v120_v4 = vld [vmem:[%s9691_s0 + $0x1e8] sm:$0xff] }
  0xe0   :  { %5845 = vmatmul.msk.bf16.gmra.mxu2 %vm1413_vm0, %v7911_v23 }
  0xe1   :  { %1706 = vmatmul.bf16.gmra.mxu1 %v7909_v14  ;;  %1982 = vmatpush.bf16.msra.mxu3 %v5609_v9 }
  0xe3   :  { %1804 = vmatmul.bf16.gmra.mxu3 %v7451_v0  ;;  %v1560_v6 = vpop.f32.mrf.mxu2  ;;  %v6586_v0 = vld [vmem:[%s9692_s1 + $0x244] sm:$0xf] }
  0xe4   :  { %v1561_v10 = vadd.f32 %v1560_v6, %v1512_v29  ;;  %v1464_v32 = vpop.f32.mrf.mxu0  ;;  %v5353_v29 = vor.u32 %v6586_v0, %v5350_v46  ;;  %v127_v6 = vld [vmem:[%s9691_s0 + $0x220] sm:$0xff]  ;;  %v121_v0 = vld [vmem:[%s9691_s0 + $0x1f0] sm:$0xff] }
  0xe5   :  { %v1465_v36 = vadd.f32 %v1464_v32, %v7721_v31  ;;  %v7970_v46 = vpack.c.bf16 %v128_v7, %v121_v0 }
  0xe6   :  { %v1609_v12 = vpop.f32.mrf.mxu3  ;;  %v1513_v44 = vpop.f32.mrf.mxu1  ;;  %1884 = vmatpush.bf16.msra.mxu1 %v5353_v29  ;;  %v5462_v29 = vld [vmem:[%s9692_s1 + $0x330] sm:$0xf0] }
  0xe7   :  { %v7940_v34 = vadd.f32 %v1609_v12, %v1561_v10  ;;  %v1514_v49 = vadd.f32 %v1513_v44, %v1465_v36  ;;  %v7966_v10 = vpack.c.bf16 %v126_v63, %v119_v48  ;;  %v7968_v44 = vpack.c.bf16 %v127_v6, %v120_v4  ;;  %9812 = vst [vmem:[#allocation36_spill] sm:$0xff] %v7970_v46  ;;  %v5206_v48 = vld [vmem:[%s9692_s1 + $0x130] sm:$0xf0]  ;;  %v6646_v63 = vld [vmem:[%s9692_s1 + $0x424] sm:$0xf] }
  0xe8   :  { %v5590_v4 = vld [vmem:[%s9692_s1 + $0x430] sm:$0xf0] }
  0xe9   :  { %9811 = vst [vmem:[#allocation35_spill] sm:$0xff] %v7968_v44  ;;  %v5593_v7 = vor.u32 %v6646_v63, %v5590_v4  ;;  %v140_v63 = vld [vmem:[%s9691_s0 + $0x288] sm:$0xff]  ;;  %v134_v4 = vld [vmem:[%s9691_s0 + $0x258] sm:$0xff] }
  0xeb   :  { %v1562_v9 = vpop.f32.mrf.mxu2  ;;  %1983 = vmatpush.bf16.msra.mxu3 %v5593_v7 }
  0xec   :  { %v1563_v12 = vadd.f32 %v1562_v9, %v1514_v49  ;;  %v1467_v36 = vpop.f32.mrf.mxu0  ;;  %v6614_v49 = vld [vmem:[%s9692_s1 + $0x324] sm:$0xf] }
  0xed   :  { %v1468_v23 = vadd.f32 %v1467_v36, %v7721_v31 }
  0xee   :  { %v1611_v32 = vpop.f32.mrf.mxu3  ;;  %v1516_v14 = vpop.f32.mrf.mxu1 }
  0xef   :  { %v7973_v24 = vadd.f32 %v1611_v32, %v1563_v12  ;;  %v1517_v18 = vadd.f32 %v1516_v14, %v1468_v23  ;;  %1662 = vmatmul.bf16.gmra.mxu0 %v7966_v10  ;;  %v6550_v14 = vld [vmem:[%s9692_s1 + $0x124] sm:$0xf]  ;;  %v5465_v23 = vor.u32 %v6614_v49, %v5462_v29 }
  0xf0   :  { %5846 = vmatmul.msk.bf16.gmra.mxu2 %vm1413_vm0, %v7970_v46  ;;  %v5209_v0 = vor.u32 %v6550_v14, %v5206_v48  ;;  %v5334_v14 = vld [vmem:[%s9692_s1 + $0x230] sm:$0xf0] }
  0xf1   :  { %1711 = vmatmul.bf16.gmra.mxu1 %v7968_v44  ;;  %1934 = vmatpush.bf16.msra.mxu2 %v5465_v23  ;;  %v133_v23 = vld [vmem:[%s9691_s0 + $0x250] sm:$0xff] }
  0xf2   :  { %1836 = vmatpush.bf16.msra.mxu0 %v5209_v0  ;;  %v142_v0 = vld [vmem:[%s9691_s0 + $0x298] sm:$0xff] }
  0xf3   :  { %1809 = vmatmul.bf16.gmra.mxu3 %v7505_v25  ;;  %v1565_v6 = vpop.f32.mrf.mxu2  ;;  %v6582_v25 = vld [vmem:[%s9692_s1 + $0x224] sm:$0xf] }
  0xf4   :  { %v1566_v9 = vadd.f32 %v1565_v6, %v1517_v18  ;;  %v1469_v32 = vpop.f32.mrf.mxu0  ;;  %v5337_v18 = vor.u32 %v6582_v25, %v5334_v14  ;;  %v141_v6 = vld [vmem:[%s9691_s0 + $0x290] sm:$0xff]  ;;  %v135_v25 = vld [vmem:[%s9691_s0 + $0x260] sm:$0xff] }
  0xf5   :  { %v1470_v36 = vadd.f32 %v1469_v32, %v7721_v31  ;;  %v8029_v14 = vpack.c.bf16 %v142_v0, %v135_v25 }
  0xf6   :  { %v1614_v12 = vpop.f32.mrf.mxu3  ;;  %v1518_v49 = vpop.f32.mrf.mxu1  ;;  %1885 = vmatpush.bf16.msra.mxu1 %v5337_v18  ;;  %v5446_v18 = vld [vmem:[%s9692_s1 + $0x310] sm:$0xf0] }
  0xf7   :  { %v7999_v29 = vadd.f32 %v1614_v12, %v1566_v9  ;;  %v1519_v48 = vadd.f32 %v1518_v49, %v1470_v36  ;;  %v8025_v9 = vpack.c.bf16 %v140_v63, %v133_v23  ;;  %v8027_v49 = vpack.c.bf16 %v141_v6, %v134_v4  ;;  %9814 = vst [vmem:[#allocation38_spill] sm:$0xff] %v8029_v14  ;;  %v5190_v23 = vld [vmem:[%s9692_s1 + $0x110] sm:$0xf0]  ;;  %v6642_v63 = vld [vmem:[%s9692_s1 + $0x404] sm:$0xf] }
  0xf8   :  { %v5574_v4 = vld [vmem:[%s9692_s1 + $0x410] sm:$0xf0] }
  0xf9   :  { %9813 = vst [vmem:[#allocation37_spill] sm:$0xff] %v8027_v49  ;;  %v5577_v0 = vor.u32 %v6642_v63, %v5574_v4  ;;  %v154_v63 = vld [vmem:[%s9691_s0 + $0x2f8] sm:$0xff]  ;;  %v148_v4 = vld [vmem:[%s9691_s0 + $0x2c8] sm:$0xff] }
  0xfb   :  { %v1567_v7 = vpop.f32.mrf.mxu2  ;;  %1984 = vmatpush.bf16.msra.mxu3 %v5577_v0 }
  0xfc   :  { %v1568_v12 = vadd.f32 %v1567_v7, %v1519_v48  ;;  %v1472_v36 = vpop.f32.mrf.mxu0  ;;  %v6610_v48 = vld [vmem:[%s9692_s1 + $0x304] sm:$0xf] }
  0xfd   :  { %v1473_v46 = vadd.f32 %v1472_v36, %v7721_v31 }
  0xfe   :  { %v1616_v32 = vpop.f32.mrf.mxu3  ;;  %v1521_v44 = vpop.f32.mrf.mxu1 }
  0xff   :  { %v8032_v58 = vadd.f32 %v1616_v32, %v1568_v12  ;;  %v1522_v50 = vadd.f32 %v1521_v44, %v1473_v46  ;;  %1667 = vmatmul.bf16.gmra.mxu0 %v8025_v9  ;;  %v6546_v44 = vld [vmem:[%s9692_s1 + $0x104] sm:$0xf]  ;;  %v5449_v46 = vor.u32 %v6610_v48, %v5446_v18 }
 0x100   :  { %5847 = vmatmul.msk.bf16.gmra.mxu2 %vm1413_vm0, %v8029_v14  ;;  %v5193_v25 = vor.u32 %v6546_v44, %v5190_v23  ;;  %v5318_v44 = vld [vmem:[%s9692_s1 + $0x210] sm:$0xf0] }
 0x101   :  { %1716 = vmatmul.bf16.gmra.mxu1 %v8027_v49  ;;  %1935 = vmatpush.bf16.msra.mxu2 %v5449_v46  ;;  %v147_v46 = vld [vmem:[%s9691_s0 + $0x2c0] sm:$0xff] }
 0x102   :  { %1837 = vmatpush.bf16.msra.mxu0 %v5193_v25  ;;  %v156_v25 = vld [vmem:[%s9691_s0 + $0x308] sm:$0xff] }
 0x103   :  { %1814 = vmatmul.bf16.gmra.mxu3 %v7559_v53  ;;  %v1570_v6 = vpop.f32.mrf.mxu2  ;;  %v6578_v53 = vld [vmem:[%s9692_s1 + $0x204] sm:$0xf] }
 0x104   :  { %v1571_v7 = vadd.f32 %v1570_v6, %v1522_v50  ;;  %v1474_v32 = vpop.f32.mrf.mxu0  ;;  %v5321_v50 = vor.u32 %v6578_v53, %v5318_v44  ;;  %v155_v6 = vld [vmem:[%s9691_s0 + $0x300] sm:$0xff]  ;;  %v149_v53 = vld [vmem:[%s9691_s0 + $0x2d0] sm:$0xff] }
 0x105   :  { %v1475_v36 = vadd.f32 %v1474_v32, %v7721_v31  ;;  %v8088_v44 = vpack.c.bf16 %v156_v25, %v149_v53 }
 0x106   :  { %v1619_v12 = vpop.f32.mrf.mxu3  ;;  %v1523_v48 = vpop.f32.mrf.mxu1  ;;  %1886 = vmatpush.bf16.msra.mxu1 %v5321_v50  ;;  %v6545_v50 = vld [vmem:[%s9692_s1 + $0xf4] sm:$0xf0] }
 0x107   :  { %v8058_v18 = vadd.f32 %v1619_v12, %v1571_v7  ;;  %v1524_v23 = vadd.f32 %v1523_v48, %v1475_v36  ;;  %v8084_v7 = vpack.c.bf16 %v154_v63, %v147_v46  ;;  %v8086_v48 = vpack.c.bf16 %v155_v6, %v148_v4  ;;  %9817 = vst [vmem:[#allocation41_spill] sm:$0xff] %v8088_v44  ;;  %v5814_v46 = vld [vmem:[%s9692_s1 + $0x5f0] sm:$0xf0]  ;;  %v5308_v63 = vld [vmem:[%s9692_s1 + $0x1e8] sm:$0xf] }
 0x108   :  { %v6577_v4 = vld [vmem:[%s9692_s1 + $0x1f4] sm:$0xf0] }
 0x109   :  { %9815 = vst [vmem:[#allocation39_spill] sm:$0xff] %v8084_v7  ;;  %v5309_v25 = vor.u32 %v6577_v4, %v5308_v63  ;;  %v168_v63 = vld [vmem:[%s9691_s0 + $0x368] sm:$0xff]  ;;  %v162_v4 = vld [vmem:[%s9691_s0 + $0x338] sm:$0xff] }
 0x10a   :  { %9816 = vst [vmem:[#allocation40_spill] sm:$0xff] %v8086_v48 }
 0x10b   :  { %v1572_v0 = vpop.f32.mrf.mxu2  ;;  %2173 = vmatpush.bf16.msrb.mxu3 %v5309_v25 }
 0x10c   :  { %v1573_v12 = vadd.f32 %v1572_v0, %v1524_v23  ;;  %v1477_v36 = vpop.f32.mrf.mxu0  ;;  %v5180_v23 = vld [vmem:[%s9692_s1 + $0xe8] sm:$0xf] }
 0x10d   :  { %v1478_v14 = vadd.f32 %v1477_v36, %v7721_v31 }
 0x10e   :  { %v1621_v32 = vpop.f32.mrf.mxu3  ;;  %v1526_v49 = vpop.f32.mrf.mxu1 }
 0x10f   :  { %v8091_v47 = vadd.f32 %v1621_v32, %v1573_v12  ;;  %v1527_v38 = vadd.f32 %v1526_v49, %v1478_v14  ;;  %1672 = vmatmul.bf16.gmra.mxu0 %v8084_v7  ;;  %v6702_v49 = vld [vmem:[%s9692_s1 + $0x5e4] sm:$0xf]  ;;  %v5181_v14 = vor.u32 %v6545_v50, %v5180_v23 }
 0x110   :  { %5848 = vmatmul.msk.bf16.gmra.mxu2 %vm1413_vm0, %v8088_v44  ;;  %v5817_v53 = vor.u32 %v6702_v49, %v5814_v46  ;;  %v5830_v49 = vld [vmem:[%s9692_s1 + $0x610] sm:$0xf0] }
 0x111   :  { %1721 = vmatmul.bf16.gmra.mxu1 %v8086_v48  ;;  %2124 = vmatpush.bf16.msrb.mxu2 %v5181_v14  ;;  %v161_v14 = vld [vmem:[%s9691_s0 + $0x330] sm:$0xff] }
 0x112   :  { %2026 = vmatpush.bf16.msrb.mxu0 %v5817_v53  ;;  %v170_v53 = vld [vmem:[%s9691_s0 + $0x378] sm:$0xff] }
 0x113   :  { %1819 = vmatmul.bf16.gmra.mxu3 %v7613_v15  ;;  %v1575_v6 = vpop.f32.mrf.mxu2  ;;  %v6706_v15 = vld [vmem:[%s9692_s1 + $0x604] sm:$0xf] }
 0x114   :  { %v1576_v0 = vadd.f32 %v1575_v6, %v1527_v38  ;;  %v1479_v32 = vpop.f32.mrf.mxu0  ;;  %v5833_v38 = vor.u32 %v6706_v15, %v5830_v49  ;;  %v169_v6 = vld [vmem:[%s9691_s0 + $0x370] sm:$0xff]  ;;  %v163_v15 = vld [vmem:[%s9691_s0 + $0x340] sm:$0xff] }
 0x115   :  { %v1480_v36 = vadd.f32 %v1479_v32, %v7721_v31  ;;  %v8147_v49 = vpack.c.bf16 %v170_v53, %v163_v15 }
 0x116   :  { %v1624_v12 = vpop.f32.mrf.mxu3  ;;  %v1528_v23 = vpop.f32.mrf.mxu1  ;;  %2082 = vmatpush.bf16.msrb.mxu1 %v5833_v38  ;;  %v6541_v38 = vld [vmem:[%s9692_s1 + $0xd4] sm:$0xf0] }
 0x117   :  { %v8117_v50 = vadd.f32 %v1624_v12, %v1576_v0  ;;  %v1529_v46 = vadd.f32 %v1528_v23, %v1480_v36  ;;  %v8143_v0 = vpack.c.bf16 %v168_v63, %v161_v14  ;;  %v8145_v23 = vpack.c.bf16 %v169_v6, %v162_v4  ;;  %9820 = vst [vmem:[#allocation44_spill] sm:$0xff] %v8147_v49  ;;  %v5798_v14 = vld [vmem:[%s9692_s1 + $0x5d0] sm:$0xf0]  ;;  %v5292_v63 = vld [vmem:[%s9692_s1 + $0x1c8] sm:$0xf] }
 0x118   :  { %v6573_v4 = vld [vmem:[%s9692_s1 + $0x1d4] sm:$0xf0] }
 0x119   :  { %9818 = vst [vmem:[#allocation42_spill] sm:$0xff] %v8143_v0  ;;  %v5293_v53 = vor.u32 %v6573_v4, %v5292_v63 }
 0x11a   :  { %9819 = vst [vmem:[#allocation43_spill] sm:$0xff] %v8145_v23 }
 0x11b   :  { %v1577_v25 = vpop.f32.mrf.mxu2  ;;  %2174 = vmatpush.bf16.msrb.mxu3 %v5293_v53 }
 0x11c   :  { %v1578_v12 = vadd.f32 %v1577_v25, %v1529_v46  ;;  %v1482_v36 = vpop.f32.mrf.mxu0  ;;  %v5164_v46 = vld [vmem:[%s9692_s1 + $0xc8] sm:$0xf] }
 0x11d   :  { %v1483_v44 = vadd.f32 %v1482_v36, %v7721_v31 }
 0x11e   :  { %v1626_v32 = vpop.f32.mrf.mxu3  ;;  %v1531_v48 = vpop.f32.mrf.mxu1 }
 0x11f   :  { %v8150_v37 = vadd.f32 %v1626_v32, %v1578_v12  ;;  %v1532_v62 = vadd.f32 %v1531_v48, %v1483_v44  ;;  %1677 = vmatmul.bf16.gmra.mxu0 %v8143_v0  ;;  %v6698_v48 = vld [vmem:[%s9692_s1 + $0x5c4] sm:$0xf]  ;;  %v5165_v44 = vor.u32 %v6541_v38, %v5164_v46 }
 0x120   :  { %5849 = vmatmul.msk.bf16.gmra.mxu2 %vm1413_vm0, %v8147_v49  ;;  %v5801_v15 = vor.u32 %v6698_v48, %v5798_v14 }
 0x121   :  { %1726 = vmatmul.bf16.gmra.mxu1 %v8145_v23  ;;  %2125 = vmatpush.bf16.msrb.mxu2 %v5165_v44 }
 0x122   :  { %2027 = vmatpush.bf16.msrb.mxu0 %v5801_v15 }
 0x123   :  { %1824 = vmatmul.bf16.gmra.mxu3 %v7673_v59  ;;  %v1580_v6 = vpop.f32.mrf.mxu2 }
 0x124   :  { %v1581_v25 = vadd.f32 %v1580_v6, %v1532_v62  ;;  %v1484_v32 = vpop.f32.mrf.mxu0 }
 0x125   :  { %v1485_v36 = vadd.f32 %v1484_v32, %v7721_v31 }
 0x126   :  { %v1629_v12 = vpop.f32.mrf.mxu3  ;;  %v1533_v46 = vpop.f32.mrf.mxu1 }
 0x127   :  { %v8176_v38 = vadd.f32 %v1629_v12, %v1581_v25  ;;  %v1534_v59 = vadd.f32 %v1533_v46, %v1485_v36 }
 0x12b   :  { %v1582_v49 = vpop.f32.mrf.mxu2 }
 0x12c   :  { %v1583_v23 = vadd.f32 %v1582_v49, %v1534_v59  ;;  %v1643_v61 = vpop.f32.mrf.mxu0  ;;  %v5148_v59 = vld [vmem:[%s9692_s1 + $0xa8] sm:$0xf] }
 0x12d   :  { %v1644_v60 = vadd.f32 %v1643_v61, %v7763_v13  ;;  %v6537_v61 = vld [vmem:[%s9692_s1 + $0xb4] sm:$0xf0]  ;;  %v5782_v13 = vld [vmem:[%s9692_s1 + $0x5b0] sm:$0xf0] }
 0x12e   :  { %v1631_v0 = vpop.f32.mrf.mxu3  ;;  %v1692_v48 = vpop.f32.mrf.mxu1  ;;  %v5149_v31 = vor.u32 %v6537_v61, %v5148_v59 }
 0x12f   :  { %v8179_v14 = vadd.f32 %v1631_v0, %v1583_v23  ;;  %v1693_v62 = vadd.f32 %v1692_v48, %v1644_v60  ;;  %1838 = vmatmul.bf16.vlgmr.msra.gmra.mxu0 %v7273_v51  ;;  %v6694_v60 = vld [vmem:[%s9692_s1 + $0x5a4] sm:$0xf]  ;;  %v5276_v0 = vld [vmem:[%s9692_s1 + $0x1a8] sm:$0xf]  ;;  %v6569_v23 = vld [vmem:[%s9692_s1 + $0x1b4] sm:$0xf0] }
 0x130   :  { %1936 = vmatmul.bf16.vlgmr.msra.gmra.mxu2 %v7283_v55  ;;  %v5785_v44 = vor.u32 %v6694_v60, %v5782_v13  ;;  %v5277_v63 = vor.u32 %v6569_v23, %v5276_v0  ;;  %v6690_v0 = vld [vmem:[%s9692_s1 + $0x584] sm:$0xf] }
 0x131   :  { %1887 = vmatmul.bf16.vlgmr.msra.gmra.mxu1 %v7275_v52  ;;  %2126 = vmatpush.bf16.msrb.mxu2 %v5149_v31 }
 0x132   :  { %2028 = vmatpush.bf16.msrb.mxu0 %v5785_v44  ;;  %2175 = vmatpush.bf16.msrb.mxu3 %v5277_v63  ;;  %v5260_v44 = vld [vmem:[%s9692_s1 + $0x188] sm:$0xf]  ;;  %v6565_v63 = vld [vmem:[%s9692_s1 + $0x194] sm:$0xf0] }
 0x133   :  { %1985 = vmatmul.bf16.vlgmr.msra.gmra.mxu3 %v7732_v35  ;;  %v1741_v49 = vpop.f32.mrf.mxu2 }
 0x134   :  { %v1742_v4 = vadd.f32 %v1741_v49, %v1693_v62  ;;  %v1645_v15 = vpop.f32.mrf.mxu0  ;;  %v5766_v49 = vld [vmem:[%s9692_s1 + $0x590] sm:$0xf0] }
 0x135   :  { %v1646_v53 = vadd.f32 %v1645_v15, %v7796_v5  ;;  %v5132_v5 = vld [vmem:[%s9692_s1 + $0x88] sm:$0xf]  ;;  %v5769_v15 = vor.u32 %v6690_v0, %v5766_v49 }
 0x136   :  { %v8203_v6 = vpop.f32.mrf.mxu3  ;;  %v1694_v25 = vpop.f32.mrf.mxu1  ;;  %v2810_v60 = vmax.f32 %v1742_v4, 0.0 }
 0x137   :  { %v1695_v12 = vadd.f32 %v1694_v25, %v1646_v53  ;;  %v5261_v53 = vor.u32 %v6565_v63, %v5260_v44  ;;  %2029 = vmatpush.bf16.msrb.mxu0 %v5769_v15  ;;  %v6686_v63 = vld [vmem:[%s9692_s1 + $0x564] sm:$0xf]  ;;  %v5750_v15 = vld [vmem:[%s9692_s1 + $0x570] sm:$0xf0] }
 0x139   :  { %2176 = vmatpush.bf16.msrb.mxu3 %v5261_v53  ;;  %v5244_v53 = vld [vmem:[%s9692_s1 + $0x168] sm:$0xf] }
 0x13b   :  { %v1743_v32 = vpop.f32.mrf.mxu2 }
 0x13c   :  { %v1744_v36 = vadd.f32 %v1743_v32, %v1695_v12  ;;  %v1648_v48 = vpop.f32.mrf.mxu0 }
 0x13d   :  { %v1649_v59 = vadd.f32 %v1648_v48, %v7822_v43  ;;  %v6533_v43 = vld [vmem:[%s9692_s1 + $0x94] sm:$0xf0] }
 0x13e   :  { %v8206_v46 = vpop.f32.mrf.mxu3  ;;  %v1697_v61 = vpop.f32.mrf.mxu1  ;;  %v2814_v62 = vmax.f32 %v1744_v36, 0.0  ;;  %v5133_v23 = vor.u32 %v6533_v43, %v5132_v5 }
 0x13f   :  { %v1698_v13 = vadd.f32 %v1697_v61, %v1649_v59  ;;  %1843 = vmatmul.bf16.gmra.mxu0 %v7345_v19 }
 0x140   :  { %v8210_v31 = vpack.c.bf16 %v2814_v62, %v2810_v60  ;;  %1941 = vmatmul.bf16.gmra.mxu2 %v7349_v21 }
 0x141   :  { %1892 = vmatmul.bf16.gmra.mxu1 %v7347_v20  ;;  %2127 = vmatpush.bf16.msrb.mxu2 %v5133_v23 }
 0x142   :  { %9821 = vst [vmem:[#allocation45_spill] sm:$0xff] %v8210_v31 }
 0x143   :  { %1990 = vmatmul.bf16.gmra.mxu3 %v7789_v45  ;;  %v1746_v4 = vpop.f32.mrf.mxu2 }
 0x144   :  { %v1747_v25 = vadd.f32 %v1746_v4, %v1698_v13  ;;  %v1650_v32 = vpop.f32.mrf.mxu0 }
 0x145   :  { %v1651_v36 = vadd.f32 %v1650_v32, %v7855_v33  ;;  %v5116_v33 = vld [vmem:[%s9692_s1 + $0x68] sm:$0xf] }
 0x146   :  { %v8233_v12 = vpop.f32.mrf.mxu3  ;;  %v1699_v48 = vpop.f32.mrf.mxu1  ;;  %v2818_v49 = vmax.f32 %v1747_v25, 0.0  ;;  %v6561_v25 = vld [vmem:[%s9692_s1 + $0x174] sm:$0xf0] }
 0x147   :  { %v1700_v59 = vadd.f32 %v1699_v48, %v1651_v36  ;;  %v5753_v36 = vor.u32 %v6686_v63, %v5750_v15  ;;  %v5245_v48 = vor.u32 %v6561_v25, %v5244_v53 }
 0x149   :  { %2030 = vmatpush.bf16.msrb.mxu0 %v5753_v36  ;;  %2177 = vmatpush.bf16.msrb.mxu3 %v5245_v48  ;;  %v5228_v36 = vld [vmem:[%s9692_s1 + $0x148] sm:$0xf]  ;;  %v6557_v48 = vld [vmem:[%s9692_s1 + $0x154] sm:$0xf0] }
 0x14b   :  { %v1748_v61 = vpop.f32.mrf.mxu2 }
 0x14c   :  { %v1749_v60 = vadd.f32 %v1748_v61, %v1700_v59  ;;  %v1653_v5 = vpop.f32.mrf.mxu0 }
 0x14d   :  { %v1654_v43 = vadd.f32 %v1653_v5, %v7881_v30  ;;  %v6529_v30 = vld [vmem:[%s9692_s1 + $0x74] sm:$0xf0] }
 0x14e   :  { %v8236_v62 = vpop.f32.mrf.mxu3  ;;  %v1702_v0 = vpop.f32.mrf.mxu1  ;;  %v2822_v13 = vmax.f32 %v1749_v60, 0.0  ;;  %v5117_v4 = vor.u32 %v6529_v30, %v5116_v33 }
 0x14f   :  { %v1703_v44 = vadd.f32 %v1702_v0, %v1654_v43  ;;  %1848 = vmatmul.bf16.gmra.mxu0 %v7399_v40 }
 0x150   :  { %v8240_v23 = vpack.c.bf16 %v2822_v13, %v2818_v49  ;;  %1946 = vmatmul.bf16.gmra.mxu2 %v7403_v42 }
 0x151   :  { %1897 = vmatmul.bf16.gmra.mxu1 %v7401_v41  ;;  %2128 = vmatpush.bf16.msrb.mxu2 %v5117_v4 }
 0x152   :  { %9822 = vst [vmem:[#allocation46_spill] sm:$0xff] %v8240_v23 }
 0x153   :  { %1995 = vmatmul.bf16.gmra.mxu3 %v7848_v11  ;;  %v1751_v32 = vpop.f32.mrf.mxu2 }
 0x154   :  { %v1752_v59 = vadd.f32 %v1751_v32, %v1703_v44  ;;  %v1655_v60 = vpop.f32.mrf.mxu0  ;;  %v5734_v32 = vld [vmem:[%s9692_s1 + $0x550] sm:$0xf0] }
 0x155   :  { %v1656_v5 = vadd.f32 %v1655_v60, %v7914_v39  ;;  %v5100_v39 = vld [vmem:[%s9692_s1 + $0x48] sm:$0xf] }
 0x156   :  { %v8263_v61 = vpop.f32.mrf.mxu3  ;;  %v1704_v43 = vpop.f32.mrf.mxu1  ;;  %v2826_v15 = vmax.f32 %v1752_v59, 0.0 }
 0x157   :  { %v1705_v0 = vadd.f32 %v1704_v43, %v1656_v5  ;;  %v5229_v5 = vor.u32 %v6557_v48, %v5228_v36 }
 0x159   :  { %2178 = vmatpush.bf16.msrb.mxu3 %v5229_v5  ;;  %v6553_v5 = vld [vmem:[%s9692_s1 + $0x134] sm:$0xf0] }
 0x15b   :  { %v1753_v49 = vpop.f32.mrf.mxu2 }
 0x15c   :  { %v1754_v13 = vadd.f32 %v1753_v49, %v1705_v0  ;;  %v1658_v30 = vpop.f32.mrf.mxu0 }
 0x15d   :  { %v1659_v23 = vadd.f32 %v1658_v30, %v7940_v34  ;;  %v6525_v34 = vld [vmem:[%s9692_s1 + $0x54] sm:$0xf0] }
 0x15e   :  { %v8266_v33 = vpop.f32.mrf.mxu3  ;;  %v1707_v63 = vpop.f32.mrf.mxu1  ;;  %v2830_v44 = vmax.f32 %v1754_v13, 0.0  ;;  %v5101_v25 = vor.u32 %v6525_v34, %v5100_v39 }
 0x15f   :  { %v1708_v53 = vadd.f32 %v1707_v63, %v1659_v23  ;;  %1853 = vmatmul.bf16.gmra.mxu0 %v7453_v1  ;;  %v6682_v23 = vld [vmem:[%s9692_s1 + $0x544] sm:$0xf] }
 0x160   :  { %v8270_v4 = vpack.c.bf16 %v2830_v44, %v2826_v15  ;;  %1951 = vmatmul.bf16.gmra.mxu2 %v7457_v3  ;;  %v5737_v60 = vor.u32 %v6682_v23, %v5734_v32 }
 0x161   :  { %1902 = vmatmul.bf16.gmra.mxu1 %v7455_v2  ;;  %2129 = vmatpush.bf16.msrb.mxu2 %v5101_v25 }
 0x162   :  { %9823 = vst [vmem:[#allocation47_spill] sm:$0xff] %v8270_v4  ;;  %2031 = vmatpush.bf16.msrb.mxu0 %v5737_v60  ;;  %v5212_v60 = vld [vmem:[%s9692_s1 + $0x128] sm:$0xf] }
 0x163   :  { %2000 = vmatmul.bf16.gmra.mxu3 %v7907_v8  ;;  %v1756_v59 = vpop.f32.mrf.mxu2 }
 0x164   :  { %v1757_v43 = vadd.f32 %v1756_v59, %v1708_v53  ;;  %v1660_v49 = vpop.f32.mrf.mxu0  ;;  %v5718_v59 = vld [vmem:[%s9692_s1 + $0x530] sm:$0xf0] }
 0x165   :  { %v1661_v13 = vadd.f32 %v1660_v49, %v7973_v24  ;;  %v5084_v24 = vld [vmem:[%s9692_s1 + $0x28] sm:$0xf] }
 0x166   :  { %v8293_v0 = vpop.f32.mrf.mxu3  ;;  %v1709_v30 = vpop.f32.mrf.mxu1  ;;  %v2834_v32 = vmax.f32 %v1757_v43, 0.0 }
 0x167   :  { %v1710_v63 = vadd.f32 %v1709_v30, %v1661_v13  ;;  %v5213_v13 = vor.u32 %v6553_v5, %v5212_v60 }
 0x169   :  { %2179 = vmatpush.bf16.msrb.mxu3 %v5213_v13  ;;  %v6549_v13 = vld [vmem:[%s9692_s1 + $0x114] sm:$0xf0] }
 0x16b   :  { %v1758_v15 = vpop.f32.mrf.mxu2 }
 0x16c   :  { %v1759_v44 = vadd.f32 %v1758_v15, %v1710_v63  ;;  %v1663_v34 = vpop.f32.mrf.mxu0 }
 0x16d   :  { %v1664_v4 = vadd.f32 %v1663_v34, %v7999_v29  ;;  %v6521_v29 = vld [vmem:[%s9692_s1 + $0x34] sm:$0xf0] }
 0x16e   :  { %v8296_v39 = vpop.f32.mrf.mxu3  ;;  %v1712_v23 = vpop.f32.mrf.mxu1  ;;  %v2838_v53 = vmax.f32 %v1759_v44, 0.0  ;;  %v5085_v48 = vor.u32 %v6521_v29, %v5084_v24 }
 0x16f   :  { %v1713_v36 = vadd.f32 %v1712_v23, %v1664_v4  ;;  %1858 = vmatmul.bf16.gmra.mxu0 %v7507_v26  ;;  %v6678_v4 = vld [vmem:[%s9692_s1 + $0x524] sm:$0xf] }
 0x170   :  { %v8300_v25 = vpack.c.bf16 %v2838_v53, %v2834_v32  ;;  %1956 = vmatmul.bf16.gmra.mxu2 %v7511_v28  ;;  %v5721_v49 = vor.u32 %v6678_v4, %v5718_v59 }
 0x171   :  { %1907 = vmatmul.bf16.gmra.mxu1 %v7509_v27  ;;  %2130 = vmatpush.bf16.msrb.mxu2 %v5085_v48 }
 0x172   :  { %9824 = vst [vmem:[#allocation48_spill] sm:$0xff] %v8300_v25  ;;  %2032 = vmatpush.bf16.msrb.mxu0 %v5721_v49  ;;  %v5196_v49 = vld [vmem:[%s9692_s1 + $0x108] sm:$0xf] }
 0x173   :  { %2005 = vmatmul.bf16.gmra.mxu3 %v7966_v10  ;;  %v1761_v43 = vpop.f32.mrf.mxu2 }
 0x174   :  { %v1762_v30 = vadd.f32 %v1761_v43, %v1713_v36  ;;  %v1665_v15 = vpop.f32.mrf.mxu0  ;;  %v5702_v43 = vld [vmem:[%s9692_s1 + $0x510] sm:$0xf0] }
 0x175   :  { %v1666_v44 = vadd.f32 %v1665_v15, %v8032_v58  ;;  %v5068_v58 = vld [vmem:[%s9692_s1 + $0x8] sm:$0xf] }
 0x176   :  { %v8323_v63 = vpop.f32.mrf.mxu3  ;;  %v1714_v34 = vpop.f32.mrf.mxu1  ;;  %v2842_v59 = vmax.f32 %v1762_v30, 0.0 }
 0x177   :  { %v1715_v23 = vadd.f32 %v1714_v34, %v1666_v44  ;;  %v5197_v44 = vor.u32 %v6549_v13, %v5196_v49 }
 0x179   :  { %2180 = vmatpush.bf16.msrb.mxu3 %v5197_v44  ;;  %v6705_v44 = vld [vmem:[%s9692_s1 + $0x5f4] sm:$0xf0] }
 0x17b   :  { %v1763_v32 = vpop.f32.mrf.mxu2 }
 0x17c   :  { %v1764_v53 = vadd.f32 %v1763_v32, %v1715_v23  ;;  %v1668_v29 = vpop.f32.mrf.mxu0 }
 0x17d   :  { %v1669_v25 = vadd.f32 %v1668_v29, %v8058_v18  ;;  %v6517_v18 = vld [vmem:[%s9692_s1 + $0x14] sm:$0xf0] }
 0x17e   :  { %v8326_v24 = vpop.f32.mrf.mxu3  ;;  %v1717_v4 = vpop.f32.mrf.mxu1  ;;  %v2846_v36 = vmax.f32 %v1764_v53, 0.0  ;;  %v5069_v5 = vor.u32 %v6517_v18, %v5068_v58 }
 0x17f   :  { %v1718_v60 = vadd.f32 %v1717_v4, %v1669_v25  ;;  %1863 = vmatmul.bf16.gmra.mxu0 %v7561_v54  ;;  %v6674_v25 = vld [vmem:[%s9692_s1 + $0x504] sm:$0xf] }
 0x180   :  { %v8330_v48 = vpack.c.bf16 %v2846_v36, %v2842_v59  ;;  %1961 = vmatmul.bf16.gmra.mxu2 %v7565_v57  ;;  %v5705_v15 = vor.u32 %v6674_v25, %v5702_v43 }
 0x181   :  { %1912 = vmatmul.bf16.gmra.mxu1 %v7563_v56  ;;  %2131 = vmatpush.bf16.msrb.mxu2 %v5069_v5 }
 0x182   :  { %9825 = vst [vmem:[#allocation49_spill] sm:$0xff] %v8330_v48  ;;  %2033 = vmatpush.bf16.msrb.mxu0 %v5705_v15  ;;  %v5820_v15 = vld [vmem:[%s9692_s1 + $0x5e8] sm:$0xf] }
 0x183   :  { %2010 = vmatmul.bf16.gmra.mxu3 %v8025_v9  ;;  %v1766_v30 = vpop.f32.mrf.mxu2 }
 0x184   :  { %v1767_v34 = vadd.f32 %v1766_v30, %v1718_v60  ;;  %v1670_v32 = vpop.f32.mrf.mxu0  ;;  %v6609_v30 = vld [vmem:[%s9692_s1 + $0x2f4] sm:$0xf0] }
 0x185   :  { %v1671_v53 = vadd.f32 %v1670_v32, %v8091_v47  ;;  %v5692_v47 = vld [vmem:[%s9692_s1 + $0x4e8] sm:$0xf] }
 0x186   :  { %v8353_v23 = vpop.f32.mrf.mxu3  ;;  %v1719_v29 = vpop.f32.mrf.mxu1  ;;  %v2850_v43 = vmax.f32 %v1767_v34, 0.0 }
 0x187   :  { %v1720_v4 = vadd.f32 %v1719_v29, %v1671_v53  ;;  %v5821_v53 = vor.u32 %v6705_v44, %v5820_v15 }
 0x189   :  { %2369 = vmatpush.bf16.msra.mxu3 %v5821_v53 }
 0x18b   :  { %v1768_v59 = vpop.f32.mrf.mxu2 }
 0x18c   :  { %v1769_v36 = vadd.f32 %v1768_v59, %v1720_v4  ;;  %v1673_v18 = vpop.f32.mrf.mxu0 }
 0x18d   :  { %v1674_v48 = vadd.f32 %v1673_v18, %v8117_v50  ;;  %v6673_v50 = vld [vmem:[%s9692_s1 + $0x4f4] sm:$0xf0] }
 0x18e   :  { %v8356_v58 = vpop.f32.mrf.mxu3  ;;  %v1722_v25 = vpop.f32.mrf.mxu1  ;;  %v2854_v60 = vmax.f32 %v1769_v36, 0.0  ;;  %v5693_v13 = vor.u32 %v6673_v50, %v5692_v47 }
 0x18f   :  { %v1723_v49 = vadd.f32 %v1722_v25, %v1674_v48  ;;  %1868 = vmatmul.bf16.gmra.mxu0 %v7615_v16  ;;  %v5436_v48 = vld [vmem:[%s9692_s1 + $0x2e8] sm:$0xf] }
 0x190   :  { %v8360_v5 = vpack.c.bf16 %v2854_v60, %v2850_v43  ;;  %1966 = vmatmul.bf16.gmra.mxu2 %v7619_v22  ;;  %v5437_v32 = vor.u32 %v6609_v30, %v5436_v48  ;;  %v5564_v25 = vld [vmem:[%s9692_s1 + $0x3e8] sm:$0xf]  ;;  %v6641_v43 = vld [vmem:[%s9692_s1 + $0x3f4] sm:$0xf0] }
 0x191   :  { %1917 = vmatmul.bf16.gmra.mxu1 %v7617_v17  ;;  %2320 = vmatpush.bf16.msra.mxu2 %v5693_v13  ;;  %v5565_v47 = vor.u32 %v6641_v43, %v5564_v25  ;;  %v5676_v25 = vld [vmem:[%s9692_s1 + $0x4c8] sm:$0xf] }
 0x192   :  { %9826 = vst [vmem:[#allocation50_spill] sm:$0xff] %v8360_v5  ;;  %2222 = vmatpush.bf16.msra.mxu0 %v5437_v32  ;;  %v9827_v32 = vld [vmem:[#allocation23_spill] sm:$0xff] }
 0x193   :  { %2015 = vmatmul.bf16.gmra.mxu3 %v8084_v7  ;;  %v1771_v34 = vpop.f32.mrf.mxu2  ;;  %2271 = vmatpush.bf16.msra.mxu1 %v5565_v47  ;;  %v5804_v47 = vld [vmem:[%s9692_s1 + $0x5c8] sm:$0xf]  ;;  %v6637_v5 = vld [vmem:[%s9692_s1 + $0x3d4] sm:$0xf0] }
 0x194   :  { %v1772_v29 = vadd.f32 %v1771_v34, %v1723_v49  ;;  %v1675_v59 = vpop.f32.mrf.mxu0 }
 0x195   :  { %v1676_v36 = vadd.f32 %v1675_v59, %v8150_v37  ;;  %v9829_v59 = vld [vmem:[#allocation24_spill] sm:$0xff] }
 0x196   :  { %v8383_v4 = vpop.f32.mrf.mxu3  ;;  %v1724_v18 = vpop.f32.mrf.mxu1  ;;  %v2858_v15 = vmax.f32 %v1772_v29, 0.0  ;;  %v5420_v29 = vld [vmem:[%s9692_s1 + $0x2c8] sm:$0xf] }
 0x197   :  { %v1725_v60 = vadd.f32 %v1724_v18, %v1676_v36  ;;  %v9830_v36 = vld [vmem:[#allocation25_spill] sm:$0xff]  ;;  %v9831_v18 = vld [vmem:[#allocation42_spill] sm:$0xff] }
 0x19b   :  { %v1773_v49 = vpop.f32.mrf.mxu2 }
 0x19c   :  { %v1774_v50 = vadd.f32 %v1773_v49, %v1725_v60  ;;  %v1678_v13 = vpop.f32.mrf.mxu0  ;;  %v6605_v60 = vld [vmem:[%s9692_s1 + $0x2d4] sm:$0xf0] }
 0x19d   :  { %v1679_v37 = vadd.f32 %v1678_v13, %v8176_v38  ;;  %v6669_v38 = vld [vmem:[%s9692_s1 + $0x4d4] sm:$0xf0]  ;;  %v5421_v13 = vor.u32 %v6605_v60, %v5420_v29 }
 0x19e   :  { %v8392_v48 = vpop.f32.mrf.mxu3  ;;  %v1727_v30 = vpop.f32.mrf.mxu1  ;;  %v2862_v44 = vmax.f32 %v1774_v50, 0.0  ;;  %v5677_v43 = vor.u32 %v6669_v38, %v5676_v25  ;;  %v6701_v49 = vld [vmem:[%s9692_s1 + $0x5d4] sm:$0xf0] }
 0x19f   :  { %v1728_v34 = vadd.f32 %v1727_v30, %v1679_v37  ;;  %1873 = vmatmul.bf16.gmra.mxu0 %v9827_v32  ;;  %v5805_v37 = vor.u32 %v6701_v49, %v5804_v47 }
 0x1a0   :  { %v8396_v53 = vpack.c.bf16 %v2862_v44, %v2858_v15  ;;  %1971 = vmatmul.bf16.gmra.mxu2 %v9830_v36  ;;  %2223 = vmatpush.bf16.msra.mxu0 %v5421_v13 }
 0x1a1   :  { %1922 = vmatmul.bf16.gmra.mxu1 %v9829_v59  ;;  %2321 = vmatpush.bf16.msra.mxu2 %v5677_v43  ;;  %v9832_v59 = vld [vmem:[#allocation27_spill] sm:$0xff] }
 0x1a2   :  { %9828 = vst [vmem:[#allocation51_spill] sm:$0xff] %v8396_v53  ;;  %2370 = vmatpush.bf16.msra.mxu3 %v5805_v37  ;;  %v5548_v53 = vld [vmem:[%s9692_s1 + $0x3c8] sm:$0xf] }
 0x1a3   :  { %2020 = vmatmul.bf16.gmra.mxu3 %v9831_v18  ;;  %v1776_v50 = vpop.f32.mrf.mxu2  ;;  %v5549_v43 = vor.u32 %v6637_v5, %v5548_v53  ;;  %v9835_v5 = vld [vmem:[#allocation8_spill] sm:$0xff]  ;;  %v6665_v53 = vld [vmem:[%s9692_s1 + $0x4b4] sm:$0xf0] }
 0x1a4   :  { %v1777_v30 = vadd.f32 %v1776_v50, %v1728_v34  ;;  %v1680_v44 = vpop.f32.mrf.mxu0  ;;  %v8431_v34 = vld [vmem:[%s9693_s2] sm:$0xf] }
 0x1a5   :  { %v1681_v25 = vadd.f32 %v1680_v44, %v8179_v14  ;;  %v8434_v29 = vperm.slane %v8431_v34, 1  ;;  %2272 = vmatpush.bf16.msra.mxu1 %v5549_v43 }
 0x1a6   :  { %v8419_v15 = vpop.f32.mrf.mxu3  ;;  %v1729_v38 = vpop.f32.mrf.mxu1  ;;  %v2866_v31 = vmax.f32 %v1777_v30, 0.0  ;;  %v6601_v30 = vld [vmem:[%s9692_s1 + $0x2b4] sm:$0xf0] }
 0x1a7   :  { %v1730_v14 = vadd.f32 %v1729_v38, %v1681_v25  ;;  %v1791_v60 = vadd.f32 %v8203_v6, %v8434_v29  ;;  %v9834_v25 = vld [vmem:[#allocation28_spill] sm:$0xff]  ;;  %v5660_v6 = vld [vmem:[%s9692_s1 + $0x4a8] sm:$0xf]  ;;  %v1793_v43 = vadd.f32 %v8206_v46, %v8434_v29  ;;  %v6633_v46 = vld [vmem:[%s9692_s1 + $0x3b4] sm:$0xf0] }
 0x1a8   :  { %v5788_v38 = vld [vmem:[%s9692_s1 + $0x5a8] sm:$0xf] }
 0x1ab   :  { %v1778_v47 = vpop.f32.mrf.mxu2 }
 0x1ac   :  { %v1779_v49 = vadd.f32 %v1778_v47, %v1730_v14  ;;  %v1839_v13 = vpop.f32.mrf.mxu0  ;;  %v6697_v14 = vld [vmem:[%s9692_s1 + $0x5b4] sm:$0xf0] }
 0x1ad   :  { %v1840_v37 = vadd.f32 %v1839_v13, %v1791_v60 }
 0x1ae   :  { %v8438_v50 = vpop.f32.mrf.mxu3  ;;  %v1888_v44 = vpop.f32.mrf.mxu1  ;;  %v2870_v18 = vmax.f32 %v1779_v49, 0.0  ;;  %v5789_v49 = vor.u32 %v6697_v14, %v5788_v38 }
 0x1af   :  { %v1889_v36 = vadd.f32 %v1888_v44, %v1840_v37  ;;  %2034 = vmatmul.bf16.vlgmr.msrb.gmra.mxu0 %v9832_v59 }
 0x1b0   :  { %v8441_v7 = vpack.c.bf16 %v2870_v18, %v2866_v31  ;;  %2132 = vmatmul.bf16.vlgmr.msrb.gmra.mxu2 %v9835_v5  ;;  %v5404_v31 = vld [vmem:[%s9692_s1 + $0x2a8] sm:$0xf]  ;;  %v5661_v18 = vor.u32 %v6665_v53, %v5660_v6  ;;  %2371 = vmatpush.bf16.msra.mxu3 %v5789_v49 }
 0x1b1   :  { %5850 = vmatmul.msk.bf16.vlgmr.msrb.gmra.mxu1 %vm1413_vm0, %v9834_v25  ;;  %v5405_v47 = vor.u32 %v6601_v30, %v5404_v31 }
 0x1b2   :  { %9833 = vst [vmem:[#allocation52_spill] sm:$0xff] %v8441_v7  ;;  %2322 = vmatpush.bf16.msra.mxu2 %v5661_v18 }
 0x1b3   :  { %2181 = vmatmul.bf16.vlgmr.msrb.gmra.mxu3 %v7273_v51  ;;  %v1937_v60 = vpop.f32.mrf.mxu2  ;;  %2224 = vmatpush.bf16.msra.mxu0 %v5405_v47  ;;  %v5532_v51 = vld [vmem:[%s9692_s1 + $0x3a8] sm:$0xf] }
 0x1b4   :  { %v1938_v13 = vadd.f32 %v1937_v60, %v1889_v36  ;;  %v1841_v44 = vpop.f32.mrf.mxu0  ;;  %v5533_v30 = vor.u32 %v6633_v46, %v5532_v51  ;;  %v1796_v36 = vadd.f32 %v8233_v12, %v8434_v29  ;;  %v5644_v51 = vld [vmem:[%s9692_s1 + $0x488] sm:$0xf]  ;;  %v6661_v12 = vld [vmem:[%s9692_s1 + $0x494] sm:$0xf0] }
 0x1b5   :  { %v1842_v6 = vadd.f32 %v1841_v44, %v1793_v43  ;;  %v9837_v44 = vld [vmem:[#allocation30_spill] sm:$0xff]  ;;  %v5645_v46 = vor.u32 %v6661_v12, %v5644_v51 }
 0x1b6   :  { %v1986_v37 = vpop.f32.mrf.mxu3  ;;  %v1890_v53 = vpop.f32.mrf.mxu1  ;;  %2273 = vmatpush.bf16.msra.mxu1 %v5533_v30  ;;  %v5772_v30 = vld [vmem:[%s9692_s1 + $0x588] sm:$0xf] }
 0x1b7   :  { %v8467_v7 = vadd.f32 %v1986_v37, %v1938_v13  ;;  %v1891_v31 = vadd.f32 %v1890_v53, %v1842_v6  ;;  %v9836_v37 = vld [vmem:[#allocation29_spill] sm:$0xff]  ;;  %v9838_v6 = vld [vmem:[#allocation10_spill] sm:$0xff]  ;;  %2323 = vmatpush.bf16.msra.mxu2 %v5645_v46 }
 0x1b8   :  { %v5388_v53 = vld [vmem:[%s9692_s1 + $0x288] sm:$0xf] }
 0x1bb   :  { %v1939_v18 = vpop.f32.mrf.mxu2 }
 0x1bc   :  { %v1940_v38 = vadd.f32 %v1939_v18, %v1891_v31  ;;  %v1844_v43 = vpop.f32.mrf.mxu0  ;;  %v6597_v31 = vld [vmem:[%s9692_s1 + $0x294] sm:$0xf0]  ;;  %v1798_v18 = vadd.f32 %v8236_v62, %v8434_v29 }
 0x1bd   :  { %v1845_v60 = vadd.f32 %v1844_v43, %v1796_v36  ;;  %v6693_v36 = vld [vmem:[%s9692_s1 + $0x594] sm:$0xf0] }
 0x1be   :  { %v1988_v14 = vpop.f32.mrf.mxu3  ;;  %v1893_v47 = vpop.f32.mrf.mxu1  ;;  %v5773_v43 = vor.u32 %v6693_v36, %v5772_v30  ;;  %v6629_v62 = vld [vmem:[%s9692_s1 + $0x394] sm:$0xf0] }
 0x1bf   :  { %v8477_v49 = vadd.f32 %v1988_v14, %v1940_v38  ;;  %v1894_v13 = vadd.f32 %v1893_v47, %v1845_v60  ;;  %2039 = vmatmul.bf16.gmra.mxu0 %v9836_v37  ;;  %v5389_v14 = vor.u32 %v6597_v31, %v5388_v53 }
 0x1c0   :  { %2137 = vmatmul.bf16.gmra.mxu2 %v9838_v6  ;;  %2372 = vmatpush.bf16.msra.mxu3 %v5773_v43 }
 0x1c1   :  { %5851 = vmatmul.msk.bf16.gmra.mxu1 %vm1413_vm0, %v9837_v44  ;;  %2225 = vmatpush.bf16.msra.mxu0 %v5389_v14  ;;  %v5516_v44 = vld [vmem:[%s9692_s1 + $0x388] sm:$0xf] }
 0x1c2   :  { %v5517_v31 = vor.u32 %v6629_v62, %v5516_v44  ;;  %v6657_v44 = vld [vmem:[%s9692_s1 + $0x474] sm:$0xf0] }
 0x1c3   :  { %2186 = vmatmul.bf16.gmra.mxu3 %v7345_v19  ;;  %v1942_v38 = vpop.f32.mrf.mxu2 }
 0x1c4   :  { %v1943_v60 = vadd.f32 %v1942_v38, %v1894_v13  ;;  %v1846_v51 = vpop.f32.mrf.mxu0  ;;  %2274 = vmatpush.bf16.msra.mxu1 %v5517_v31  ;;  %v1801_v13 = vadd.f32 %v8263_v61, %v8434_v29  ;;  %v5628_v61 = vld [vmem:[%s9692_s1 + $0x468] sm:$0xf] }
 0x1c5   :  { %v1847_v12 = vadd.f32 %v1846_v51, %v1798_v18  ;;  %v9840_v51 = vld [vmem:[#allocation32_spill] sm:$0xff]  ;;  %v5629_v62 = vor.u32 %v6657_v44, %v5628_v61  ;;  %v5756_v31 = vld [vmem:[%s9692_s1 + $0x568] sm:$0xf] }
 0x1c6   :  { %v1991_v47 = vpop.f32.mrf.mxu3  ;;  %v1895_v19 = vpop.f32.mrf.mxu1 }
 0x1c7   :  { %v8504_v6 = vadd.f32 %v1991_v47, %v1943_v60  ;;  %v1896_v53 = vadd.f32 %v1895_v19, %v1847_v12  ;;  %v9839_v47 = vld [vmem:[#allocation31_spill] sm:$0xff]  ;;  %v9841_v19 = vld [vmem:[#allocation12_spill] sm:$0xff]  ;;  %v5372_v12 = vld [vmem:[%s9692_s1 + $0x268] sm:$0xf]  ;;  %2324 = vmatpush.bf16.msra.mxu2 %v5629_v62 }
 0x1cb   :  { %v1944_v46 = vpop.f32.mrf.mxu2 }
 0x1cc   :  { %v1945_v30 = vadd.f32 %v1944_v46, %v1896_v53  ;;  %v1849_v18 = vpop.f32.mrf.mxu0  ;;  %v6593_v53 = vld [vmem:[%s9692_s1 + $0x274] sm:$0xf0]  ;;  %v1803_v46 = vadd.f32 %v8266_v33, %v8434_v29 }
 0x1cd   :  { %v1850_v38 = vadd.f32 %v1849_v18, %v1801_v13  ;;  %v6689_v13 = vld [vmem:[%s9692_s1 + $0x574] sm:$0xf0] }
 0x1ce   :  { %v1993_v36 = vpop.f32.mrf.mxu3  ;;  %v1898_v14 = vpop.f32.mrf.mxu1  ;;  %v5757_v18 = vor.u32 %v6689_v13, %v5756_v31  ;;  %v6625_v33 = vld [vmem:[%s9692_s1 + $0x374] sm:$0xf0] }
 0x1cf   :  { %v8514_v43 = vadd.f32 %v1993_v36, %v1945_v30  ;;  %v1899_v60 = vadd.f32 %v1898_v14, %v1850_v38  ;;  %2044 = vmatmul.bf16.gmra.mxu0 %v9839_v47  ;;  %v5373_v36 = vor.u32 %v6593_v53, %v5372_v12 }
 0x1d0   :  { %2142 = vmatmul.bf16.gmra.mxu2 %v9841_v19  ;;  %2373 = vmatpush.bf16.msra.mxu3 %v5757_v18 }
 0x1d1   :  { %5852 = vmatmul.msk.bf16.gmra.mxu1 %vm1413_vm0, %v9840_v51  ;;  %2226 = vmatpush.bf16.msra.mxu0 %v5373_v36  ;;  %v5500_v51 = vld [vmem:[%s9692_s1 + $0x368] sm:$0xf] }
 0x1d2   :  { %v5501_v53 = vor.u32 %v6625_v33, %v5500_v51  ;;  %v6653_v51 = vld [vmem:[%s9692_s1 + $0x454] sm:$0xf0] }
 0x1d3   :  { %2191 = vmatmul.bf16.gmra.mxu3 %v7399_v40  ;;  %v1947_v30 = vpop.f32.mrf.mxu2 }
 0x1d4   :  { %v1948_v38 = vadd.f32 %v1947_v30, %v1899_v60  ;;  %v1851_v61 = vpop.f32.mrf.mxu0  ;;  %2275 = vmatpush.bf16.msra.mxu1 %v5501_v53  ;;  %v1806_v60 = vadd.f32 %v8293_v0, %v8434_v29  ;;  %v5612_v0 = vld [vmem:[%s9692_s1 + $0x448] sm:$0xf] }
 0x1d5   :  { %v1852_v44 = vadd.f32 %v1851_v61, %v1803_v46  ;;  %v9843_v61 = vld [vmem:[#allocation34_spill] sm:$0xff]  ;;  %v5613_v33 = vor.u32 %v6653_v51, %v5612_v0  ;;  %v5740_v53 = vld [vmem:[%s9692_s1 + $0x548] sm:$0xf] }
 0x1d6   :  { %v1996_v14 = vpop.f32.mrf.mxu3  ;;  %v1900_v40 = vpop.f32.mrf.mxu1 }
 0x1d7   :  { %v8541_v19 = vadd.f32 %v1996_v14, %v1948_v38  ;;  %v1901_v12 = vadd.f32 %v1900_v40, %v1852_v44  ;;  %v9842_v14 = vld [vmem:[#allocation33_spill] sm:$0xff]  ;;  %v9844_v40 = vld [vmem:[#allocation14_spill] sm:$0xff]  ;;  %2325 = vmatpush.bf16.msra.mxu2 %v5613_v33 }
 0x1d8   :  { %v5356_v44 = vld [vmem:[%s9692_s1 + $0x248] sm:$0xf] }
 0x1db   :  { %v1949_v62 = vpop.f32.mrf.mxu2 }
 0x1dc   :  { %v1950_v31 = vadd.f32 %v1949_v62, %v1901_v12  ;;  %v1854_v46 = vpop.f32.mrf.mxu0  ;;  %v6589_v12 = vld [vmem:[%s9692_s1 + $0x254] sm:$0xf0]  ;;  %v1808_v62 = vadd.f32 %v8296_v39, %v8434_v29 }
 0x1dd   :  { %v1855_v30 = vadd.f32 %v1854_v46, %v1806_v60  ;;  %v6685_v60 = vld [vmem:[%s9692_s1 + $0x554] sm:$0xf0] }
 0x1de   :  { %v1998_v13 = vpop.f32.mrf.mxu3  ;;  %v1903_v36 = vpop.f32.mrf.mxu1  ;;  %v5741_v46 = vor.u32 %v6685_v60, %v5740_v53  ;;  %v6621_v39 = vld [vmem:[%s9692_s1 + $0x354] sm:$0xf0] }
 0x1df   :  { %v8551_v18 = vadd.f32 %v1998_v13, %v1950_v31  ;;  %v1904_v38 = vadd.f32 %v1903_v36, %v1855_v30  ;;  %2049 = vmatmul.bf16.gmra.mxu0 %v9842_v14  ;;  %v5357_v13 = vor.u32 %v6589_v12, %v5356_v44 }
 0x1e0   :  { %2147 = vmatmul.bf16.gmra.mxu2 %v9844_v40  ;;  %2374 = vmatpush.bf16.msra.mxu3 %v5741_v46 }
 0x1e1   :  { %5853 = vmatmul.msk.bf16.gmra.mxu1 %vm1413_vm0, %v9843_v61  ;;  %2227 = vmatpush.bf16.msra.mxu0 %v5357_v13  ;;  %v5484_v61 = vld [vmem:[%s9692_s1 + $0x348] sm:$0xf] }
 0x1e2   :  { %v5485_v12 = vor.u32 %v6621_v39, %v5484_v61  ;;  %v6649_v61 = vld [vmem:[%s9692_s1 + $0x434] sm:$0xf0] }
 0x1e3   :  { %2196 = vmatmul.bf16.gmra.mxu3 %v7453_v1  ;;  %v1952_v31 = vpop.f32.mrf.mxu2 }
 0x1e4   :  { %v1953_v30 = vadd.f32 %v1952_v31, %v1904_v38  ;;  %v1856_v0 = vpop.f32.mrf.mxu0  ;;  %2276 = vmatpush.bf16.msra.mxu1 %v5485_v12  ;;  %v1811_v38 = vadd.f32 %v8323_v63, %v8434_v29  ;;  %v5596_v63 = vld [vmem:[%s9692_s1 + $0x428] sm:$0xf] }
 0x1e5   :  { %v1857_v51 = vadd.f32 %v1856_v0, %v1808_v62  ;;  %v9846_v0 = vld [vmem:[#allocation36_spill] sm:$0xff]  ;;  %v5597_v39 = vor.u32 %v6649_v61, %v5596_v63  ;;  %v5724_v12 = vld [vmem:[%s9692_s1 + $0x528] sm:$0xf] }
 0x1e6   :  { %v2001_v36 = vpop.f32.mrf.mxu3  ;;  %v1905_v1 = vpop.f32.mrf.mxu1 }
 0x1e7   :  { %v8578_v40 = vadd.f32 %v2001_v36, %v1953_v30  ;;  %v1906_v44 = vadd.f32 %v1905_v1, %v1857_v51  ;;  %v9845_v36 = vld [vmem:[#allocation35_spill] sm:$0xff]  ;;  %v9847_v1 = vld [vmem:[#allocation16_spill] sm:$0xff]  ;;  %v5340_v51 = vld [vmem:[%s9692_s1 + $0x228] sm:$0xf]  ;;  %2326 = vmatpush.bf16.msra.mxu2 %v5597_v39 }
 0x1eb   :  { %v1954_v33 = vpop.f32.mrf.mxu2 }
 0x1ec   :  { %v1955_v53 = vadd.f32 %v1954_v33, %v1906_v44  ;;  %v1859_v62 = vpop.f32.mrf.mxu0  ;;  %v6585_v44 = vld [vmem:[%s9692_s1 + $0x234] sm:$0xf0]  ;;  %v1813_v33 = vadd.f32 %v8326_v24, %v8434_v29 }
 0x1ed   :  { %v1860_v31 = vadd.f32 %v1859_v62, %v1811_v38  ;;  %v6681_v38 = vld [vmem:[%s9692_s1 + $0x534] sm:$0xf0] }
 0x1ee   :  { %v2003_v60 = vpop.f32.mrf.mxu3  ;;  %v1908_v13 = vpop.f32.mrf.mxu1  ;;  %v5725_v62 = vor.u32 %v6681_v38, %v5724_v12  ;;  %v6617_v24 = vld [vmem:[%s9692_s1 + $0x334] sm:$0xf0] }
 0x1ef   :  { %v8588_v46 = vadd.f32 %v2003_v60, %v1955_v53  ;;  %v1909_v30 = vadd.f32 %v1908_v13, %v1860_v31  ;;  %2054 = vmatmul.bf16.gmra.mxu0 %v9845_v36  ;;  %v5341_v60 = vor.u32 %v6585_v44, %v5340_v51 }
 0x1f0   :  { %2152 = vmatmul.bf16.gmra.mxu2 %v9847_v1  ;;  %2375 = vmatpush.bf16.msra.mxu3 %v5725_v62 }
 0x1f1   :  { %5854 = vmatmul.msk.bf16.gmra.mxu1 %vm1413_vm0, %v9846_v0  ;;  %2228 = vmatpush.bf16.msra.mxu0 %v5341_v60  ;;  %v5468_v0 = vld [vmem:[%s9692_s1 + $0x328] sm:$0xf] }
 0x1f2   :  { %v5469_v44 = vor.u32 %v6617_v24, %v5468_v0  ;;  %v6645_v0 = vld [vmem:[%s9692_s1 + $0x414] sm:$0xf0] }
 0x1f3   :  { %2201 = vmatmul.bf16.gmra.mxu3 %v7507_v26  ;;  %v1957_v53 = vpop.f32.mrf.mxu2 }
 0x1f4   :  { %v1958_v31 = vadd.f32 %v1957_v53, %v1909_v30  ;;  %v1861_v63 = vpop.f32.mrf.mxu0  ;;  %2277 = vmatpush.bf16.msra.mxu1 %v5469_v44  ;;  %v1816_v30 = vadd.f32 %v8353_v23, %v8434_v29  ;;  %v5580_v23 = vld [vmem:[%s9692_s1 + $0x408] sm:$0xf] }
 0x1f5   :  { %v1862_v61 = vadd.f32 %v1861_v63, %v1813_v33  ;;  %v9849_v63 = vld [vmem:[#allocation38_spill] sm:$0xff]  ;;  %v5581_v24 = vor.u32 %v6645_v0, %v5580_v23  ;;  %v5708_v44 = vld [vmem:[%s9692_s1 + $0x508] sm:$0xf] }
 0x1f6   :  { %v2006_v13 = vpop.f32.mrf.mxu3  ;;  %v1910_v26 = vpop.f32.mrf.mxu1 }
 0x1f7   :  { %v8615_v1 = vadd.f32 %v2006_v13, %v1958_v31  ;;  %v1911_v51 = vadd.f32 %v1910_v26, %v1862_v61  ;;  %v9848_v13 = vld [vmem:[#allocation37_spill] sm:$0xff]  ;;  %v9850_v26 = vld [vmem:[#allocation18_spill] sm:$0xff]  ;;  %2327 = vmatpush.bf16.msra.mxu2 %v5581_v24 }
 0x1f8   :  { %v5324_v61 = vld [vmem:[%s9692_s1 + $0x208] sm:$0xf] }
 0x1fb   :  { %v1959_v39 = vpop.f32.mrf.mxu2 }
 0x1fc   :  { %v1960_v12 = vadd.f32 %v1959_v39, %v1911_v51  ;;  %v1864_v33 = vpop.f32.mrf.mxu0  ;;  %v6581_v51 = vld [vmem:[%s9692_s1 + $0x214] sm:$0xf0]  ;;  %v1818_v39 = vadd.f32 %v8356_v58, %v8434_v29 }
 0x1fd   :  { %v1865_v53 = vadd.f32 %v1864_v33, %v1816_v30  ;;  %v6677_v30 = vld [vmem:[%s9692_s1 + $0x514] sm:$0xf0] }
 0x1fe   :  { %v2008_v38 = vpop.f32.mrf.mxu3  ;;  %v1913_v60 = vpop.f32.mrf.mxu1  ;;  %v5709_v33 = vor.u32 %v6677_v30, %v5708_v44  ;;  %v6613_v58 = vld [vmem:[%s9692_s1 + $0x314] sm:$0xf0] }
 0x1ff   :  { %v8625_v62 = vadd.f32 %v2008_v38, %v1960_v12  ;;  %v1914_v31 = vadd.f32 %v1913_v60, %v1865_v53  ;;  %2059 = vmatmul.bf16.gmra.mxu0 %v9848_v13  ;;  %v5325_v38 = vor.u32 %v6581_v51, %v5324_v61 }
 0x200   :  { %2157 = vmatmul.bf16.gmra.mxu2 %v9850_v26  ;;  %2376 = vmatpush.bf16.msra.mxu3 %v5709_v33 }
 0x201   :  { %5855 = vmatmul.msk.bf16.gmra.mxu1 %vm1413_vm0, %v9849_v63  ;;  %2229 = vmatpush.bf16.msra.mxu0 %v5325_v38  ;;  %v5452_v63 = vld [vmem:[%s9692_s1 + $0x308] sm:$0xf] }
 0x202   :  { %v5453_v51 = vor.u32 %v6613_v58, %v5452_v63  ;;  %v5310_v63 = vld [vmem:[%s9692_s1 + $0x1f8] sm:$0xf0] }
 0x203   :  { %2206 = vmatmul.bf16.gmra.mxu3 %v7561_v54  ;;  %v1962_v12 = vpop.f32.mrf.mxu2 }
 0x204   :  { %v1963_v53 = vadd.f32 %v1962_v12, %v1914_v31  ;;  %v1866_v23 = vpop.f32.mrf.mxu0  ;;  %2278 = vmatpush.bf16.msra.mxu1 %v5453_v51  ;;  %v1821_v31 = vadd.f32 %v8383_v4, %v8434_v29  ;;  %v6575_v4 = vld [vmem:[%s9692_s1 + $0x1ec] sm:$0xf] }
 0x205   :  { %v1867_v0 = vadd.f32 %v1866_v23, %v1818_v39  ;;  %v9852_v23 = vld [vmem:[#allocation41_spill] sm:$0xff]  ;;  %v5313_v58 = vor.u32 %v6575_v4, %v5310_v63 }
 0x206   :  { %v2011_v60 = vpop.f32.mrf.mxu3  ;;  %v1915_v54 = vpop.f32.mrf.mxu1  ;;  %v6607_v51 = vld [vmem:[%s9692_s1 + $0x2ec] sm:$0xf] }
 0x207   :  { %v8652_v26 = vadd.f32 %v2011_v60, %v1963_v53  ;;  %v1916_v61 = vadd.f32 %v1915_v54, %v1867_v0  ;;  %v9851_v60 = vld [vmem:[#allocation40_spill] sm:$0xff]  ;;  %v5836_v0 = vld [vmem:[%s9692_s1 + $0x608] sm:$0xf]  ;;  %2516 = vmatpush.bf16.msrb.mxu2 %v5313_v58 }
 0x208   :  { %v9853_v54 = vld [vmem:[#allocation20_spill] sm:$0xff] }
 0x20b   :  { %v1964_v24 = vpop.f32.mrf.mxu2 }
 0x20c   :  { %v1965_v44 = vadd.f32 %v1964_v24, %v1916_v61  ;;  %v1869_v39 = vpop.f32.mrf.mxu0  ;;  %v6709_v61 = vld [vmem:[%s9692_s1 + $0x614] sm:$0xf0]  ;;  %v1823_v24 = vadd.f32 %v8392_v48, %v8434_v29  ;;  %v5182_v48 = vld [vmem:[%s9692_s1 + $0xf8] sm:$0xf0] }
 0x20d   :  { %v1870_v12 = vadd.f32 %v1869_v39, %v1821_v31  ;;  %v5438_v31 = vld [vmem:[%s9692_s1 + $0x2f8] sm:$0xf0] }
 0x20e   :  { %v2013_v30 = vpop.f32.mrf.mxu3  ;;  %v1918_v38 = vpop.f32.mrf.mxu1  ;;  %v5441_v39 = vor.u32 %v6607_v51, %v5438_v31 }
 0x20f   :  { %v8662_v33 = vadd.f32 %v2013_v30, %v1965_v44  ;;  %v1919_v53 = vadd.f32 %v1918_v38, %v1870_v12  ;;  %2064 = vmatmul.bf16.gmra.mxu0 %v9851_v60  ;;  %v5837_v30 = vor.u32 %v6709_v61, %v5836_v0 }
 0x210   :  { %2162 = vmatmul.bf16.gmra.mxu2 %v9853_v54  ;;  %2565 = vmatpush.bf16.msrb.mxu3 %v5441_v39 }
 0x211   :  { %5856 = vmatmul.msk.bf16.gmra.mxu1 %vm1413_vm0, %v9852_v23  ;;  %2425 = vmatpush.bf16.msrb.mxu0 %v5837_v30  ;;  %v6543_v23 = vld [vmem:[%s9692_s1 + $0xec] sm:$0xf] }
 0x212   :  { %v5185_v61 = vor.u32 %v6543_v23, %v5182_v48  ;;  %v5294_v23 = vld [vmem:[%s9692_s1 + $0x1d8] sm:$0xf0] }
 0x213   :  { %2211 = vmatmul.bf16.gmra.mxu3 %v7615_v16  ;;  %v1967_v44 = vpop.f32.mrf.mxu2 }
 0x214   :  { %v1968_v12 = vadd.f32 %v1967_v44, %v1919_v53  ;;  %v1871_v4 = vpop.f32.mrf.mxu0  ;;  %2467 = vmatpush.bf16.msrb.mxu1 %v5185_v61  ;;  %v1826_v53 = vadd.f32 %v8419_v15, %v8434_v29  ;;  %v6571_v15 = vld [vmem:[%s9692_s1 + $0x1cc] sm:$0xf]  ;;  %v1828_v61 = vadd.f32 %v8438_v50, %v8434_v29 }
 0x215   :  { %v1872_v63 = vadd.f32 %v1871_v4, %v1823_v24  ;;  %v9855_v4 = vld [vmem:[#allocation44_spill] sm:$0xff]  ;;  %v5297_v48 = vor.u32 %v6571_v15, %v5294_v23  ;;  %v6539_v15 = vld [vmem:[%s9692_s1 + $0xcc] sm:$0xf]  ;;  %v5166_v23 = vld [vmem:[%s9692_s1 + $0xd8] sm:$0xf0] }
 0x216   :  { %v2016_v38 = vpop.f32.mrf.mxu3  ;;  %v1920_v16 = vpop.f32.mrf.mxu1  ;;  %v5169_v50 = vor.u32 %v6539_v15, %v5166_v23 }
 0x217   :  { %v8689_v54 = vadd.f32 %v2016_v38, %v1968_v12  ;;  %v1921_v0 = vadd.f32 %v1920_v16, %v1872_v63  ;;  %v9854_v38 = vld [vmem:[#allocation43_spill] sm:$0xff]  ;;  %v9856_v16 = vld [vmem:[#allocation22_spill] sm:$0xff]  ;;  %v6603_v63 = vld [vmem:[%s9692_s1 + $0x2cc] sm:$0xf]  ;;  %2517 = vmatpush.bf16.msrb.mxu2 %v5297_v48 }
 0x218   :  { %2468 = vmatpush.bf16.msrb.mxu1 %v5169_v50 }
 0x21b   :  { %v1969_v58 = vpop.f32.mrf.mxu2 }
 0x21c   :  { %v1970_v51 = vadd.f32 %v1969_v58, %v1921_v0  ;;  %v1874_v24 = vpop.f32.mrf.mxu0  ;;  %v5422_v0 = vld [vmem:[%s9692_s1 + $0x2d8] sm:$0xf0] }
 0x21d   :  { %v1875_v44 = vadd.f32 %v1874_v24, %v1826_v53  ;;  %v5425_v58 = vor.u32 %v6603_v63, %v5422_v0 }
 0x21e   :  { %v2018_v31 = vpop.f32.mrf.mxu3  ;;  %v1923_v30 = vpop.f32.mrf.mxu1 }
 0x21f   :  { %v8699_v39 = vadd.f32 %v2018_v31, %v1970_v51  ;;  %v1924_v12 = vadd.f32 %v1923_v30, %v1875_v44  ;;  %2069 = vmatmul.bf16.gmra.mxu0 %v9854_v38  ;;  %2566 = vmatpush.bf16.msrb.mxu3 %v5425_v58 }
 0x220   :  { %2167 = vmatmul.bf16.gmra.mxu2 %v9856_v16 }
 0x221   :  { %5857 = vmatmul.msk.bf16.gmra.mxu1 %vm1413_vm0, %v9855_v4 }
 0x223   :  { %2216 = vmatmul.bf16.gmra.mxu3 %v9827_v32  ;;  %v1972_v53 = vpop.f32.mrf.mxu2 }
 0x224   :  { %v1973_v51 = vadd.f32 %v1972_v53, %v1924_v12  ;;  %v1876_v24 = vpop.f32.mrf.mxu0 }
 0x225   :  { %v1877_v44 = vadd.f32 %v1876_v24, %v1828_v61  ;;  %v6567_v24 = vld [vmem:[%s9692_s1 + $0x1ac] sm:$0xf] }
 0x226   :  { %v2021_v31 = vpop.f32.mrf.mxu3  ;;  %v1925_v30 = vpop.f32.mrf.mxu1 }
 0x227   :  { %v8720_v32 = vadd.f32 %v2021_v31, %v1973_v51  ;;  %v1926_v29 = vadd.f32 %v1925_v30, %v1877_v44  ;;  %v8735_v31 = vperm.slane %v8431_v34, 2  ;;  %v6599_v30 = vld [vmem:[%s9692_s1 + $0x2ac] sm:$0xf]  ;;  %v5406_v34 = vld [vmem:[%s9692_s1 + $0x2b8] sm:$0xf0] }
 0x228   :  { %v5409_v23 = vor.u32 %v6599_v30, %v5406_v34 }
 0x22a   :  { %2567 = vmatpush.bf16.msrb.mxu3 %v5409_v23 }
 0x22b   :  { %v1974_v12 = vpop.f32.mrf.mxu2 }
 0x22c   :  { %v1975_v63 = vadd.f32 %v1974_v12, %v1926_v29  ;;  %v2035_v48 = vpop.f32.mrf.mxu0 }
 0x22d   :  { %v2036_v61 = vadd.f32 %v2035_v48, %v8467_v7  ;;  %v5278_v7 = vld [vmem:[%s9692_s1 + $0x1b8] sm:$0xf0] }
 0x22e   :  { %v2023_v0 = vpop.f32.mrf.mxu3  ;;  %v2084_v53 = vpop.f32.mrf.mxu1  ;;  %v5281_v44 = vor.u32 %v6567_v24, %v5278_v7 }
 0x22f   :  { %v8729_v58 = vadd.f32 %v2023_v0, %v1975_v63  ;;  %v2085_v51 = vadd.f32 %v2084_v53, %v2036_v61  ;;  %2230 = vmatmul.bf16.vlgmr.msra.gmra.mxu0 %v7275_v52  ;;  %v6535_v61 = vld [vmem:[%s9692_s1 + $0xac] sm:$0xf]  ;;  %v5150_v53 = vld [vmem:[%s9692_s1 + $0xb8] sm:$0xf0] }
 0x230   :  { %2328 = vmatmul.bf16.vlgmr.msra.gmra.mxu2 %v7732_v35  ;;  %v5153_v7 = vor.u32 %v6535_v61, %v5150_v53  ;;  %v5390_v61 = vld [vmem:[%s9692_s1 + $0x298] sm:$0xf0] }
 0x231   :  { %2279 = vmatmul.bf16.vlgmr.msra.gmra.mxu1 %v7283_v55  ;;  %2518 = vmatpush.bf16.msrb.mxu2 %v5281_v44  ;;  %v2811_v30 = vmax.f32 %v2085_v51, 0.0  ;;  %v6563_v51 = vld [vmem:[%s9692_s1 + $0x18c] sm:$0xf] }
 0x232   :  { %2469 = vmatpush.bf16.msrb.mxu1 %v5153_v7 }
 0x233   :  { %2377 = vmatmul.bf16.vlgmr.msra.gmra.mxu3 %v9832_v59  ;;  %v2133_v15 = vpop.f32.mrf.mxu2 }
 0x234   :  { %v2134_v29 = vadd.f32 %v2133_v15, %v8735_v31  ;;  %v2037_v12 = vpop.f32.mrf.mxu0 }
 0x235   :  { %v2038_v63 = vadd.f32 %v2037_v12, %v8477_v49 }
 0x236   :  { %v2182_v50 = vpop.f32.mrf.mxu3  ;;  %v2086_v0 = vpop.f32.mrf.mxu1 }
 0x237   :  { %v8752_v48 = vadd.f32 %v2182_v50, %v2134_v29  ;;  %v2087_v24 = vadd.f32 %v2086_v0, %v2038_v63  ;;  %v6595_v0 = vld [vmem:[%s9692_s1 + $0x28c] sm:$0xf] }
 0x239   :  { %v2815_v34 = vmax.f32 %v2087_v24, 0.0  ;;  %v5393_v24 = vor.u32 %v6595_v0, %v5390_v61 }
 0x23b   :  { %v8760_v44 = vpack.c.bf16 %v2815_v34, %v2811_v30  ;;  %v2135_v49 = vpop.f32.mrf.mxu2  ;;  %2568 = vmatpush.bf16.msrb.mxu3 %v5393_v24 }
 0x23c   :  { %v2136_v15 = vadd.f32 %v2135_v49, %v8735_v31  ;;  %v2040_v29 = vpop.f32.mrf.mxu0 }
 0x23d   :  { %9857 = vst [vmem:[#allocation28_spill] sm:$0xff] %v8760_v44  ;;  %v2041_v50 = vadd.f32 %v2040_v29, %v8504_v6  ;;  %v5262_v6 = vld [vmem:[%s9692_s1 + $0x198] sm:$0xf0]  ;;  %v6531_v29 = vld [vmem:[%s9692_s1 + $0x8c] sm:$0xf] }
 0x23e   :  { %v2184_v23 = vpop.f32.mrf.mxu3  ;;  %v2089_v12 = vpop.f32.mrf.mxu1  ;;  %v5265_v63 = vor.u32 %v6563_v51, %v5262_v6 }
 0x23f   :  { %v8764_v59 = vadd.f32 %v2184_v23, %v2136_v15  ;;  %v2090_v35 = vadd.f32 %v2089_v12, %v2041_v50  ;;  %2235 = vmatmul.bf16.gmra.mxu0 %v7347_v20  ;;  %v5134_v50 = vld [vmem:[%s9692_s1 + $0x98] sm:$0xf0] }
 0x240   :  { %2333 = vmatmul.bf16.gmra.mxu2 %v7789_v45  ;;  %v5137_v51 = vor.u32 %v6531_v29, %v5134_v50  ;;  %v5374_v29 = vld [vmem:[%s9692_s1 + $0x278] sm:$0xf0] }
 0x241   :  { %2284 = vmatmul.bf16.gmra.mxu1 %v7349_v21  ;;  %2519 = vmatpush.bf16.msrb.mxu2 %v5265_v63  ;;  %v2819_v6 = vmax.f32 %v2090_v35, 0.0  ;;  %v6559_v35 = vld [vmem:[%s9692_s1 + $0x16c] sm:$0xf] }
 0x242   :  { %2470 = vmatpush.bf16.msrb.mxu1 %v5137_v51 }
 0x243   :  { %2382 = vmatmul.bf16.gmra.mxu3 %v9836_v37  ;;  %v2138_v53 = vpop.f32.mrf.mxu2 }
 0x244   :  { %v2139_v7 = vadd.f32 %v2138_v53, %v8735_v31  ;;  %v2042_v34 = vpop.f32.mrf.mxu0 }
 0x245   :  { %v2043_v49 = vadd.f32 %v2042_v34, %v8514_v43 }
 0x246   :  { %v2187_v30 = vpop.f32.mrf.mxu3  ;;  %v2091_v15 = vpop.f32.mrf.mxu1 }
 0x247   :  { %v8784_v23 = vadd.f32 %v2187_v30, %v2139_v7  ;;  %v2092_v12 = vadd.f32 %v2091_v15, %v2043_v49  ;;  %v6591_v15 = vld [vmem:[%s9692_s1 + $0x26c] sm:$0xf] }
 0x249   :  { %v2823_v0 = vmax.f32 %v2092_v12, 0.0  ;;  %v5377_v12 = vor.u32 %v6591_v15, %v5374_v29 }
 0x24b   :  { %v8792_v63 = vpack.c.bf16 %v2823_v0, %v2819_v6  ;;  %v2140_v43 = vpop.f32.mrf.mxu2  ;;  %2569 = vmatpush.bf16.msrb.mxu3 %v5377_v12 }
 0x24c   :  { %v2141_v61 = vadd.f32 %v2140_v43, %v8735_v31  ;;  %v2045_v24 = vpop.f32.mrf.mxu0 }
 0x24d   :  { %9858 = vst [vmem:[#allocation8_spill] sm:$0xff] %v8792_v63  ;;  %v2046_v7 = vadd.f32 %v2045_v24, %v8541_v19  ;;  %v5246_v19 = vld [vmem:[%s9692_s1 + $0x178] sm:$0xf0]  ;;  %v6527_v24 = vld [vmem:[%s9692_s1 + $0x6c] sm:$0xf] }
 0x24e   :  { %v2189_v53 = vpop.f32.mrf.mxu3  ;;  %v2094_v30 = vpop.f32.mrf.mxu1  ;;  %v5249_v49 = vor.u32 %v6559_v35, %v5246_v19 }
 0x24f   :  { %v8796_v34 = vadd.f32 %v2189_v53, %v2141_v61  ;;  %v2095_v44 = vadd.f32 %v2094_v30, %v2046_v7  ;;  %2240 = vmatmul.bf16.gmra.mxu0 %v7401_v41  ;;  %v5118_v7 = vld [vmem:[%s9692_s1 + $0x78] sm:$0xf0] }
 0x250   :  { %2338 = vmatmul.bf16.gmra.mxu2 %v7848_v11  ;;  %v5121_v35 = vor.u32 %v6527_v24, %v5118_v7  ;;  %v5358_v24 = vld [vmem:[%s9692_s1 + $0x258] sm:$0xf0] }
 0x251   :  { %2289 = vmatmul.bf16.gmra.mxu1 %v7403_v42  ;;  %2520 = vmatpush.bf16.msrb.mxu2 %v5249_v49  ;;  %v2827_v19 = vmax.f32 %v2095_v44, 0.0  ;;  %v6555_v44 = vld [vmem:[%s9692_s1 + $0x14c] sm:$0xf] }
 0x252   :  { %2471 = vmatpush.bf16.msrb.mxu1 %v5121_v35 }
 0x253   :  { %2387 = vmatmul.bf16.gmra.mxu3 %v9839_v47  ;;  %v2143_v50 = vpop.f32.mrf.mxu2 }
 0x254   :  { %v2144_v51 = vadd.f32 %v2143_v50, %v8735_v31  ;;  %v2047_v0 = vpop.f32.mrf.mxu0 }
 0x255   :  { %v2048_v43 = vadd.f32 %v2047_v0, %v8551_v18 }
 0x256   :  { %v2192_v6 = vpop.f32.mrf.mxu3  ;;  %v2096_v61 = vpop.f32.mrf.mxu1 }
 0x257   :  { %v8816_v53 = vadd.f32 %v2192_v6, %v2144_v51  ;;  %v2097_v30 = vadd.f32 %v2096_v61, %v2048_v43  ;;  %v6587_v61 = vld [vmem:[%s9692_s1 + $0x24c] sm:$0xf] }
 0x259   :  { %v2831_v15 = vmax.f32 %v2097_v30, 0.0  ;;  %v5361_v30 = vor.u32 %v6587_v61, %v5358_v24 }
 0x25b   :  { %v8824_v49 = vpack.c.bf16 %v2831_v15, %v2827_v19  ;;  %v2145_v18 = vpop.f32.mrf.mxu2  ;;  %2570 = vmatpush.bf16.msrb.mxu3 %v5361_v30 }
 0x25c   :  { %v2146_v29 = vadd.f32 %v2145_v18, %v8735_v31  ;;  %v2050_v12 = vpop.f32.mrf.mxu0 }
 0x25d   :  { %9859 = vst [vmem:[#allocation29_spill] sm:$0xff] %v8824_v49  ;;  %v2051_v51 = vadd.f32 %v2050_v12, %v8578_v40  ;;  %v5230_v40 = vld [vmem:[%s9692_s1 + $0x158] sm:$0xf0]  ;;  %v6523_v12 = vld [vmem:[%s9692_s1 + $0x4c] sm:$0xf] }
 0x25e   :  { %v2194_v50 = vpop.f32.mrf.mxu3  ;;  %v2099_v6 = vpop.f32.mrf.mxu1  ;;  %v5233_v43 = vor.u32 %v6555_v44, %v5230_v40 }
 0x25f   :  { %v8828_v0 = vadd.f32 %v2194_v50, %v2146_v29  ;;  %v2100_v63 = vadd.f32 %v2099_v6, %v2051_v51  ;;  %2245 = vmatmul.bf16.gmra.mxu0 %v7455_v2  ;;  %v5102_v51 = vld [vmem:[%s9692_s1 + $0x58] sm:$0xf0] }
 0x260   :  { %2343 = vmatmul.bf16.gmra.mxu2 %v7907_v8  ;;  %v5105_v44 = vor.u32 %v6523_v12, %v5102_v51  ;;  %v5342_v12 = vld [vmem:[%s9692_s1 + $0x238] sm:$0xf0] }
 0x261   :  { %2294 = vmatmul.bf16.gmra.mxu1 %v7457_v3  ;;  %2521 = vmatpush.bf16.msrb.mxu2 %v5233_v43  ;;  %v2835_v40 = vmax.f32 %v2100_v63, 0.0  ;;  %v6551_v63 = vld [vmem:[%s9692_s1 + $0x12c] sm:$0xf] }
 0x262   :  { %2472 = vmatpush.bf16.msrb.mxu1 %v5105_v44 }
 0x263   :  { %2392 = vmatmul.bf16.gmra.mxu3 %v9842_v14  ;;  %v2148_v7 = vpop.f32.mrf.mxu2 }
 0x264   :  { %v2149_v35 = vadd.f32 %v2148_v7, %v8735_v31  ;;  %v2052_v15 = vpop.f32.mrf.mxu0 }
 0x265   :  { %v2053_v18 = vadd.f32 %v2052_v15, %v8588_v46 }
 0x266   :  { %v2197_v19 = vpop.f32.mrf.mxu3  ;;  %v2101_v29 = vpop.f32.mrf.mxu1 }
 0x267   :  { %v8848_v50 = vadd.f32 %v2197_v19, %v2149_v35  ;;  %v2102_v6 = vadd.f32 %v2101_v29, %v2053_v18  ;;  %v6583_v29 = vld [vmem:[%s9692_s1 + $0x22c] sm:$0xf] }
 0x269   :  { %v2839_v61 = vmax.f32 %v2102_v6, 0.0  ;;  %v5345_v6 = vor.u32 %v6583_v29, %v5342_v12 }
 0x26b   :  { %v8856_v43 = vpack.c.bf16 %v2839_v61, %v2835_v40  ;;  %v2150_v46 = vpop.f32.mrf.mxu2  ;;  %2571 = vmatpush.bf16.msrb.mxu3 %v5345_v6 }
 0x26c   :  { %v2151_v24 = vadd.f32 %v2150_v46, %v8735_v31  ;;  %v2055_v30 = vpop.f32.mrf.mxu0 }
 0x26d   :  { %9860 = vst [vmem:[#allocation31_spill] sm:$0xff] %v8856_v43  ;;  %v2056_v35 = vadd.f32 %v2055_v30, %v8615_v1  ;;  %v5214_v1 = vld [vmem:[%s9692_s1 + $0x138] sm:$0xf0]  ;;  %v6519_v30 = vld [vmem:[%s9692_s1 + $0x2c] sm:$0xf] }
 0x26e   :  { %v2199_v7 = vpop.f32.mrf.mxu3  ;;  %v2104_v19 = vpop.f32.mrf.mxu1  ;;  %v5217_v18 = vor.u32 %v6551_v63, %v5214_v1 }
 0x26f   :  { %v8860_v15 = vadd.f32 %v2199_v7, %v2151_v24  ;;  %v2105_v49 = vadd.f32 %v2104_v19, %v2056_v35  ;;  %2250 = vmatmul.bf16.gmra.mxu0 %v7509_v27  ;;  %v5086_v35 = vld [vmem:[%s9692_s1 + $0x38] sm:$0xf0] }
 0x270   :  { %2348 = vmatmul.bf16.gmra.mxu2 %v7966_v10  ;;  %v5089_v63 = vor.u32 %v6519_v30, %v5086_v35  ;;  %v5326_v30 = vld [vmem:[%s9692_s1 + $0x218] sm:$0xf0] }
 0x271   :  { %2299 = vmatmul.bf16.gmra.mxu1 %v7511_v28  ;;  %2522 = vmatpush.bf16.msrb.mxu2 %v5217_v18  ;;  %v2843_v1 = vmax.f32 %v2105_v49, 0.0  ;;  %v6547_v49 = vld [vmem:[%s9692_s1 + $0x10c] sm:$0xf] }
 0x272   :  { %2473 = vmatpush.bf16.msrb.mxu1 %v5089_v63 }
 0x273   :  { %2397 = vmatmul.bf16.gmra.mxu3 %v9845_v36  ;;  %v2153_v51 = vpop.f32.mrf.mxu2 }
 0x274   :  { %v2154_v44 = vadd.f32 %v2153_v51, %v8735_v31  ;;  %v2057_v61 = vpop.f32.mrf.mxu0 }
 0x275   :  { %v2058_v46 = vadd.f32 %v2057_v61, %v8625_v62 }
 0x276   :  { %v2202_v40 = vpop.f32.mrf.mxu3  ;;  %v2106_v24 = vpop.f32.mrf.mxu1 }
 0x277   :  { %v8880_v7 = vadd.f32 %v2202_v40, %v2154_v44  ;;  %v2107_v19 = vadd.f32 %v2106_v24, %v2058_v46  ;;  %v6579_v24 = vld [vmem:[%s9692_s1 + $0x20c] sm:$0xf] }
 0x279   :  { %v2847_v29 = vmax.f32 %v2107_v19, 0.0  ;;  %v5329_v19 = vor.u32 %v6579_v24, %v5326_v30 }
 0x27b   :  { %v8888_v18 = vpack.c.bf16 %v2847_v29, %v2843_v1  ;;  %v2155_v62 = vpop.f32.mrf.mxu2  ;;  %2572 = vmatpush.bf16.msrb.mxu3 %v5329_v19 }
 0x27c   :  { %v2156_v12 = vadd.f32 %v2155_v62, %v8735_v31  ;;  %v2060_v6 = vpop.f32.mrf.mxu0 }
 0x27d   :  { %9861 = vst [vmem:[#allocation33_spill] sm:$0xff] %v8888_v18  ;;  %v2061_v44 = vadd.f32 %v2060_v6, %v8652_v26  ;;  %v5198_v26 = vld [vmem:[%s9692_s1 + $0x118] sm:$0xf0]  ;;  %v6515_v6 = vld [vmem:[%s9692_s1 + $0xc] sm:$0xf] }
 0x27e   :  { %v2204_v51 = vpop.f32.mrf.mxu3  ;;  %v2109_v40 = vpop.f32.mrf.mxu1  ;;  %v5201_v46 = vor.u32 %v6547_v49, %v5198_v26 }
 0x27f   :  { %v8892_v61 = vadd.f32 %v2204_v51, %v2156_v12  ;;  %v2110_v43 = vadd.f32 %v2109_v40, %v2061_v44  ;;  %2255 = vmatmul.bf16.gmra.mxu0 %v7563_v56  ;;  %v5070_v44 = vld [vmem:[%s9692_s1 + $0x18] sm:$0xf0] }
 0x280   :  { %2353 = vmatmul.bf16.gmra.mxu2 %v8025_v9  ;;  %v5073_v49 = vor.u32 %v6515_v6, %v5070_v44  ;;  %v6639_v6 = vld [vmem:[%s9692_s1 + $0x3ec] sm:$0xf]  ;;  %v5566_v44 = vld [vmem:[%s9692_s1 + $0x3f8] sm:$0xf0] }
 0x281   :  { %2304 = vmatmul.bf16.gmra.mxu1 %v7565_v57  ;;  %2523 = vmatpush.bf16.msrb.mxu2 %v5201_v46  ;;  %v2851_v26 = vmax.f32 %v2110_v43, 0.0  ;;  %v9863_v43 = vld [vmem:[#allocation39_spill] sm:$0xff] }
 0x282   :  { %2474 = vmatpush.bf16.msrb.mxu1 %v5073_v49 }
 0x283   :  { %2402 = vmatmul.bf16.gmra.mxu3 %v9848_v13  ;;  %v2158_v35 = vpop.f32.mrf.mxu2 }
 0x284   :  { %v2159_v63 = vadd.f32 %v2158_v35, %v8735_v31  ;;  %v2062_v29 = vpop.f32.mrf.mxu0 }
 0x285   :  { %v2063_v62 = vadd.f32 %v2062_v29, %v8662_v33 }
 0x286   :  { %v2207_v1 = vpop.f32.mrf.mxu3  ;;  %v2111_v12 = vpop.f32.mrf.mxu1 }
 0x287   :  { %v8912_v51 = vadd.f32 %v2207_v1, %v2159_v63  ;;  %v2112_v40 = vadd.f32 %v2111_v12, %v2063_v62  ;;  %v6703_v62 = vld [vmem:[%s9692_s1 + $0x5ec] sm:$0xf] }
 0x289   :  { %v2855_v24 = vmax.f32 %v2112_v40, 0.0  ;;  %v6707_v40 = vld [vmem:[%s9692_s1 + $0x60c] sm:$0xf] }
 0x28b   :  { %v8920_v46 = vpack.c.bf16 %v2855_v24, %v2851_v26  ;;  %v2160_v33 = vpop.f32.mrf.mxu2  ;;  %v5569_v26 = vor.u32 %v6639_v6, %v5566_v44  ;;  %v5838_v24 = vld [vmem:[%s9692_s1 + $0x618] sm:$0xf0] }
 0x28c   :  { %v2161_v30 = vadd.f32 %v2160_v33, %v8735_v31  ;;  %v2065_v19 = vpop.f32.mrf.mxu0  ;;  %v5694_v6 = vld [vmem:[%s9692_s1 + $0x4f8] sm:$0xf0] }
 0x28d   :  { %9862 = vst [vmem:[#allocation35_spill] sm:$0xff] %v8920_v46  ;;  %v2066_v63 = vadd.f32 %v2065_v19, %v8689_v54  ;;  %v5822_v54 = vld [vmem:[%s9692_s1 + $0x5f8] sm:$0xf0]  ;;  %v5841_v19 = vor.u32 %v6707_v40, %v5838_v24  ;;  %2614 = vmatpush.bf16.msra.mxu0 %v5569_v26 }
 0x28e   :  { %v2209_v35 = vpop.f32.mrf.mxu3  ;;  %v2114_v1 = vpop.f32.mrf.mxu1  ;;  %v5825_v12 = vor.u32 %v6703_v62, %v5822_v54  ;;  %v6671_v54 = vld [vmem:[%s9692_s1 + $0x4ec] sm:$0xf] }
 0x28f   :  { %v8924_v29 = vadd.f32 %v2209_v35, %v2161_v30  ;;  %v2115_v18 = vadd.f32 %v2114_v1, %v2066_v63  ;;  %2260 = vmatmul.bf16.gmra.mxu0 %v7617_v17  ;;  %2768 = vmatpush.bf16.msra.mxu3 %v5841_v19 }
 0x290   :  { %2358 = vmatmul.bf16.gmra.mxu2 %v9863_v43  ;;  %v9865_v43 = vld [vmem:[#allocation24_spill] sm:$0xff] }
 0x291   :  { %2309 = vmatmul.bf16.gmra.mxu1 %v7619_v22  ;;  %2712 = vmatpush.bf16.msra.mxu2 %v5825_v12  ;;  %v2859_v46 = vmax.f32 %v2115_v18, 0.0  ;;  %v9867_v18 = vld [vmem:[#allocation42_spill] sm:$0xff] }
 0x293   :  { %2407 = vmatmul.bf16.gmra.mxu3 %v9851_v60  ;;  %v2163_v49 = vpop.f32.mrf.mxu2 }
 0x294   :  { %v2164_v33 = vadd.f32 %v2163_v49, %v8735_v31  ;;  %v2067_v35 = vpop.f32.mrf.mxu0  ;;  %v5697_v49 = vor.u32 %v6671_v54, %v5694_v6  ;;  %v6635_v54 = vld [vmem:[%s9692_s1 + $0x3cc] sm:$0xf]  ;;  %v5550_v6 = vld [vmem:[%s9692_s1 + $0x3d8] sm:$0xf0] }
 0x295   :  { %v2068_v63 = vadd.f32 %v2067_v35, %v8699_v39 }
 0x296   :  { %v2212_v30 = vpop.f32.mrf.mxu3  ;;  %v2116_v1 = vpop.f32.mrf.mxu1  ;;  %2663 = vmatpush.bf16.msra.mxu1 %v5697_v49  ;;  %v5553_v49 = vor.u32 %v6635_v54, %v5550_v6 }
 0x297   :  { %v8950_v62 = vadd.f32 %v2212_v30, %v2164_v33  ;;  %v2117_v44 = vadd.f32 %v2116_v1, %v2068_v63  ;;  %v9866_v63 = vld [vmem:[#allocation25_spill] sm:$0xff] }
 0x298   :  { %2615 = vmatpush.bf16.msra.mxu0 %v5553_v49 }
 0x299   :  { %v2863_v12 = vmax.f32 %v2117_v44, 0.0 }
 0x29b   :  { %v8958_v40 = vpack.c.bf16 %v2863_v12, %v2859_v46  ;;  %v2165_v39 = vpop.f32.mrf.mxu2  ;;  %v6699_v46 = vld [vmem:[%s9692_s1 + $0x5cc] sm:$0xf] }
 0x29c   :  { %v2166_v26 = vadd.f32 %v2165_v39, %v8735_v31  ;;  %v2070_v33 = vpop.f32.mrf.mxu0 }
 0x29d   :  { %9864 = vst [vmem:[#allocation37_spill] sm:$0xff] %v8958_v40  ;;  %v2071_v30 = vadd.f32 %v2070_v33, %v8720_v32  ;;  %v5806_v32 = vld [vmem:[%s9692_s1 + $0x5d8] sm:$0xf0] }
 0x29e   :  { %v2214_v24 = vpop.f32.mrf.mxu3  ;;  %v2119_v35 = vpop.f32.mrf.mxu1  ;;  %v5809_v1 = vor.u32 %v6699_v46, %v5806_v32  ;;  %v5678_v46 = vld [vmem:[%s9692_s1 + $0x4d8] sm:$0xf0] }
 0x29f   :  { %v8962_v19 = vadd.f32 %v2214_v24, %v2166_v26  ;;  %v2120_v60 = vadd.f32 %v2119_v35, %v2071_v30  ;;  %2265 = vmatmul.bf16.gmra.mxu0 %v9865_v43  ;;  %v6667_v35 = vld [vmem:[%s9692_s1 + $0x4cc] sm:$0xf] }
 0x2a0   :  { %2363 = vmatmul.bf16.gmra.mxu2 %v9867_v18  ;;  %v5681_v54 = vor.u32 %v6667_v35, %v5678_v46 }
 0x2a1   :  { %2314 = vmatmul.bf16.gmra.mxu1 %v9866_v63  ;;  %2713 = vmatpush.bf16.msra.mxu2 %v5809_v1  ;;  %v2867_v6 = vmax.f32 %v2120_v60, 0.0  ;;  %v9868_v60 = vld [vmem:[#allocation9_spill] sm:$0xff] }
 0x2a2   :  { %2664 = vmatpush.bf16.msra.mxu1 %v5681_v54 }
 0x2a3   :  { %2412 = vmatmul.bf16.gmra.mxu3 %v9854_v38  ;;  %v2168_v44 = vpop.f32.mrf.mxu2 }
 0x2a4   :  { %v2169_v12 = vadd.f32 %v2168_v44, %v8735_v31  ;;  %v2072_v26 = vpop.f32.mrf.mxu0 }
 0x2a5   :  { %v2073_v24 = vadd.f32 %v2072_v26, %v8729_v58 }
 0x2a6   :  { %v2217_v39 = vpop.f32.mrf.mxu3  ;;  %v2121_v33 = vpop.f32.mrf.mxu1 }
 0x2a7   :  { %v8982_v30 = vadd.f32 %v2217_v39, %v2169_v12  ;;  %v2122_v32 = vadd.f32 %v2121_v33, %v2073_v24 }
 0x2a9   :  { %v2871_v44 = vmax.f32 %v2122_v32, 0.0 }
 0x2ab   :  { %v8990_v1 = vpack.c.bf16 %v2871_v44, %v2867_v6  ;;  %v2170_v58 = vpop.f32.mrf.mxu2 }
 0x2ac   :  { %v2171_v49 = vadd.f32 %v2170_v58, %v8735_v31  ;;  %v2231_v39 = vpop.f32.mrf.mxu0  ;;  %v6695_v31 = vld [vmem:[%s9692_s1 + $0x5ac] sm:$0xf] }
 0x2ad   :  { %v2232_v26 = vadd.f32 %v2231_v39, %v8752_v48  ;;  %v5790_v48 = vld [vmem:[%s9692_s1 + $0x5b8] sm:$0xf0]  ;;  %v6663_v58 = vld [vmem:[%s9692_s1 + $0x4ac] sm:$0xf] }
 0x2ae   :  { %v2219_v12 = vpop.f32.mrf.mxu3  ;;  %v2280_v40 = vpop.f32.mrf.mxu1  ;;  %v5793_v24 = vor.u32 %v6695_v31, %v5790_v48 }
 0x2af   :  { %v8994_v38 = vadd.f32 %v2219_v12, %v2171_v49  ;;  %v2281_v18 = vadd.f32 %v2280_v40, %v2232_v26  ;;  %5858 = vmatmul.msk.bf16.vlgmr.msrb.gmra.mxu0 %vm1413_vm0, %v9834_v25  ;;  %v6631_v40 = vld [vmem:[%s9692_s1 + $0x3ac] sm:$0xf]  ;;  %v5662_v49 = vld [vmem:[%s9692_s1 + $0x4b8] sm:$0xf0] }
 0x2b0   :  { %2524 = vmatmul.bf16.vlgmr.msrb.gmra.mxu2 %v9868_v60  ;;  %v5665_v39 = vor.u32 %v6663_v58, %v5662_v49 }
 0x2b1   :  { %2475 = vmatmul.bf16.vlgmr.msrb.gmra.mxu1 %v9835_v5  ;;  %v5534_v5 = vld [vmem:[%s9692_s1 + $0x3b8] sm:$0xf0]  ;;  %2714 = vmatpush.bf16.msra.mxu2 %v5793_v24 }
 0x2b2   :  { %v5537_v35 = vor.u32 %v6631_v40, %v5534_v5  ;;  %2665 = vmatpush.bf16.msra.mxu1 %v5665_v39  ;;  %v9869_v5 = vld [vmem:[#allocation30_spill] sm:$0xff] }
 0x2b3   :  { %2573 = vmatmul.bf16.vlgmr.msrb.gmra.mxu3 %v7275_v52  ;;  %v2329_v33 = vpop.f32.mrf.mxu2 }
 0x2b4   :  { %v2330_v52 = vadd.f32 %v2329_v33, %v2281_v18  ;;  %v2233_v32 = vpop.f32.mrf.mxu0  ;;  %2616 = vmatpush.bf16.msra.mxu0 %v5537_v35  ;;  %v9870_v33 = vld [vmem:[#allocation10_spill] sm:$0xff]  ;;  %v9871_v35 = vld [vmem:[#allocation11_spill] sm:$0xff] }
 0x2b5   :  { %v2234_v54 = vadd.f32 %v2233_v32, %v8764_v59 }
 0x2b6   :  { %v2378_v46 = vpop.f32.mrf.mxu3  ;;  %v2282_v6 = vpop.f32.mrf.mxu1 }
 0x2b7   :  { %v9014_v44 = vadd.f32 %v2378_v46, %v2330_v52  ;;  %v2283_v12 = vadd.f32 %v2282_v6, %v2234_v54  ;;  %v6691_v52 = vld [vmem:[%s9692_s1 + $0x58c] sm:$0xf]  ;;  %v5518_v54 = vld [vmem:[%s9692_s1 + $0x398] sm:$0xf0] }
 0x2b8   :  { %v6627_v46 = vld [vmem:[%s9692_s1 + $0x38c] sm:$0xf] }
 0x2b9   :  { %v5521_v58 = vor.u32 %v6627_v46, %v5518_v54  ;;  %v9872_v54 = vld [vmem:[#allocation32_spill] sm:$0xff] }
 0x2bb   :  { %v2331_v18 = vpop.f32.mrf.mxu2  ;;  %2617 = vmatpush.bf16.msra.mxu0 %v5521_v58  ;;  %v9874_v58 = vld [vmem:[#allocation13_spill] sm:$0xff] }
 0x2bc   :  { %v2332_v26 = vadd.f32 %v2331_v18, %v2283_v12  ;;  %v2236_v31 = vpop.f32.mrf.mxu0 }
 0x2bd   :  { %v2237_v59 = vadd.f32 %v2236_v31, %v8784_v23  ;;  %v5774_v23 = vld [vmem:[%s9692_s1 + $0x598] sm:$0xf0] }
 0x2be   :  { %v2380_v60 = vpop.f32.mrf.mxu3  ;;  %v2285_v48 = vpop.f32.mrf.mxu1  ;;  %v5777_v32 = vor.u32 %v6691_v52, %v5774_v23  ;;  %v5646_v31 = vld [vmem:[%s9692_s1 + $0x498] sm:$0xf0] }
 0x2bf   :  { %v9023_v40 = vadd.f32 %v2380_v60, %v2332_v26  ;;  %v2286_v24 = vadd.f32 %v2285_v48, %v2237_v59  ;;  %5859 = vmatmul.msk.bf16.gmra.mxu0 %vm1413_vm0, %v9869_v5  ;;  %v6659_v60 = vld [vmem:[%s9692_s1 + $0x48c] sm:$0xf] }
 0x2c0   :  { %2529 = vmatmul.bf16.gmra.mxu2 %v9871_v35  ;;  %v5649_v48 = vor.u32 %v6659_v60, %v5646_v31 }
 0x2c1   :  { %2480 = vmatmul.bf16.gmra.mxu1 %v9870_v33  ;;  %2715 = vmatpush.bf16.msra.mxu2 %v5777_v32 }
 0x2c2   :  { %2666 = vmatpush.bf16.msra.mxu1 %v5649_v48 }
 0x2c3   :  { %2578 = vmatmul.bf16.gmra.mxu3 %v7347_v20  ;;  %v2334_v6 = vpop.f32.mrf.mxu2 }
 0x2c4   :  { %v2335_v20 = vadd.f32 %v2334_v6, %v2286_v24  ;;  %v2238_v12 = vpop.f32.mrf.mxu0  ;;  %v9873_v6 = vld [vmem:[#allocation12_spill] sm:$0xff] }
 0x2c5   :  { %v2239_v39 = vadd.f32 %v2238_v12, %v8796_v34 }
 0x2c6   :  { %v2383_v49 = vpop.f32.mrf.mxu3  ;;  %v2287_v18 = vpop.f32.mrf.mxu1 }
 0x2c7   :  { %v9043_v26 = vadd.f32 %v2383_v49, %v2335_v20  ;;  %v2288_v59 = vadd.f32 %v2287_v18, %v2239_v39  ;;  %v6687_v20 = vld [vmem:[%s9692_s1 + $0x56c] sm:$0xf]  ;;  %v5502_v39 = vld [vmem:[%s9692_s1 + $0x378] sm:$0xf0] }
 0x2c8   :  { %v6623_v49 = vld [vmem:[%s9692_s1 + $0x36c] sm:$0xf] }
 0x2c9   :  { %v5505_v60 = vor.u32 %v6623_v49, %v5502_v39  ;;  %v9875_v39 = vld [vmem:[#allocation34_spill] sm:$0xff] }
 0x2cb   :  { %v2336_v24 = vpop.f32.mrf.mxu2  ;;  %2618 = vmatpush.bf16.msra.mxu0 %v5505_v60  ;;  %v9877_v60 = vld [vmem:[#allocation15_spill] sm:$0xff] }
 0x2cc   :  { %v2337_v33 = vadd.f32 %v2336_v24, %v2288_v59  ;;  %v2241_v52 = vpop.f32.mrf.mxu0 }
 0x2cd   :  { %v2242_v34 = vadd.f32 %v2241_v52, %v8816_v53  ;;  %v5758_v53 = vld [vmem:[%s9692_s1 + $0x578] sm:$0xf0] }
 0x2ce   :  { %v2385_v35 = vpop.f32.mrf.mxu3  ;;  %v2290_v23 = vpop.f32.mrf.mxu1  ;;  %v5761_v12 = vor.u32 %v6687_v20, %v5758_v53  ;;  %v5630_v52 = vld [vmem:[%s9692_s1 + $0x478] sm:$0xf0] }
 0x2cf   :  { %v9052_v46 = vadd.f32 %v2385_v35, %v2337_v33  ;;  %v2291_v32 = vadd.f32 %v2290_v23, %v2242_v34  ;;  %5860 = vmatmul.msk.bf16.gmra.mxu0 %vm1413_vm0, %v9872_v54  ;;  %v6655_v35 = vld [vmem:[%s9692_s1 + $0x46c] sm:$0xf] }
 0x2d0   :  { %2534 = vmatmul.bf16.gmra.mxu2 %v9874_v58  ;;  %v5633_v23 = vor.u32 %v6655_v35, %v5630_v52 }
 0x2d1   :  { %2485 = vmatmul.bf16.gmra.mxu1 %v9873_v6  ;;  %2716 = vmatpush.bf16.msra.mxu2 %v5761_v12 }
 0x2d2   :  { %2667 = vmatpush.bf16.msra.mxu1 %v5633_v23 }
 0x2d3   :  { %2583 = vmatmul.bf16.gmra.mxu3 %v7401_v41  ;;  %v2339_v18 = vpop.f32.mrf.mxu2 }
 0x2d4   :  { %v2340_v41 = vadd.f32 %v2339_v18, %v2291_v32  ;;  %v2243_v59 = vpop.f32.mrf.mxu0  ;;  %v9876_v18 = vld [vmem:[#allocation14_spill] sm:$0xff] }
 0x2d5   :  { %v2244_v48 = vadd.f32 %v2243_v59, %v8828_v0 }
 0x2d6   :  { %v2388_v31 = vpop.f32.mrf.mxu3  ;;  %v2292_v24 = vpop.f32.mrf.mxu1 }
 0x2d7   :  { %v9072_v33 = vadd.f32 %v2388_v31, %v2340_v41  ;;  %v2293_v34 = vadd.f32 %v2292_v24, %v2244_v48  ;;  %v6683_v41 = vld [vmem:[%s9692_s1 + $0x54c] sm:$0xf]  ;;  %v5486_v48 = vld [vmem:[%s9692_s1 + $0x358] sm:$0xf0] }
 0x2d8   :  { %v6619_v31 = vld [vmem:[%s9692_s1 + $0x34c] sm:$0xf] }
 0x2d9   :  { %v5489_v35 = vor.u32 %v6619_v31, %v5486_v48  ;;  %v9878_v48 = vld [vmem:[#allocation36_spill] sm:$0xff] }
 0x2db   :  { %v2341_v32 = vpop.f32.mrf.mxu2  ;;  %2619 = vmatpush.bf16.msra.mxu0 %v5489_v35  ;;  %v9880_v35 = vld [vmem:[#allocation17_spill] sm:$0xff] }
 0x2dc   :  { %v2342_v6 = vadd.f32 %v2341_v32, %v2293_v34  ;;  %v2246_v20 = vpop.f32.mrf.mxu0 }
 0x2dd   :  { %v2247_v0 = vadd.f32 %v2246_v20, %v8848_v50  ;;  %v5742_v50 = vld [vmem:[%s9692_s1 + $0x558] sm:$0xf0] }
 0x2de   :  { %v2390_v58 = vpop.f32.mrf.mxu3  ;;  %v2295_v53 = vpop.f32.mrf.mxu1  ;;  %v5745_v59 = vor.u32 %v6683_v41, %v5742_v50  ;;  %v5614_v20 = vld [vmem:[%s9692_s1 + $0x458] sm:$0xf0] }
 0x2df   :  { %v9081_v49 = vadd.f32 %v2390_v58, %v2342_v6  ;;  %v2296_v12 = vadd.f32 %v2295_v53, %v2247_v0  ;;  %5861 = vmatmul.msk.bf16.gmra.mxu0 %vm1413_vm0, %v9875_v39  ;;  %v6651_v58 = vld [vmem:[%s9692_s1 + $0x44c] sm:$0xf] }
 0x2e0   :  { %2539 = vmatmul.bf16.gmra.mxu2 %v9877_v60  ;;  %v5617_v53 = vor.u32 %v6651_v58, %v5614_v20 }
 0x2e1   :  { %2490 = vmatmul.bf16.gmra.mxu1 %v9876_v18  ;;  %2717 = vmatpush.bf16.msra.mxu2 %v5745_v59 }
 0x2e2   :  { %2668 = vmatpush.bf16.msra.mxu1 %v5617_v53 }
 0x2e3   :  { %2588 = vmatmul.bf16.gmra.mxu3 %v7455_v2  ;;  %v2344_v24 = vpop.f32.mrf.mxu2 }
 0x2e4   :  { %v2345_v2 = vadd.f32 %v2344_v24, %v2296_v12  ;;  %v2248_v34 = vpop.f32.mrf.mxu0  ;;  %v9879_v24 = vld [vmem:[#allocation16_spill] sm:$0xff] }
 0x2e5   :  { %v2249_v23 = vadd.f32 %v2248_v34, %v8860_v15 }
 0x2e6   :  { %v2393_v52 = vpop.f32.mrf.mxu3  ;;  %v2297_v32 = vpop.f32.mrf.mxu1 }
 0x2e7   :  { %v9101_v6 = vadd.f32 %v2393_v52, %v2345_v2  ;;  %v2298_v0 = vadd.f32 %v2297_v32, %v2249_v23  ;;  %v6679_v2 = vld [vmem:[%s9692_s1 + $0x52c] sm:$0xf]  ;;  %v5470_v23 = vld [vmem:[%s9692_s1 + $0x338] sm:$0xf0] }
 0x2e8   :  { %v6615_v52 = vld [vmem:[%s9692_s1 + $0x32c] sm:$0xf] }
 0x2e9   :  { %v5473_v58 = vor.u32 %v6615_v52, %v5470_v23  ;;  %v9881_v23 = vld [vmem:[#allocation38_spill] sm:$0xff] }
 0x2eb   :  { %v2346_v12 = vpop.f32.mrf.mxu2  ;;  %2620 = vmatpush.bf16.msra.mxu0 %v5473_v58  ;;  %v9883_v58 = vld [vmem:[#allocation19_spill] sm:$0xff] }
 0x2ec   :  { %v2347_v18 = vadd.f32 %v2346_v12, %v2298_v0  ;;  %v2251_v41 = vpop.f32.mrf.mxu0 }
 0x2ed   :  { %v2252_v15 = vadd.f32 %v2251_v41, %v8880_v7  ;;  %v5726_v7 = vld [vmem:[%s9692_s1 + $0x538] sm:$0xf0] }
 0x2ee   :  { %v2395_v60 = vpop.f32.mrf.mxu3  ;;  %v2300_v50 = vpop.f32.mrf.mxu1  ;;  %v5729_v34 = vor.u32 %v6679_v2, %v5726_v7  ;;  %v5598_v41 = vld [vmem:[%s9692_s1 + $0x438] sm:$0xf0] }
 0x2ef   :  { %v9110_v31 = vadd.f32 %v2395_v60, %v2347_v18  ;;  %v2301_v59 = vadd.f32 %v2300_v50, %v2252_v15  ;;  %5862 = vmatmul.msk.bf16.gmra.mxu0 %vm1413_vm0, %v9878_v48  ;;  %v6647_v60 = vld [vmem:[%s9692_s1 + $0x42c] sm:$0xf] }
 0x2f0   :  { %2544 = vmatmul.bf16.gmra.mxu2 %v9880_v35  ;;  %v5601_v50 = vor.u32 %v6647_v60, %v5598_v41 }
 0x2f1   :  { %2495 = vmatmul.bf16.gmra.mxu1 %v9879_v24  ;;  %2718 = vmatpush.bf16.msra.mxu2 %v5729_v34 }
 0x2f2   :  { %2669 = vmatpush.bf16.msra.mxu1 %v5601_v50 }
 0x2f3   :  { %2593 = vmatmul.bf16.gmra.mxu3 %v7509_v27  ;;  %v2349_v32 = vpop.f32.mrf.mxu2 }
 0x2f4   :  { %v2350_v27 = vadd.f32 %v2349_v32, %v2301_v59  ;;  %v2253_v0 = vpop.f32.mrf.mxu0  ;;  %v9882_v32 = vld [vmem:[#allocation18_spill] sm:$0xff] }
 0x2f5   :  { %v2254_v53 = vadd.f32 %v2253_v0, %v8892_v61 }
 0x2f6   :  { %v2398_v20 = vpop.f32.mrf.mxu3  ;;  %v2302_v12 = vpop.f32.mrf.mxu1 }
 0x2f7   :  { %v9130_v18 = vadd.f32 %v2398_v20, %v2350_v27  ;;  %v2303_v15 = vadd.f32 %v2302_v12, %v2254_v53  ;;  %v6675_v27 = vld [vmem:[%s9692_s1 + $0x50c] sm:$0xf]  ;;  %v5454_v53 = vld [vmem:[%s9692_s1 + $0x318] sm:$0xf0] }
 0x2f8   :  { %v6611_v20 = vld [vmem:[%s9692_s1 + $0x30c] sm:$0xf] }
 0x2f9   :  { %v5457_v60 = vor.u32 %v6611_v20, %v5454_v53  ;;  %v9884_v53 = vld [vmem:[#allocation41_spill] sm:$0xff] }
 0x2fb   :  { %v2351_v59 = vpop.f32.mrf.mxu2  ;;  %2621 = vmatpush.bf16.msra.mxu0 %v5457_v60  ;;  %v9886_v60 = vld [vmem:[#allocation21_spill] sm:$0xff] }
 0x2fc   :  { %v2352_v24 = vadd.f32 %v2351_v59, %v2303_v15  ;;  %v2256_v2 = vpop.f32.mrf.mxu0 }
 0x2fd   :  { %v2257_v61 = vadd.f32 %v2256_v2, %v8912_v51  ;;  %v5710_v51 = vld [vmem:[%s9692_s1 + $0x518] sm:$0xf0] }
 0x2fe   :  { %v2400_v35 = vpop.f32.mrf.mxu3  ;;  %v2305_v7 = vpop.f32.mrf.mxu1  ;;  %v5713_v0 = vor.u32 %v6675_v27, %v5710_v51  ;;  %v5582_v2 = vld [vmem:[%s9692_s1 + $0x418] sm:$0xf0] }
 0x2ff   :  { %v9139_v52 = vadd.f32 %v2400_v35, %v2352_v24  ;;  %v2306_v34 = vadd.f32 %v2305_v7, %v2257_v61  ;;  %5863 = vmatmul.msk.bf16.gmra.mxu0 %vm1413_vm0, %v9881_v23  ;;  %v6643_v35 = vld [vmem:[%s9692_s1 + $0x40c] sm:$0xf] }
 0x300   :  { %2549 = vmatmul.bf16.gmra.mxu2 %v9883_v58  ;;  %v5585_v7 = vor.u32 %v6643_v35, %v5582_v2 }
 0x301   :  { %2500 = vmatmul.bf16.gmra.mxu1 %v9882_v32  ;;  %2719 = vmatpush.bf16.msra.mxu2 %v5713_v0 }
 0x302   :  { %2670 = vmatpush.bf16.msra.mxu1 %v5585_v7 }
 0x303   :  { %2598 = vmatmul.bf16.gmra.mxu3 %v7563_v56  ;;  %v2354_v12 = vpop.f32.mrf.mxu2 }
 0x304   :  { %v2355_v56 = vadd.f32 %v2354_v12, %v2306_v34  ;;  %v2258_v15 = vpop.f32.mrf.mxu0  ;;  %v9885_v12 = vld [vmem:[#allocation20_spill] sm:$0xff] }
 0x305   :  { %v2259_v50 = vadd.f32 %v2258_v15, %v8924_v29 }
 0x306   :  { %v2403_v41 = vpop.f32.mrf.mxu3  ;;  %v2307_v59 = vpop.f32.mrf.mxu1 }
 0x307   :  { %v9159_v24 = vadd.f32 %v2403_v41, %v2355_v56  ;;  %v2308_v61 = vadd.f32 %v2307_v59, %v2259_v50 }
 0x30b   :  { %v2356_v34 = vpop.f32.mrf.mxu2 }
 0x30c   :  { %v2357_v32 = vadd.f32 %v2356_v34, %v2308_v61  ;;  %v2261_v27 = vpop.f32.mrf.mxu0 }
 0x30d   :  { %v2262_v29 = vadd.f32 %v2261_v27, %v8950_v62 }
 0x30e   :  { %v2405_v58 = vpop.f32.mrf.mxu3  ;;  %v2310_v51 = vpop.f32.mrf.mxu1 }
 0x30f   :  { %v9168_v20 = vadd.f32 %v2405_v58, %v2357_v32  ;;  %v2311_v0 = vadd.f32 %v2310_v51, %v2262_v29  ;;  %5864 = vmatmul.msk.bf16.gmra.mxu0 %vm1413_vm0, %v9884_v53  ;;  %v6244_v51 = vld [vmem:[#allocation2 + $0x2e0] sm:$0xf] }
 0x310   :  { %2554 = vmatmul.bf16.gmra.mxu2 %v9886_v60 }
 0x311   :  { %2505 = vmatmul.bf16.gmra.mxu1 %v9885_v12 }
 0x313   :  { %2603 = vmatmul.bf16.gmra.mxu3 %v7617_v17  ;;  %v2359_v56 = vpop.f32.mrf.mxu2 }
 0x314   :  { %v2360_v41 = vadd.f32 %v2359_v56, %v2311_v0  ;;  %v2263_v50 = vpop.f32.mrf.mxu0  ;;  %v6804_v0 = vld [vmem:[#allocation2 + $0x2ec] sm:$0xf0] }
 0x315   :  { %v2264_v59 = vadd.f32 %v2263_v50, %v8962_v19  ;;  %v9887_v19 = vld [vmem:[#allocation23_spill] sm:$0xff]  ;;  %v6245_v12 = vor.u32 %v6804_v0, %v6244_v51 }
 0x316   :  { %v2408_v15 = vpop.f32.mrf.mxu3  ;;  %v2312_v62 = vpop.f32.mrf.mxu1 }
 0x317   :  { %v9176_v35 = vadd.f32 %v2408_v15, %v2360_v41  ;;  %v2313_v2 = vadd.f32 %v2312_v62, %v2264_v59  ;;  %3782 = vmatpush.bf16.msrb.mxu2 %v6245_v12  ;;  %v5988_v62 = vld [vmem:[#allocation2 + $0xe0] sm:$0xf] }
 0x31b   :  { %v2361_v61 = vpop.f32.mrf.mxu2 }
 0x31c   :  { %v2362_v7 = vadd.f32 %v2361_v61, %v2313_v2  ;;  %v2266_v32 = vpop.f32.mrf.mxu0  ;;  %v6740_v2 = vld [vmem:[#allocation2 + $0xec] sm:$0xf0] }
 0x31d   :  { %v2267_v58 = vadd.f32 %v2266_v32, %v8982_v30  ;;  %v6116_v32 = vld [vmem:[#allocation2 + $0x1e0] sm:$0xf] }
 0x31e   :  { %v2410_v34 = vpop.f32.mrf.mxu3  ;;  %v2315_v27 = vpop.f32.mrf.mxu1 }
 0x31f   :  { %v9179_v29 = vadd.f32 %v2410_v34, %v2362_v7  ;;  %v2316_v17 = vadd.f32 %v2315_v27, %v2267_v58  ;;  %5865 = vmatmul.msk.bf16.gmra.mxu0 %vm1413_vm0, %v9855_v4  ;;  %v5989_v7 = vor.u32 %v6740_v2, %v5988_v62  ;;  %v6836_v34 = vld [vmem:[#allocation2 + $0x3ec] sm:$0xf0]  ;;  %v6228_v62 = vld [vmem:[#allocation2 + $0x2c0] sm:$0xf] }
 0x320   :  { %2559 = vmatmul.bf16.gmra.mxu2 %v9887_v19  ;;  %v6772_v58 = vld [vmem:[#allocation2 + $0x1ec] sm:$0xf0] }
 0x321   :  { %2510 = vmatmul.bf16.gmra.mxu1 %v9856_v16  ;;  %v6372_v16 = vld [vmem:[#allocation2 + $0x3e0] sm:$0xf]  ;;  %3684 = vmatpush.bf16.msrb.mxu0 %v5989_v7  ;;  %v6117_v27 = vor.u32 %v6772_v58, %v6116_v32  ;;  %v6800_v2 = vld [vmem:[#allocation2 + $0x2cc] sm:$0xf0] }
 0x322   :  { %v5972_v58 = vld [vmem:[#allocation2 + $0xc0] sm:$0xf] }
 0x323   :  { %2608 = vmatmul.bf16.gmra.mxu3 %v9865_v43  ;;  %v2364_v60 = vpop.f32.mrf.mxu2  ;;  %v6373_v43 = vor.u32 %v6836_v34, %v6372_v16  ;;  %3733 = vmatpush.bf16.msrb.mxu1 %v6117_v27  ;;  %v6229_v16 = vor.u32 %v6800_v2, %v6228_v62  ;;  %v6736_v27 = vld [vmem:[#allocation2 + $0xcc] sm:$0xf0] }
 0x324   :  { %v2365_v56 = vadd.f32 %v2364_v60, %v2316_v17  ;;  %v2268_v30 = vpop.f32.mrf.mxu0 }
 0x325   :  { %v2269_v15 = vadd.f32 %v2268_v30, %v8994_v38  ;;  %3831 = vmatpush.bf16.msrb.mxu3 %v6373_v43  ;;  %v6925_v38 = vld [vmem:[%s9693_s2] sm:$0xf]  ;;  %3783 = vmatpush.bf16.msrb.mxu2 %v6229_v16 }
 0x326   :  { %v2413_v41 = vpop.f32.mrf.mxu3  ;;  %v2317_v50 = vpop.f32.mrf.mxu1  ;;  %v9192_v12 = vperm.slane %v6925_v38, 3 }
 0x327   :  { %v9187_v59 = vadd.f32 %v2413_v41, %v2365_v56  ;;  %v2318_v61 = vadd.f32 %v2317_v50, %v2269_v15  ;;  %v9888_v15 = vld [vmem:[#allocation26_spill] sm:$0xff]  ;;  %v9889_v50 = vld [vmem:[#allocation27_spill] sm:$0xff] }
 0x32b   :  { %v2366_v17 = vpop.f32.mrf.mxu2 }
 0x32c   :  { %v2367_v19 = vadd.f32 %v2366_v17, %v2318_v61  ;;  %v2427_v0 = vpop.f32.mrf.mxu0  ;;  %v6356_v17 = vld [vmem:[#allocation2 + $0x3c0] sm:$0xf] }
 0x32d   :  { %v2428_v60 = vadd.f32 %v2427_v0, %v9014_v44  ;;  %v5973_v0 = vor.u32 %v6736_v27, %v5972_v58 }
 0x32e   :  { %v2415_v51 = vpop.f32.mrf.mxu3  ;;  %v2476_v56 = vpop.f32.mrf.mxu1 }
 0x32f   :  { %v9195_v41 = vadd.f32 %v2415_v51, %v2367_v19  ;;  %2622 = vmatmul.bf16.vlgmr.msra.gmra.mxu0 %v7283_v55  ;;  %v2477_v30 = vadd.f32 %v2476_v56, %v9192_v12  ;;  %v2812_v19 = vmax.f32 %v2428_v60, 0.0 }
 0x330   :  { %2720 = vmatmul.bf16.vlgmr.msra.gmra.mxu2 %v9889_v50  ;;  %3685 = vmatpush.bf16.msrb.mxu0 %v5973_v0 }
 0x331   :  { %2671 = vmatmul.bf16.vlgmr.msra.gmra.mxu1 %v9888_v15  ;;  %v6768_v15 = vld [vmem:[#allocation2 + $0x1cc] sm:$0xf0] }
 0x333   :  { %5866 = vmatmul.msk.bf16.vlgmr.msra.gmra.mxu3 %vm1413_vm0, %v9834_v25  ;;  %v2525_v61 = vpop.f32.mrf.mxu2  ;;  %v6832_v25 = vld [vmem:[#allocation2 + $0x3cc] sm:$0xf0] }
 0x334   :  { %v2526_v7 = vadd.f32 %v2525_v61, %v2477_v30  ;;  %v2429_v34 = vpop.f32.mrf.mxu0  ;;  %v6357_v38 = vor.u32 %v6832_v25, %v6356_v17  ;;  %v6100_v30 = vld [vmem:[#allocation2 + $0x1c0] sm:$0xf] }
 0x335   :  { %v2430_v43 = vadd.f32 %v2429_v34, %v9023_v40  ;;  %v6101_v40 = vor.u32 %v6768_v15, %v6100_v30  ;;  %v5956_v25 = vld [vmem:[#allocation2 + $0xa0] sm:$0xf] }
 0x336   :  { %v2574_v44 = vpop.f32.mrf.mxu3  ;;  %v2478_v55 = vpop.f32.mrf.mxu1  ;;  %3832 = vmatpush.bf16.msrb.mxu3 %v6357_v38  ;;  %v6340_v38 = vld [vmem:[#allocation2 + $0x3a0] sm:$0xf] }
 0x337   :  { %v9204_v32 = vadd.f32 %v2574_v44, %v2526_v7  ;;  %v2816_v51 = vmax.f32 %v2430_v43, 0.0  ;;  %v2479_v50 = vadd.f32 %v2478_v55, %v9192_v12  ;;  %3734 = vmatpush.bf16.msrb.mxu1 %v6101_v40  ;;  %v6212_v43 = vld [vmem:[#allocation2 + $0x2a0] sm:$0xf]  ;;  %v6796_v55 = vld [vmem:[#allocation2 + $0x2ac] sm:$0xf0] }
 0x338   :  { %v6213_v58 = vor.u32 %v6796_v55, %v6212_v43 }
 0x339   :  { %v9206_v56 = vpack.c.bf16 %v2816_v51, %v2812_v19 }
 0x33a   :  { %3784 = vmatpush.bf16.msrb.mxu2 %v6213_v58 }
 0x33b   :  { %v2527_v62 = vpop.f32.mrf.mxu2 }
 0x33c   :  { %v2528_v2 = vadd.f32 %v2527_v62, %v2479_v50  ;;  %v2432_v61 = vpop.f32.mrf.mxu0  ;;  %v6084_v62 = vld [vmem:[#allocation2 + $0x1a0] sm:$0xf] }
 0x33d   :  { %v2433_v60 = vadd.f32 %v2432_v61, %v9043_v26 }
 0x33e   :  { %v2576_v16 = vpop.f32.mrf.mxu3  ;;  %v2481_v7 = vpop.f32.mrf.mxu1 }
 0x33f   :  { %v9210_v44 = vadd.f32 %v2576_v16, %v2528_v2  ;;  %2627 = vmatmul.bf16.gmra.mxu0 %v7349_v21  ;;  %v2482_v34 = vadd.f32 %v2481_v7, %v9192_v12  ;;  %v6764_v2 = vld [vmem:[#allocation2 + $0x1ac] sm:$0xf0] }
 0x340   :  { %2725 = vmatmul.bf16.gmra.mxu2 %v9836_v37  ;;  %v2820_v37 = vmax.f32 %v2433_v60, 0.0 }
 0x341   :  { %2676 = vmatmul.bf16.gmra.mxu1 %v7789_v45  ;;  %v6732_v45 = vld [vmem:[#allocation2 + $0xac] sm:$0xf0] }
 0x342   :  { %v5957_v15 = vor.u32 %v6732_v45, %v5956_v25 }
 0x343   :  { %5867 = vmatmul.msk.bf16.gmra.mxu3 %vm1413_vm0, %v9869_v5  ;;  %v2530_v27 = vpop.f32.mrf.mxu2  ;;  %v6828_v5 = vld [vmem:[#allocation2 + $0x3ac] sm:$0xf0] }
 0x344   :  { %v2531_v17 = vadd.f32 %v2530_v27, %v2482_v34  ;;  %v2434_v19 = vpop.f32.mrf.mxu0  ;;  %v6341_v50 = vor.u32 %v6828_v5, %v6340_v38  ;;  %3686 = vmatpush.bf16.msrb.mxu0 %v5957_v15 }
 0x345   :  { %v2435_v51 = vadd.f32 %v2434_v19, %v9052_v46  ;;  %v6085_v46 = vor.u32 %v6764_v2, %v6084_v62  ;;  %v6068_v2 = vld [vmem:[#allocation2 + $0x180] sm:$0xf] }
 0x346   :  { %v2579_v26 = vpop.f32.mrf.mxu3  ;;  %v2483_v21 = vpop.f32.mrf.mxu1  ;;  %3833 = vmatpush.bf16.msrb.mxu3 %v6341_v50 }
 0x347   :  { %v9219_v0 = vadd.f32 %v2579_v26, %v2531_v17  ;;  %v2824_v30 = vmax.f32 %v2435_v51, 0.0  ;;  %v2484_v16 = vadd.f32 %v2483_v21, %v9192_v12  ;;  %3735 = vmatpush.bf16.msrb.mxu1 %v6085_v46  ;;  %v6196_v17 = vld [vmem:[#allocation2 + $0x280] sm:$0xf]  ;;  %v6792_v26 = vld [vmem:[#allocation2 + $0x28c] sm:$0xf0] }
 0x348   :  { %v6197_v19 = vor.u32 %v6792_v26, %v6196_v17  ;;  %v6180_v26 = vld [vmem:[#allocation2 + $0x260] sm:$0xf] }
 0x349   :  { %v9221_v40 = vpack.c.bf16 %v2824_v30, %v2820_v37  ;;  %v5940_v37 = vld [vmem:[#allocation2 + $0x80] sm:$0xf] }
 0x34a   :  { %3785 = vmatpush.bf16.msrb.mxu2 %v6197_v19  ;;  %v6324_v30 = vld [vmem:[#allocation2 + $0x380] sm:$0xf]  ;;  %v6788_v19 = vld [vmem:[#allocation2 + $0x26c] sm:$0xf0] }
 0x34b   :  { %v2532_v61 = vpop.f32.mrf.mxu2 }
 0x34c   :  { %v2533_v7 = vadd.f32 %v2532_v61, %v2484_v16  ;;  %v2437_v43 = vpop.f32.mrf.mxu0  ;;  %v6760_v16 = vld [vmem:[#allocation2 + $0x18c] sm:$0xf0] }
 0x34d   :  { %v2438_v60 = vadd.f32 %v2437_v43, %v9072_v33 }
 0x34e   :  { %v2581_v34 = vpop.f32.mrf.mxu3  ;;  %v2486_v55 = vpop.f32.mrf.mxu1 }
 0x34f   :  { %v9225_v58 = vadd.f32 %v2581_v34, %v2533_v7  ;;  %2632 = vmatmul.bf16.gmra.mxu0 %v7403_v42  ;;  %v2487_v27 = vadd.f32 %v2486_v55, %v9192_v12 }
 0x350   :  { %2730 = vmatmul.bf16.gmra.mxu2 %v9839_v47  ;;  %v2828_v47 = vmax.f32 %v2438_v60, 0.0 }
 0x351   :  { %2681 = vmatmul.bf16.gmra.mxu1 %v7848_v11  ;;  %v6728_v11 = vld [vmem:[#allocation2 + $0x8c] sm:$0xf0] }
 0x352   :  { %v5941_v5 = vor.u32 %v6728_v11, %v5940_v37  ;;  %v5924_v37 = vld [vmem:[#allocation2 + $0x60] sm:$0xf] }
 0x353   :  { %5868 = vmatmul.msk.bf16.gmra.mxu3 %vm1413_vm0, %v9872_v54  ;;  %v2535_v51 = vpop.f32.mrf.mxu2  ;;  %v6824_v54 = vld [vmem:[#allocation2 + $0x38c] sm:$0xf0]  ;;  %v6308_v11 = vld [vmem:[#allocation2 + $0x360] sm:$0xf] }
 0x354   :  { %v2536_v21 = vadd.f32 %v2535_v51, %v2487_v27  ;;  %v2439_v25 = vpop.f32.mrf.mxu0  ;;  %v6325_v50 = vor.u32 %v6824_v54, %v6324_v30  ;;  %3687 = vmatpush.bf16.msrb.mxu0 %v5941_v5  ;;  %v6181_v51 = vor.u32 %v6788_v19, %v6180_v26  ;;  %v6052_v54 = vld [vmem:[#allocation2 + $0x160] sm:$0xf] }
 0x355   :  { %v2440_v45 = vadd.f32 %v2439_v25, %v9081_v49  ;;  %v6069_v49 = vor.u32 %v6760_v16, %v6068_v2 }
 0x356   :  { %v2584_v33 = vpop.f32.mrf.mxu3  ;;  %v2488_v42 = vpop.f32.mrf.mxu1  ;;  %3834 = vmatpush.bf16.msrb.mxu3 %v6325_v50  ;;  %3786 = vmatpush.bf16.msrb.mxu2 %v6181_v51  ;;  %v6756_v50 = vld [vmem:[#allocation2 + $0x16c] sm:$0xf0] }
 0x357   :  { %v9234_v38 = vadd.f32 %v2584_v33, %v2536_v21  ;;  %v2832_v15 = vmax.f32 %v2440_v45, 0.0  ;;  %v2489_v46 = vadd.f32 %v2488_v42, %v9192_v12  ;;  %3736 = vmatpush.bf16.msrb.mxu1 %v6069_v49 }
 0x359   :  { %v9236_v62 = vpack.c.bf16 %v2832_v15, %v2828_v47 }
 0x35b   :  { %v2537_v61 = vpop.f32.mrf.mxu2 }
 0x35c   :  { %v2538_v7 = vadd.f32 %v2537_v61, %v2489_v46  ;;  %v2442_v43 = vpop.f32.mrf.mxu0 }
 0x35d   :  { %v2443_v60 = vadd.f32 %v2442_v43, %v9101_v6 }
 0x35e   :  { %v2586_v34 = vpop.f32.mrf.mxu3  ;;  %v2491_v55 = vpop.f32.mrf.mxu1 }
 0x35f   :  { %v9240_v27 = vadd.f32 %v2586_v34, %v2538_v7  ;;  %2637 = vmatmul.bf16.gmra.mxu0 %v7457_v3  ;;  %v2492_v17 = vadd.f32 %v2491_v55, %v9192_v12  ;;  %v6164_v55 = vld [vmem:[#allocation2 + $0x240] sm:$0xf] }
 0x360   :  { %2735 = vmatmul.bf16.gmra.mxu2 %v9842_v14  ;;  %v2836_v14 = vmax.f32 %v2443_v60, 0.0 }
 0x361   :  { %2686 = vmatmul.bf16.gmra.mxu1 %v7907_v8  ;;  %v6724_v8 = vld [vmem:[#allocation2 + $0x6c] sm:$0xf0] }
 0x362   :  { %v5925_v47 = vor.u32 %v6724_v8, %v5924_v37 }
 0x363   :  { %5869 = vmatmul.msk.bf16.gmra.mxu3 %vm1413_vm0, %v9875_v39  ;;  %v2540_v21 = vpop.f32.mrf.mxu2  ;;  %v6820_v39 = vld [vmem:[#allocation2 + $0x36c] sm:$0xf0] }
 0x364   :  { %v2541_v33 = vadd.f32 %v2540_v21, %v2492_v17  ;;  %v2444_v25 = vpop.f32.mrf.mxu0  ;;  %v6309_v15 = vor.u32 %v6820_v39, %v6308_v11  ;;  %3688 = vmatpush.bf16.msrb.mxu0 %v5925_v47  ;;  %v6784_v17 = vld [vmem:[#allocation2 + $0x24c] sm:$0xf0] }
 0x365   :  { %v2445_v45 = vadd.f32 %v2444_v25, %v9110_v31  ;;  %v6053_v31 = vor.u32 %v6756_v50, %v6052_v54  ;;  %v6165_v26 = vor.u32 %v6784_v17, %v6164_v55  ;;  %v5908_v25 = vld [vmem:[#allocation2 + $0x40] sm:$0xf] }
 0x366   :  { %v2589_v6 = vpop.f32.mrf.mxu3  ;;  %v2493_v3 = vpop.f32.mrf.mxu1  ;;  %3835 = vmatpush.bf16.msrb.mxu3 %v6309_v15 }
 0x367   :  { %v9249_v42 = vadd.f32 %v2589_v6, %v2541_v33  ;;  %v2840_v30 = vmax.f32 %v2445_v45, 0.0  ;;  %v2494_v2 = vadd.f32 %v2493_v3, %v9192_v12  ;;  %3737 = vmatpush.bf16.msrb.mxu1 %v6053_v31  ;;  %3787 = vmatpush.bf16.msrb.mxu2 %v6165_v26  ;;  %v6292_v45 = vld [vmem:[#allocation2 + $0x340] sm:$0xf] }
 0x368   :  { %v5892_v26 = vld [vmem:[#allocation2 + $0x20] sm:$0xf] }
 0x369   :  { %v9251_v5 = vpack.c.bf16 %v2840_v30, %v2836_v14  ;;  %v6036_v14 = vld [vmem:[#allocation2 + $0x140] sm:$0xf]  ;;  %v6752_v30 = vld [vmem:[#allocation2 + $0x14c] sm:$0xf0] }
 0x36b   :  { %v2542_v16 = vpop.f32.mrf.mxu2 }
 0x36c   :  { %v2543_v46 = vadd.f32 %v2542_v16, %v2494_v2  ;;  %v2447_v61 = vpop.f32.mrf.mxu0 }
 0x36d   :  { %v2448_v7 = vadd.f32 %v2447_v61, %v9130_v18 }
 0x36e   :  { %v2591_v49 = vpop.f32.mrf.mxu3  ;;  %v2496_v34 = vpop.f32.mrf.mxu1 }
 0x36f   :  { %v9255_v43 = vadd.f32 %v2591_v49, %v2543_v46  ;;  %2642 = vmatmul.bf16.gmra.mxu0 %v7511_v28  ;;  %v2497_v60 = vadd.f32 %v2496_v34, %v9192_v12  ;;  %v6148_v46 = vld [vmem:[#allocation2 + $0x220] sm:$0xf]  ;;  %v6780_v49 = vld [vmem:[#allocation2 + $0x22c] sm:$0xf0] }
 0x370   :  { %2740 = vmatmul.bf16.gmra.mxu2 %v9845_v36  ;;  %v2844_v36 = vmax.f32 %v2448_v7, 0.0  ;;  %v6149_v61 = vor.u32 %v6780_v49, %v6148_v46  ;;  %v9890_v49 = vld [vmem:[#allocation39_spill] sm:$0xff] }
 0x371   :  { %2691 = vmatmul.bf16.gmra.mxu1 %v7966_v10  ;;  %v6720_v10 = vld [vmem:[#allocation2 + $0x4c] sm:$0xf0] }
 0x372   :  { %v5909_v37 = vor.u32 %v6720_v10, %v5908_v25  ;;  %3788 = vmatpush.bf16.msrb.mxu2 %v6149_v61  ;;  %v9891_v61 = vld [vmem:[#allocation40_spill] sm:$0xff] }
 0x373   :  { %5870 = vmatmul.msk.bf16.gmra.mxu3 %vm1413_vm0, %v9878_v48  ;;  %v2545_v19 = vpop.f32.mrf.mxu2  ;;  %v6816_v48 = vld [vmem:[#allocation2 + $0x34c] sm:$0xf0] }
 0x374   :  { %v2546_v51 = vadd.f32 %v2545_v19, %v2497_v60  ;;  %v2449_v21 = vpop.f32.mrf.mxu0  ;;  %v6293_v8 = vor.u32 %v6816_v48, %v6292_v45  ;;  %3689 = vmatpush.bf16.msrb.mxu0 %v5909_v37  ;;  %v6276_v19 = vld [vmem:[#allocation2 + $0x320] sm:$0xf] }
 0x375   :  { %v2450_v33 = vadd.f32 %v2449_v21, %v9139_v52  ;;  %v6037_v52 = vor.u32 %v6752_v30, %v6036_v14  ;;  %v6020_v21 = vld [vmem:[#allocation2 + $0x120] sm:$0xf] }
 0x376   :  { %v2594_v18 = vpop.f32.mrf.mxu3  ;;  %v2498_v28 = vpop.f32.mrf.mxu1  ;;  %3836 = vmatpush.bf16.msrb.mxu3 %v6293_v8  ;;  %v6004_v37 = vld [vmem:[#allocation2 + $0x100] sm:$0xf] }
 0x377   :  { %v9264_v6 = vadd.f32 %v2594_v18, %v2546_v51  ;;  %v2848_v3 = vmax.f32 %v2450_v33, 0.0  ;;  %v2499_v47 = vadd.f32 %v2498_v28, %v9192_v12  ;;  %3738 = vmatpush.bf16.msrb.mxu1 %v6037_v52  ;;  %v6748_v28 = vld [vmem:[#allocation2 + $0x12c] sm:$0xf0]  ;;  %v6132_v52 = vld [vmem:[#allocation2 + $0x200] sm:$0xf] }
 0x378   :  { %v6021_v10 = vor.u32 %v6748_v28, %v6020_v21 }
 0x379   :  { %v9266_v11 = vpack.c.bf16 %v2848_v3, %v2844_v36  ;;  %v5876_v36 = vld [vmem:[#allocation2] sm:$0xf]  ;;  %v6712_v3 = vld [vmem:[#allocation2 + $0xc] sm:$0xf0] }
 0x37a   :  { %v5877_v30 = vor.u32 %v6712_v3, %v5876_v36  ;;  %v6802_v36 = vld [vmem:[#allocation2 + $0x2e4] sm:$0xf]  ;;  %v6246_v3 = vld [vmem:[#allocation2 + $0x2f0] sm:$0xf0] }
 0x37b   :  { %v2547_v39 = vpop.f32.mrf.mxu2  ;;  %3739 = vmatpush.bf16.msrb.mxu1 %v6021_v10 }
 0x37c   :  { %v9269_v15 = vadd.f32 %v2547_v39, %v2499_v47  ;;  %v2452_v50 = vpop.f32.mrf.mxu0  ;;  %v6744_v47 = vld [vmem:[#allocation2 + $0x10c] sm:$0xf0] }
 0x37d   :  { %v2453_v2 = vadd.f32 %v2452_v50, %v9159_v24  ;;  %v6776_v39 = vld [vmem:[#allocation2 + $0x20c] sm:$0xf0] }
 0x37e   :  { %v9271_v54 = vpop.f32.mrf.mxu3  ;;  %v2501_v31 = vpop.f32.mrf.mxu1 }
 0x37f   :  { %2647 = vmatmul.bf16.gmra.mxu0 %v7565_v57  ;;  %v2502_v16 = vadd.f32 %v2501_v31, %v9192_v12  ;;  %v6005_v31 = vor.u32 %v6744_v47, %v6004_v37 }
 0x380   :  { %2745 = vmatmul.bf16.gmra.mxu2 %v9848_v13  ;;  %v2852_v13 = vmax.f32 %v2453_v2, 0.0 }
 0x381   :  { %2696 = vmatmul.bf16.gmra.mxu1 %v8025_v9  ;;  %v6716_v9 = vld [vmem:[#allocation2 + $0x2c] sm:$0xf0] }
 0x382   :  { %v5893_v18 = vor.u32 %v6716_v9, %v5892_v26  ;;  %3740 = vmatpush.bf16.msrb.mxu1 %v6005_v31  ;;  %v6260_v9 = vld [vmem:[#allocation2 + $0x300] sm:$0xf]  ;;  %v6738_v31 = vld [vmem:[#allocation2 + $0xe4] sm:$0xf] }
 0x383   :  { %5871 = vmatmul.msk.bf16.gmra.mxu3 %vm1413_vm0, %v9881_v23  ;;  %v2550_v7 = vpop.f32.mrf.mxu2  ;;  %v6812_v23 = vld [vmem:[#allocation2 + $0x32c] sm:$0xf0] }
 0x384   :  { %v2551_v34 = vadd.f32 %v2550_v7, %v2502_v16  ;;  %v2454_v55 = vpop.f32.mrf.mxu0  ;;  %v6277_v33 = vor.u32 %v6812_v23, %v6276_v19  ;;  %3690 = vmatpush.bf16.msrb.mxu0 %v5893_v18  ;;  %v6133_v16 = vor.u32 %v6776_v39, %v6132_v52  ;;  %v6808_v19 = vld [vmem:[#allocation2 + $0x30c] sm:$0xf0] }
 0x385   :  { %v2455_v24 = vadd.f32 %v2454_v55, %v9168_v20 }
 0x386   :  { %v2599_v60 = vpop.f32.mrf.mxu3  ;;  %v2503_v57 = vpop.f32.mrf.mxu1  ;;  %3837 = vmatpush.bf16.msrb.mxu3 %v6277_v33  ;;  %3789 = vmatpush.bf16.msrb.mxu2 %v6133_v16  ;;  %v5990_v16 = vld [vmem:[#allocation2 + $0xf0] sm:$0xf0] }
 0x387   :  { %v9281_v17 = vadd.f32 %v2599_v60, %v2551_v34  ;;  %v2856_v51 = vmax.f32 %v2455_v24, 0.0  ;;  %v2504_v45 = vadd.f32 %v2503_v57, %v9192_v12 }
 0x388   :  { %3691 = vmatpush.bf16.msrb.mxu0 %v5877_v30 }
 0x389   :  { %v9283_v25 = vpack.c.bf16 %v2856_v51, %v2852_v13  ;;  %v6261_v51 = vor.u32 %v6808_v19, %v6260_v9  ;;  %v9894_v19 = vld [vmem:[#allocation45_spill] sm:$0xff] }
 0x38b   :  { %v2552_v20 = vpop.f32.mrf.mxu2  ;;  %3838 = vmatpush.bf16.msrb.mxu3 %v6261_v51  ;;  %v9895_v51 = vld [vmem:[#allocation28_spill] sm:$0xff] }
 0x38c   :  { %v9286_v48 = vadd.f32 %v2552_v20, %v2504_v45  ;;  %v2457_v14 = vpop.f32.mrf.mxu0  ;;  %v9892_v45 = vld [vmem:[#allocation42_spill] sm:$0xff]  ;;  %v9893_v20 = vld [vmem:[#allocation43_spill] sm:$0xff] }
 0x38d   :  { %v2458_v50 = vadd.f32 %v2457_v14, %v9176_v35  ;;  %v6249_v14 = vor.u32 %v6802_v36, %v6246_v3 }
 0x38e   :  { %v9288_v8 = vpop.f32.mrf.mxu3  ;;  %v2506_v2 = vpop.f32.mrf.mxu1 }
 0x38f   :  { %2652 = vmatmul.bf16.gmra.mxu0 %v7619_v22  ;;  %v2507_v46 = vadd.f32 %v2506_v2, %v9192_v12  ;;  %v2860_v22 = vmax.f32 %v2458_v50, 0.0  ;;  %3978 = vmatpush.bf16.msra.mxu2 %v6249_v14  ;;  %v5974_v14 = vld [vmem:[#allocation2 + $0xd0] sm:$0xf0] }
 0x390   :  { %2750 = vmatmul.bf16.gmra.mxu2 %v9891_v61  ;;  %v6374_v61 = vld [vmem:[#allocation2 + $0x3f0] sm:$0xf0] }
 0x391   :  { %2701 = vmatmul.bf16.gmra.mxu1 %v9890_v49 }
 0x393   :  { %5872 = vmatmul.msk.bf16.gmra.mxu3 %vm1413_vm0, %v9884_v53  ;;  %v2555_v7 = vpop.f32.mrf.mxu2 }
 0x394   :  { %v2556_v34 = vadd.f32 %v2555_v7, %v2507_v46  ;;  %v2459_v60 = vpop.f32.mrf.mxu0  ;;  %v6834_v46 = vld [vmem:[#allocation2 + $0x3e4] sm:$0xf] }
 0x395   :  { %v2460_v55 = vadd.f32 %v2459_v60, %v9179_v29  ;;  %v6770_v7 = vld [vmem:[#allocation2 + $0x1e4] sm:$0xf]  ;;  %v6377_v60 = vor.u32 %v6834_v46, %v6374_v61 }
 0x396   :  { %v2604_v35 = vpop.f32.mrf.mxu3  ;;  %v2508_v24 = vpop.f32.mrf.mxu1 }
 0x397   :  { %v9298_v57 = vadd.f32 %v2604_v35, %v2556_v34  ;;  %v2864_v26 = vmax.f32 %v2460_v55, 0.0  ;;  %v2509_v18 = vadd.f32 %v2508_v24, %v9192_v12  ;;  %v6118_v34 = vld [vmem:[#allocation2 + $0x1f0] sm:$0xf0]  ;;  %4027 = vmatpush.bf16.msra.mxu3 %v6377_v60 }
 0x398   :  { %v6121_v55 = vor.u32 %v6770_v7, %v6118_v34  ;;  %v9896_v34 = vld [vmem:[#allocation46_spill] sm:$0xff] }
 0x399   :  { %v9300_v13 = vpack.c.bf16 %v2864_v26, %v2860_v22 }
 0x39a   :  { %3929 = vmatpush.bf16.msra.mxu1 %v6121_v55  ;;  %v9897_v55 = vld [vmem:[#allocation8_spill] sm:$0xff] }
 0x39b   :  { %v2557_v53 = vpop.f32.mrf.mxu2 }
 0x39c   :  { %v9303_v23 = vadd.f32 %v2557_v53, %v2509_v18  ;;  %v2462_v33 = vpop.f32.mrf.mxu0  ;;  %v6798_v18 = vld [vmem:[#allocation2 + $0x2c4] sm:$0xf]  ;;  %v6230_v53 = vld [vmem:[#allocation2 + $0x2d0] sm:$0xf0] }
 0x39d   :  { %v2463_v29 = vadd.f32 %v2462_v33, %v9187_v59 }
 0x39e   :  { %v9305_v21 = vpop.f32.mrf.mxu3  ;;  %v2511_v28 = vpop.f32.mrf.mxu1 }
 0x39f   :  { %2657 = vmatmul.bf16.gmra.mxu0 %v9866_v63  ;;  %v2512_v10 = vadd.f32 %v2511_v28, %v9192_v12  ;;  %v2868_v50 = vmax.f32 %v2463_v29, 0.0  ;;  %v6233_v29 = vor.u32 %v6798_v18, %v6230_v53 }
 0x3a0   :  { %2755 = vmatmul.bf16.gmra.mxu2 %v9893_v20 }
 0x3a1   :  { %2706 = vmatmul.bf16.gmra.mxu1 %v9892_v45  ;;  %3979 = vmatpush.bf16.msra.mxu2 %v6233_v29 }
 0x3a3   :  { %5873 = vmatmul.msk.bf16.gmra.mxu3 %vm1413_vm0, %v9855_v4  ;;  %v2560_v37 = vpop.f32.mrf.mxu2  ;;  %v5993_v4 = vor.u32 %v6738_v31, %v5990_v16 }
 0x3a4   :  { %v2561_v30 = vadd.f32 %v2560_v37, %v2512_v10  ;;  %v2464_v52 = vpop.f32.mrf.mxu0  ;;  %v6734_v37 = vld [vmem:[#allocation2 + $0xc4] sm:$0xf] }
 0x3a5   :  { %v2465_v59 = vadd.f32 %v2464_v52, %v9195_v41  ;;  %3880 = vmatpush.bf16.msra.mxu0 %v5993_v4  ;;  %v6358_v52 = vld [vmem:[#allocation2 + $0x3d0] sm:$0xf0] }
 0x3a6   :  { %v2609_v47 = vpop.f32.mrf.mxu3  ;;  %v2513_v39 = vpop.f32.mrf.mxu1 }
 0x3a7   :  { %v9315_v63 = vadd.f32 %v2609_v47, %v2561_v30  ;;  %v2872_v2 = vmax.f32 %v2465_v59, 0.0  ;;  %v2514_v35 = vadd.f32 %v2513_v39, %v9192_v12  ;;  %v5977_v30 = vor.u32 %v6734_v37, %v5974_v14  ;;  %v6830_v47 = vld [vmem:[#allocation2 + $0x3c4] sm:$0xf] }
 0x3a8   :  { %v6766_v59 = vld [vmem:[#allocation2 + $0x1c4] sm:$0xf] }
 0x3a9   :  { %v9317_v49 = vpack.c.bf16 %v2872_v2, %v2868_v50  ;;  %v6102_v50 = vld [vmem:[#allocation2 + $0x1d0] sm:$0xf0]  ;;  %3881 = vmatpush.bf16.msra.mxu0 %v5977_v30  ;;  %v6826_v14 = vld [vmem:[#allocation2 + $0x3a4] sm:$0xf] }
 0x3aa   :  { %v6105_v31 = vor.u32 %v6766_v59, %v6102_v50  ;;  %v6342_v30 = vld [vmem:[#allocation2 + $0x3b0] sm:$0xf0] }
 0x3ab   :  { %v2562_v41 = vpop.f32.mrf.mxu2  ;;  %v6086_v59 = vld [vmem:[#allocation2 + $0x1b0] sm:$0xf0] }
 0x3ac   :  { %v9320_v24 = vadd.f32 %v2562_v41, %v2514_v35  ;;  %v2623_v26 = vpop.f32.mrf.mxu0  ;;  %3930 = vmatpush.bf16.msra.mxu1 %v6105_v31 }
 0x3ad   :  { %v2624_v12 = vadd.f32 %v2623_v26, %v9204_v32  ;;  %v6361_v32 = vor.u32 %v6830_v47, %v6358_v52  ;;  %v6345_v52 = vor.u32 %v6826_v14, %v6342_v30  ;;  %v6326_v14 = vld [vmem:[#allocation2 + $0x390] sm:$0xf0] }
 0x3ae   :  { %v9322_v22 = vpop.f32.mrf.mxu3  ;;  %v2672_v9 = vpop.f32.mrf.mxu1 }
 0x3af   :  { %3692 = vmatmul.bf16.vlgmr.msrb.gmra.mxu0 %v9894_v19  ;;  %v2673_v20 = vadd.f32 %v2672_v9, %v2624_v12  ;;  %4028 = vmatpush.bf16.msra.mxu3 %v6361_v32  ;;  %v6794_v9 = vld [vmem:[#allocation2 + $0x2a4] sm:$0xf]  ;;  %v6214_v12 = vld [vmem:[#allocation2 + $0x2b0] sm:$0xf0] }
 0x3b0   :  { %3790 = vmatmul.bf16.vlgmr.msrb.gmra.mxu2 %v9206_v56  ;;  %v6217_v53 = vor.u32 %v6794_v9, %v6214_v12  ;;  %v6198_v9 = vld [vmem:[#allocation2 + $0x290] sm:$0xf0] }
 0x3b1   :  { %3741 = vmatmul.bf16.vlgmr.msrb.gmra.mxu1 %v9895_v51 }
 0x3b2   :  { %3980 = vmatpush.bf16.msra.mxu2 %v6217_v53 }
 0x3b3   :  { %v2721_v33 = vpop.f32.mrf.mxu2  ;;  %4029 = vmatpush.bf16.msra.mxu3 %v6345_v52 }
 0x3b4   :  { %v2625_v10 = vpop.f32.mrf.mxu0  ;;  %v2722_v3 = vadd.f32 %v2721_v33, %v2673_v20 }
 0x3b5   :  { %v2626_v36 = vadd.f32 %v2625_v10, %v9210_v44 }
 0x3b6   :  { %v2770_v28 = vpop.f32.mrf.mxu3  ;;  %v2674_v45 = vpop.f32.mrf.mxu1 }
 0x3b7   :  { %v2675_v39 = vadd.f32 %v2674_v45, %v2626_v36  ;;  %v2771_v16 = vadd.f32 %v2770_v28, %v2722_v3  ;;  %v6730_v36 = vld [vmem:[#allocation2 + $0xa4] sm:$0xf]  ;;  %v5958_v3 = vld [vmem:[#allocation2 + $0xb0] sm:$0xf0] }
 0x3b8   :  { %v5961_v37 = vor.u32 %v6730_v36, %v5958_v3  ;;  %v5942_v36 = vld [vmem:[#allocation2 + $0x90] sm:$0xf0] }
 0x3b9   :  { %v2813_v35 = vmax.f32 %v2771_v16, 0.0 }
 0x3ba   :  { %3882 = vmatpush.bf16.msra.mxu0 %v5961_v37  ;;  %v6822_v37 = vld [vmem:[#allocation2 + $0x384] sm:$0xf] }
 0x3bb   :  { %v2723_v2 = vpop.f32.mrf.mxu2 }
 0x3bc   :  { %v2724_v46 = vadd.f32 %v2723_v2, %v2675_v39  ;;  %v2628_v61 = vpop.f32.mrf.mxu0 }
 0x3bd   :  { %v2629_v26 = vadd.f32 %v2628_v61, %v9219_v0  ;;  %v6762_v0 = vld [vmem:[#allocation2 + $0x1a4] sm:$0xf] }
 0x3be   :  { %v2772_v4 = vpop.f32.mrf.mxu3  ;;  %v2677_v7 = vpop.f32.mrf.mxu1  ;;  %v6089_v32 = vor.u32 %v6762_v0, %v6086_v59  ;;  %v6329_v0 = vor.u32 %v6822_v37, %v6326_v14  ;;  %v6818_v37 = vld [vmem:[#allocation2 + $0x364] sm:$0xf]  ;;  %v6310_v14 = vld [vmem:[#allocation2 + $0x370] sm:$0xf0] }
 0x3bf   :  { %v2773_v44 = vadd.f32 %v2772_v4, %v2724_v46  ;;  %3697 = vmatmul.bf16.gmra.mxu0 %v9896_v34  ;;  %v2678_v10 = vadd.f32 %v2677_v7, %v2629_v26  ;;  %v9898_v4 = vld [vmem:[#allocation47_spill] sm:$0xff]  ;;  %v6790_v26 = vld [vmem:[#allocation2 + $0x284] sm:$0xf] }
 0x3c0   :  { %3795 = vmatmul.bf16.gmra.mxu2 %v9221_v40  ;;  %3931 = vmatpush.bf16.msra.mxu1 %v6089_v32 }
 0x3c1   :  { %v2817_v60 = vmax.f32 %v2773_v44, 0.0  ;;  %3746 = vmatmul.bf16.gmra.mxu1 %v9897_v55  ;;  %v9899_v44 = vld [vmem:[#allocation29_spill] sm:$0xff]  ;;  %4030 = vmatpush.bf16.msra.mxu3 %v6329_v0  ;;  %v6054_v0 = vld [vmem:[#allocation2 + $0x170] sm:$0xf0] }
 0x3c3   :  { %v9332_v41 = vpack.c.bf16 %v2817_v60, %v2813_v35  ;;  %v2726_v18 = vpop.f32.mrf.mxu2 }
 0x3c4   :  { %v2630_v29 = vpop.f32.mrf.mxu0  ;;  %v2727_v20 = vadd.f32 %v2726_v18, %v2678_v10  ;;  %v6201_v18 = vor.u32 %v6790_v26, %v6198_v9  ;;  %v6786_v26 = vld [vmem:[#allocation2 + $0x264] sm:$0xf]  ;;  %v6182_v9 = vld [vmem:[#allocation2 + $0x270] sm:$0xf0] }
 0x3c5   :  { %3839 = vmatmul.bf16.vlgmr.msrb.gmra.mxu3 %v9332_v41  ;;  %v2631_v45 = vadd.f32 %v2630_v29, %v9225_v58 }
 0x3c6   :  { %v2775_v33 = vpop.f32.mrf.mxu3  ;;  %v2679_v28 = vpop.f32.mrf.mxu1  ;;  %3981 = vmatpush.bf16.msra.mxu2 %v6201_v18  ;;  %v6185_v18 = vor.u32 %v6786_v26, %v6182_v9  ;;  %v6782_v9 = vld [vmem:[#allocation2 + $0x244] sm:$0xf] }
 0x3c7   :  { %v2680_v47 = vadd.f32 %v2679_v28, %v2631_v45  ;;  %v2776_v50 = vadd.f32 %v2775_v33, %v2727_v20  ;;  %v6726_v20 = vld [vmem:[#allocation2 + $0x84] sm:$0xf] }
 0x3c8   :  { %v5945_v3 = vor.u32 %v6726_v20, %v5942_v36  ;;  %v6722_v20 = vld [vmem:[#allocation2 + $0x64] sm:$0xf]  ;;  %v5926_v36 = vld [vmem:[#allocation2 + $0x70] sm:$0xf0] }
 0x3c9   :  { %v2821_v61 = vmax.f32 %v2776_v50, 0.0 }
 0x3ca   :  { %3883 = vmatpush.bf16.msra.mxu0 %v5945_v3  ;;  %3982 = vmatpush.bf16.msra.mxu2 %v6185_v18  ;;  %v5929_v3 = vor.u32 %v6722_v20, %v5926_v36 }
 0x3cb   :  { %v2728_v39 = vpop.f32.mrf.mxu2 }
 0x3cc   :  { %v2729_v2 = vadd.f32 %v2728_v39, %v2680_v47  ;;  %v2633_v16 = vpop.f32.mrf.mxu0  ;;  %v6070_v47 = vld [vmem:[#allocation2 + $0x190] sm:$0xf0] }
 0x3cd   :  { %v2634_v60 = vadd.f32 %v2633_v16, %v9234_v38  ;;  %v6758_v38 = vld [vmem:[#allocation2 + $0x184] sm:$0xf] }
 0x3ce   :  { %v2777_v31 = vpop.f32.mrf.mxu3  ;;  %v2682_v46 = vpop.f32.mrf.mxu1  ;;  %v6073_v59 = vor.u32 %v6758_v38, %v6070_v47  ;;  %v9900_v16 = vld [vmem:[#allocation48_spill] sm:$0xff]  ;;  %3884 = vmatpush.bf16.msra.mxu0 %v5929_v3 }
 0x3cf   :  { %v2778_v58 = vadd.f32 %v2777_v31, %v2729_v2  ;;  %3702 = vmatmul.bf16.gmra.mxu0 %v9898_v4  ;;  %v2683_v28 = vadd.f32 %v2682_v46, %v2634_v60  ;;  %v6718_v3 = vld [vmem:[#allocation2 + $0x44] sm:$0xf] }
 0x3d0   :  { %3800 = vmatmul.bf16.gmra.mxu2 %v9236_v62  ;;  %3932 = vmatpush.bf16.msra.mxu1 %v6073_v59 }
 0x3d1   :  { %v2825_v7 = vmax.f32 %v2778_v58, 0.0  ;;  %3751 = vmatmul.bf16.gmra.mxu1 %v9899_v44 }
 0x3d3   :  { %v9340_v35 = vpack.c.bf16 %v2825_v7, %v2821_v61  ;;  %v2731_v12 = vpop.f32.mrf.mxu2  ;;  %v9901_v61 = vld [vmem:[#allocation31_spill] sm:$0xff] }
 0x3d4   :  { %v2635_v33 = vpop.f32.mrf.mxu0  ;;  %v2732_v45 = vadd.f32 %v2731_v12, %v2683_v28 }
 0x3d5   :  { %3844 = vmatmul.bf16.gmra.mxu3 %v9340_v35  ;;  %v2636_v10 = vadd.f32 %v2635_v33, %v9240_v27 }
 0x3d6   :  { %v2780_v53 = vpop.f32.mrf.mxu3  ;;  %v2684_v29 = vpop.f32.mrf.mxu1 }
 0x3d7   :  { %v2685_v30 = vadd.f32 %v2684_v29, %v2636_v10  ;;  %v2781_v39 = vadd.f32 %v2780_v53, %v2732_v45 }
 0x3d9   :  { %v2829_v46 = vmax.f32 %v2781_v39, 0.0 }
 0x3db   :  { %v2733_v52 = vpop.f32.mrf.mxu2 }
 0x3dc   :  { %v2734_v32 = vadd.f32 %v2733_v52, %v2685_v30  ;;  %v2638_v2 = vpop.f32.mrf.mxu0  ;;  %v6313_v30 = vor.u32 %v6818_v37, %v6310_v14  ;;  %v5910_v37 = vld [vmem:[#allocation2 + $0x50] sm:$0xf0] }
 0x3dd   :  { %v2639_v60 = vadd.f32 %v2638_v2, %v9249_v42  ;;  %v6754_v42 = vld [vmem:[#allocation2 + $0x164] sm:$0xf]  ;;  %v5913_v14 = vor.u32 %v6718_v3, %v5910_v37 }
 0x3de   :  { %v2782_v50 = vpop.f32.mrf.mxu3  ;;  %v2687_v31 = vpop.f32.mrf.mxu1  ;;  %v6057_v52 = vor.u32 %v6754_v42, %v6054_v0  ;;  %4031 = vmatpush.bf16.msra.mxu3 %v6313_v30  ;;  %v6294_v42 = vld [vmem:[#allocation2 + $0x350] sm:$0xf0]  ;;  %v6714_v37 = vld [vmem:[#allocation2 + $0x24] sm:$0xf] }
 0x3df   :  { %v2783_v27 = vadd.f32 %v2782_v50, %v2734_v32  ;;  %3707 = vmatmul.bf16.gmra.mxu0 %v9900_v16  ;;  %v2688_v28 = vadd.f32 %v2687_v31, %v2639_v60  ;;  %v9902_v31 = vld [vmem:[#allocation49_spill] sm:$0xff] }
 0x3e0   :  { %3805 = vmatmul.bf16.gmra.mxu2 %v9251_v5  ;;  %3933 = vmatpush.bf16.msra.mxu1 %v6057_v52 }
 0x3e1   :  { %v2833_v58 = vmax.f32 %v2783_v27, 0.0  ;;  %3756 = vmatmul.bf16.gmra.mxu1 %v9901_v61  ;;  %3885 = vmatpush.bf16.msra.mxu0 %v5913_v14  ;;  %v5894_v14 = vld [vmem:[#allocation2 + $0x30] sm:$0xf0] }
 0x3e3   :  { %v9348_v7 = vpack.c.bf16 %v2833_v58, %v2829_v46  ;;  %v2736_v12 = vpop.f32.mrf.mxu2  ;;  %v9903_v58 = vld [vmem:[#allocation33_spill] sm:$0xff] }
 0x3e4   :  { %v2640_v33 = vpop.f32.mrf.mxu0  ;;  %v2737_v45 = vadd.f32 %v2736_v12, %v2688_v28  ;;  %v6166_v12 = vld [vmem:[#allocation2 + $0x250] sm:$0xf0] }
 0x3e5   :  { %3849 = vmatmul.bf16.gmra.mxu3 %v9348_v7  ;;  %v2641_v10 = vadd.f32 %v2640_v33, %v9255_v43  ;;  %v2597_v33 = vadd.f32 %v9271_v54, %v9269_v15 }
 0x3e6   :  { %v2785_v53 = vpop.f32.mrf.mxu3  ;;  %v2689_v29 = vpop.f32.mrf.mxu1 }
 0x3e7   :  { %v2690_v38 = vadd.f32 %v2689_v29, %v2641_v10  ;;  %v2786_v59 = vadd.f32 %v2785_v53, %v2737_v45  ;;  %v6169_v53 = vor.u32 %v6782_v9, %v6166_v12 }
 0x3e9   :  { %v2837_v27 = vmax.f32 %v2786_v59, 0.0  ;;  %3983 = vmatpush.bf16.msra.mxu2 %v6169_v53  ;;  %v6150_v53 = vld [vmem:[#allocation2 + $0x230] sm:$0xf0] }
 0x3eb   :  { %v2738_v47 = vpop.f32.mrf.mxu2 }
 0x3ec   :  { %v2739_v39 = vadd.f32 %v2738_v47, %v2690_v38  ;;  %v2643_v50 = vpop.f32.mrf.mxu0  ;;  %v6750_v38 = vld [vmem:[#allocation2 + $0x144] sm:$0xf]  ;;  %v6038_v47 = vld [vmem:[#allocation2 + $0x150] sm:$0xf0] }
 0x3ed   :  { %v2644_v26 = vadd.f32 %v2643_v50, %v9264_v6  ;;  %v6814_v6 = vld [vmem:[#allocation2 + $0x344] sm:$0xf]  ;;  %v6041_v15 = vor.u32 %v6750_v38, %v6038_v47  ;;  %v6022_v47 = vld [vmem:[#allocation2 + $0x130] sm:$0xf0] }
 0x3ee   :  { %v2787_v32 = vpop.f32.mrf.mxu3  ;;  %v2692_v2 = vpop.f32.mrf.mxu1  ;;  %v6297_v0 = vor.u32 %v6814_v6, %v6294_v42  ;;  %v6746_v6 = vld [vmem:[#allocation2 + $0x124] sm:$0xf] }
 0x3ef   :  { %v2788_v43 = vadd.f32 %v2787_v32, %v2739_v39  ;;  %3712 = vmatmul.bf16.gmra.mxu0 %v9902_v31  ;;  %v2693_v45 = vadd.f32 %v2692_v2, %v2644_v26  ;;  %3934 = vmatpush.bf16.msra.mxu1 %v6041_v15  ;;  %v9905_v26 = vld [vmem:[#allocation35_spill] sm:$0xff]  ;;  %v6810_v38 = vld [vmem:[#allocation2 + $0x324] sm:$0xf] }
 0x3f0   :  { %3810 = vmatmul.bf16.gmra.mxu2 %v9266_v11  ;;  %4032 = vmatpush.bf16.msra.mxu3 %v6297_v0  ;;  %v6710_v15 = vld [vmem:[#allocation2 + $0x4] sm:$0xf] }
 0x3f1   :  { %v2841_v46 = vmax.f32 %v2788_v43, 0.0  ;;  %3761 = vmatmul.bf16.gmra.mxu1 %v9903_v58  ;;  %v9904_v43 = vld [vmem:[#allocation50_spill] sm:$0xff] }
 0x3f3   :  { %v9356_v60 = vpack.c.bf16 %v2841_v46, %v2837_v27  ;;  %v2741_v18 = vpop.f32.mrf.mxu2 }
 0x3f4   :  { %v2645_v28 = vpop.f32.mrf.mxu0  ;;  %v2742_v36 = vadd.f32 %v2741_v18, %v2693_v45  ;;  %v6778_v18 = vld [vmem:[#allocation2 + $0x224] sm:$0xf] }
 0x3f5   :  { %3854 = vmatmul.bf16.gmra.mxu3 %v9356_v60  ;;  %v2646_v20 = vadd.f32 %v2645_v28, %v2597_v33  ;;  %v2602_v28 = vadd.f32 %v9288_v8, %v9286_v48  ;;  %v6025_v48 = vor.u32 %v6746_v6, %v6022_v47  ;;  %v2607_v6 = vadd.f32 %v9305_v21, %v9303_v23  ;;  %v9908_v21 = vld [vmem:[#allocation52_spill] sm:$0xff] }
 0x3f6   :  { %v2790_v29 = vpop.f32.mrf.mxu3  ;;  %v2694_v10 = vpop.f32.mrf.mxu1 }
 0x3f7   :  { %v2695_v30 = vadd.f32 %v2694_v10, %v2646_v20  ;;  %v2791_v54 = vadd.f32 %v2790_v29, %v2742_v36  ;;  %v6153_v29 = vor.u32 %v6778_v18, %v6150_v53  ;;  %3935 = vmatpush.bf16.msra.mxu1 %v6025_v48 }
 0x3f9   :  { %v2845_v27 = vmax.f32 %v2791_v54, 0.0  ;;  %3984 = vmatpush.bf16.msra.mxu2 %v6153_v29  ;;  %v5878_v54 = vld [vmem:[#allocation2 + $0x10] sm:$0xf0] }
 0x3fb   :  { %v2743_v52 = vpop.f32.mrf.mxu2 }
 0x3fc   :  { %v2744_v59 = vadd.f32 %v2743_v52, %v2695_v30  ;;  %v2648_v32 = vpop.f32.mrf.mxu0  ;;  %v6278_v30 = vld [vmem:[#allocation2 + $0x330] sm:$0xf0] }
 0x3fd   :  { %v2649_v12 = vadd.f32 %v2648_v32, %v9281_v17  ;;  %v5897_v17 = vor.u32 %v6714_v37, %v5894_v14  ;;  %v6281_v0 = vor.u32 %v6810_v38, %v6278_v30  ;;  %v6806_v38 = vld [vmem:[#allocation2 + $0x304] sm:$0xf]  ;;  %v6262_v30 = vld [vmem:[#allocation2 + $0x310] sm:$0xf0] }
 0x3fe   :  { %v2792_v39 = vpop.f32.mrf.mxu3  ;;  %v2697_v50 = vpop.f32.mrf.mxu1  ;;  %v6265_v47 = vor.u32 %v6806_v38, %v6262_v30  ;;  %v6837_v38 = vld [vmem:[#allocation2 + $0x3f4] sm:$0xf0] }
 0x3ff   :  { %v2793_v2 = vadd.f32 %v2792_v39, %v2744_v59  ;;  %3717 = vmatmul.bf16.gmra.mxu0 %v9904_v43  ;;  %v2698_v36 = vadd.f32 %v2697_v50, %v2649_v12  ;;  %4033 = vmatpush.bf16.msra.mxu3 %v6281_v0  ;;  %v6742_v59 = vld [vmem:[#allocation2 + $0x104] sm:$0xf] }
 0x400   :  { %3815 = vmatmul.bf16.gmra.mxu2 %v9283_v25  ;;  %3886 = vmatpush.bf16.msra.mxu0 %v5897_v17  ;;  %v6774_v12 = vld [vmem:[#allocation2 + $0x204] sm:$0xf] }
 0x401   :  { %v2849_v46 = vmax.f32 %v2793_v2, 0.0  ;;  %3766 = vmatmul.bf16.gmra.mxu1 %v9905_v26 }
 0x403   :  { %v9365_v9 = vpack.c.bf16 %v2849_v46, %v2845_v27  ;;  %v2746_v33 = vpop.f32.mrf.mxu2  ;;  %v5881_v27 = vor.u32 %v6710_v15, %v5878_v54  ;;  %v6006_v46 = vld [vmem:[#allocation2 + $0x110] sm:$0xf0]  ;;  %4034 = vmatpush.bf16.msra.mxu3 %v6265_v47 }
 0x404   :  { %v2650_v45 = vpop.f32.mrf.mxu0  ;;  %v2747_v42 = vadd.f32 %v2746_v33, %v2698_v36  ;;  %v6009_v53 = vor.u32 %v6742_v59, %v6006_v46  ;;  %v6134_v33 = vld [vmem:[#allocation2 + $0x210] sm:$0xf0]  ;;  %v6252_v46 = vld [vmem:[#allocation2 + $0x2e8] sm:$0xf] }
 0x405   :  { %3859 = vmatmul.bf16.gmra.mxu3 %v9365_v9  ;;  %v2651_v3 = vadd.f32 %v2650_v45, %v2602_v28  ;;  %3887 = vmatpush.bf16.msra.mxu0 %v5881_v27  ;;  %v6137_v28 = vor.u32 %v6774_v12, %v6134_v33  ;;  %v9906_v45 = vld [vmem:[#allocation51_spill] sm:$0xff] }
 0x406   :  { %v2795_v10 = vpop.f32.mrf.mxu3  ;;  %v2699_v20 = vpop.f32.mrf.mxu1  ;;  %3936 = vmatpush.bf16.msra.mxu1 %v6009_v53  ;;  %v6805_v12 = vld [vmem:[#allocation2 + $0x2f4] sm:$0xf0] }
 0x407   :  { %v2700_v52 = vadd.f32 %v2699_v20, %v2651_v3  ;;  %v2796_v39 = vadd.f32 %v2795_v10, %v2747_v42  ;;  %v9907_v3 = vld [vmem:[#allocation37_spill] sm:$0xff]  ;;  %3985 = vmatpush.bf16.msra.mxu2 %v6137_v28  ;;  %v2612_v28 = vadd.f32 %v9322_v22, %v9320_v24  ;;  %v6773_v22 = vld [vmem:[#allocation2 + $0x1f4] sm:$0xf0] }
 0x408   :  { %v6124_v24 = vld [vmem:[#allocation2 + $0x1e8] sm:$0xf] }
 0x409   :  { %v2853_v20 = vmax.f32 %v2796_v39, 0.0 }
 0x40b   :  { %v2748_v8 = vpop.f32.mrf.mxu2 }
 0x40c   :  { %v2749_v32 = vadd.f32 %v2748_v8, %v2700_v52  ;;  %v2653_v2 = vpop.f32.mrf.mxu0 }
 0x40d   :  { %v2654_v37 = vadd.f32 %v2653_v2, %v9298_v57 }
 0x40e   :  { %v2797_v50 = vpop.f32.mrf.mxu3  ;;  %v2702_v18 = vpop.f32.mrf.mxu1 }
 0x40f   :  { %v2798_v29 = vadd.f32 %v2797_v50, %v2749_v32  ;;  %3722 = vmatmul.bf16.gmra.mxu0 %v9906_v45  ;;  %v2703_v52 = vadd.f32 %v2702_v18, %v2654_v37  ;;  %v6253_v18 = vor.u32 %v6805_v12, %v6252_v46  ;;  %v5996_v37 = vld [vmem:[#allocation2 + $0xe8] sm:$0xf] }
 0x410   :  { %3820 = vmatmul.bf16.gmra.mxu2 %v9300_v13 }
 0x411   :  { %v2857_v36 = vmax.f32 %v2798_v29, 0.0  ;;  %3771 = vmatmul.bf16.gmra.mxu1 %v9907_v3  ;;  %4174 = vmatpush.bf16.msrb.mxu2 %v6253_v18 }
 0x413   :  { %v9374_v10 = vpack.c.bf16 %v2857_v36, %v2853_v20  ;;  %v2751_v14 = vpop.f32.mrf.mxu2 }
 0x414   :  { %v2655_v17 = vpop.f32.mrf.mxu0  ;;  %v2752_v8 = vadd.f32 %v2751_v14, %v2703_v52  ;;  %v6741_v14 = vld [vmem:[#allocation2 + $0xf4] sm:$0xf0] }
 0x415   :  { %3864 = vmatmul.bf16.gmra.mxu3 %v9374_v10  ;;  %v2656_v48 = vadd.f32 %v2655_v17, %v2607_v6  ;;  %v6380_v6 = vld [vmem:[#allocation2 + $0x3e8] sm:$0xf]  ;;  %v5997_v17 = vor.u32 %v6741_v14, %v5996_v37 }
 0x416   :  { %v2800_v42 = vpop.f32.mrf.mxu3  ;;  %v2704_v0 = vpop.f32.mrf.mxu1  ;;  %v6381_v47 = vor.u32 %v6837_v38, %v6380_v6  ;;  %v5980_v37 = vld [vmem:[#allocation2 + $0xc8] sm:$0xf] }
 0x417   :  { %v2705_v15 = vadd.f32 %v2704_v0, %v2656_v48  ;;  %v2801_v59 = vadd.f32 %v2800_v42, %v2752_v8  ;;  %4076 = vmatpush.bf16.msrb.mxu0 %v5997_v17  ;;  %v6125_v48 = vor.u32 %v6773_v22, %v6124_v24  ;;  %v6737_v17 = vld [vmem:[#allocation2 + $0xd4] sm:$0xf0]  ;;  %v6364_v38 = vld [vmem:[#allocation2 + $0x3c8] sm:$0xf] }
 0x418   :  { %4223 = vmatpush.bf16.msrb.mxu3 %v6381_v47  ;;  %v6108_v22 = vld [vmem:[#allocation2 + $0x1c8] sm:$0xf] }
 0x419   :  { %v2861_v2 = vmax.f32 %v2801_v59, 0.0  ;;  %4125 = vmatpush.bf16.msrb.mxu1 %v6125_v48 }
 0x41b   :  { %v2753_v54 = vpop.f32.mrf.mxu2 }
 0x41c   :  { %v2754_v57 = vadd.f32 %v2753_v54, %v2705_v15  ;;  %v2658_v32 = vpop.f32.mrf.mxu0 }
 0x41d   :  { %v2659_v33 = vadd.f32 %v2658_v32, %v9315_v63  ;;  %v9392_v63 = vld [vmem:[%s9695_s4] sm:$0xf] }
 0x41e   :  { %v2802_v39 = vpop.f32.mrf.mxu3  ;;  %v2707_v50 = vpop.f32.mrf.mxu1  ;;  %v9395_v8 = vperm.slane %v9392_v63, 0 }
 0x41f   :  { %v2803_v23 = vadd.f32 %v2802_v39, %v2754_v57  ;;  %3727 = vmatmul.bf16.gmra.mxu0 %v9908_v21  ;;  %v2708_v30 = vadd.f32 %v2707_v50, %v2659_v33 }
 0x420   :  { %3825 = vmatmul.bf16.gmra.mxu2 %v9317_v49 }
 0x421   :  { %v2865_v27 = vmax.f32 %v2803_v23, 0.0  ;;  %3776 = vmatmul.bf16.gmra.mxu1 %v8990_v1 }
 0x423   :  { %v9383_v53 = vpack.c.bf16 %v2865_v27, %v2861_v2  ;;  %v2756_v29 = vpop.f32.mrf.mxu2 }
 0x424   :  { %v2660_v36 = vpop.f32.mrf.mxu0  ;;  %v2757_v52 = vadd.f32 %v2756_v29, %v2708_v30  ;;  %v6833_v30 = vld [vmem:[#allocation2 + $0x3d4] sm:$0xf0] }
 0x425   :  { %3869 = vmatmul.bf16.gmra.mxu3 %v9383_v53  ;;  %v2661_v0 = vadd.f32 %v2660_v36, %v2612_v28  ;;  %v6801_v36 = vld [vmem:[#allocation2 + $0x2d4] sm:$0xf0]  ;;  %v6365_v47 = vor.u32 %v6833_v30, %v6364_v38  ;;  %v6092_v30 = vld [vmem:[#allocation2 + $0x1a8] sm:$0xf] }
 0x426   :  { %v2805_v20 = vpop.f32.mrf.mxu3  ;;  %v2709_v42 = vpop.f32.mrf.mxu1 }
 0x427   :  { %v2710_v15 = vadd.f32 %v2709_v42, %v2661_v0  ;;  %v2806_v59 = vadd.f32 %v2805_v20, %v2757_v52  ;;  %v6236_v20 = vld [vmem:[#allocation2 + $0x2c8] sm:$0xf]  ;;  %v5981_v0 = vor.u32 %v6737_v17, %v5980_v37  ;;  %v6769_v52 = vld [vmem:[#allocation2 + $0x1d4] sm:$0xf0]  ;;  %4224 = vmatpush.bf16.msrb.mxu3 %v6365_v47 }
 0x428   :  { %v6237_v42 = vor.u32 %v6801_v36, %v6236_v20  ;;  %v6109_v48 = vor.u32 %v6769_v52, %v6108_v22  ;;  %v6348_v20 = vld [vmem:[#allocation2 + $0x3a8] sm:$0xf] }
 0x429   :  { %v2869_v46 = vmax.f32 %v2806_v59, 0.0  ;;  %4077 = vmatpush.bf16.msrb.mxu0 %v5981_v0  ;;  %v6765_v0 = vld [vmem:[#allocation2 + $0x1b4] sm:$0xf0] }
 0x42a   :  { %4175 = vmatpush.bf16.msrb.mxu2 %v6237_v42  ;;  %4126 = vmatpush.bf16.msrb.mxu1 %v6109_v48 }
 0x42b   :  { %v2758_v54 = vpop.f32.mrf.mxu2 }
 0x42c   :  { %v2759_v57 = vadd.f32 %v2758_v54, %v2710_v15  ;;  %v3693_v39 = vpop.f32.mrf.mxu0 }
 0x42d   :  { %v3694_v50 = vadd.f32 %v3693_v39, %v9395_v8 }
 0x42e   :  { %v2807_v32 = vpop.f32.mrf.mxu3  ;;  %v3742_v23 = vpop.f32.mrf.mxu1 }
 0x42f   :  { %v2808_v2 = vadd.f32 %v2807_v32, %v2759_v57  ;;  %v3743_v27 = vadd.f32 %v3742_v23, %v3694_v50  ;;  %3888 = vmatmul.bf16.vlgmr.msra.gmra.mxu0 %v9894_v19  ;;  %v6220_v50 = vld [vmem:[#allocation2 + $0x2a8] sm:$0xf]  ;;  %v6797_v23 = vld [vmem:[#allocation2 + $0x2b4] sm:$0xf0] }
 0x430   :  { %3986 = vmatmul.bf16.vlgmr.msra.gmra.mxu2 %v9206_v56 }
 0x431   :  { %v2873_v12 = vmax.f32 %v2808_v2, 0.0  ;;  %3937 = vmatmul.bf16.vlgmr.msra.gmra.mxu1 %v9895_v51 }
 0x433   :  { %v9401_v18 = vpack.c.bf16 %v2873_v12, %v2869_v46  ;;  %v3791_v33 = vpop.f32.mrf.mxu2 }
 0x434   :  { %v3792_v29 = vadd.f32 %v3791_v33, %v3743_v27  ;;  %v3695_v28 = vpop.f32.mrf.mxu0  ;;  %v6221_v27 = vor.u32 %v6797_v23, %v6220_v50  ;;  %v5964_v33 = vld [vmem:[#allocation2 + $0xa8] sm:$0xf] }
 0x435   :  { %3874 = vmatmul.bf16.gmra.mxu3 %v9401_v18  ;;  %v3696_v14 = vadd.f32 %v3695_v28, %v9395_v8  ;;  %v6733_v28 = vld [vmem:[#allocation2 + $0xb4] sm:$0xf0]  ;;  %v6204_v23 = vld [vmem:[#allocation2 + $0x288] sm:$0xf] }
 0x436   :  { %v3744_v6 = vpop.f32.mrf.mxu1  ;;  %4176 = vmatpush.bf16.msrb.mxu2 %v6221_v27 }
 0x437   :  { %v3745_v24 = vadd.f32 %v3744_v6, %v3696_v14  ;;  %v5965_v14 = vor.u32 %v6733_v28, %v5964_v33  ;;  %v6829_v6 = vld [vmem:[#allocation2 + $0x3b4] sm:$0xf0] }
 0x438   :  { %v6349_v42 = vor.u32 %v6829_v6, %v6348_v20 }
 0x439   :  { %4078 = vmatpush.bf16.msrb.mxu0 %v5965_v14  ;;  %v6332_v14 = vld [vmem:[#allocation2 + $0x388] sm:$0xf] }
 0x43a   :  { %4225 = vmatpush.bf16.msrb.mxu3 %v6349_v42 }
 0x43b   :  { %v3793_v15 = vpop.f32.mrf.mxu2 }
 0x43c   :  { %v3794_v54 = vadd.f32 %v3793_v15, %v3745_v24  ;;  %v3698_v59 = vpop.f32.mrf.mxu0  ;;  %v6093_v24 = vor.u32 %v6765_v0, %v6092_v30 }
 0x43d   :  { %v3699_v57 = vadd.f32 %v3698_v59, %v9395_v8 }
 0x43e   :  { %v3747_v39 = vpop.f32.mrf.mxu1  ;;  %4127 = vmatpush.bf16.msrb.mxu1 %v6093_v24  ;;  %v6761_v24 = vld [vmem:[#allocation2 + $0x194] sm:$0xf0] }
 0x43f   :  { %v3748_v32 = vadd.f32 %v3747_v39, %v3699_v57  ;;  %3893 = vmatmul.bf16.gmra.mxu0 %v9896_v34 }
 0x440   :  { %3991 = vmatmul.bf16.gmra.mxu2 %v9221_v40 }
 0x441   :  { %3942 = vmatmul.bf16.gmra.mxu1 %v9897_v55 }
 0x443   :  { %v3796_v2 = vpop.f32.mrf.mxu2 }
 0x444   :  { %v3797_v46 = vadd.f32 %v3796_v2, %v3748_v32  ;;  %v3700_v12 = vpop.f32.mrf.mxu0  ;;  %v6793_v2 = vld [vmem:[#allocation2 + $0x294] sm:$0xf0] }
 0x445   :  { %4035 = vmatmul.bf16.vlgmr.msra.gmra.mxu3 %v9332_v41  ;;  %v3701_v36 = vadd.f32 %v3700_v12, %v9395_v8  ;;  %v6205_v12 = vor.u32 %v6793_v2, %v6204_v23 }
 0x446   :  { %v3749_v37 = vpop.f32.mrf.mxu1 }
 0x447   :  { %v3750_v17 = vadd.f32 %v3749_v37, %v3701_v36  ;;  %v5948_v36 = vld [vmem:[#allocation2 + $0x88] sm:$0xf]  ;;  %v6729_v37 = vld [vmem:[#allocation2 + $0x94] sm:$0xf0]  ;;  %4177 = vmatpush.bf16.msrb.mxu2 %v6205_v12 }
 0x448   :  { %v3840_v38 = vpop.f32.mrf.mxu3  ;;  %v5949_v42 = vor.u32 %v6729_v37, %v5948_v36  ;;  %v6789_v12 = vld [vmem:[#allocation2 + $0x274] sm:$0xf0] }
 0x449   :  { %v3841_v47 = vadd.f32 %v3840_v38, %v3792_v29 }
 0x44a   :  { %4079 = vmatpush.bf16.msrb.mxu0 %v5949_v42  ;;  %v6316_v42 = vld [vmem:[#allocation2 + $0x368] sm:$0xf] }
 0x44b   :  { %v3798_v22 = vpop.f32.mrf.mxu2  ;;  %v4468_v50 = vmax.f32 %v3841_v47, 0.0  ;;  %v6076_v47 = vld [vmem:[#allocation2 + $0x188] sm:$0xf] }
 0x44c   :  { %v3799_v52 = vadd.f32 %v3798_v22, %v3750_v17  ;;  %v3703_v48 = vpop.f32.mrf.mxu0  ;;  %v6825_v17 = vld [vmem:[#allocation2 + $0x394] sm:$0xf0] }
 0x44d   :  { %v3704_v15 = vadd.f32 %v3703_v48, %v9395_v8  ;;  %v6333_v38 = vor.u32 %v6825_v17, %v6332_v14  ;;  %v6077_v48 = vor.u32 %v6761_v24, %v6076_v47 }
 0x44e   :  { %v3752_v59 = vpop.f32.mrf.mxu1 }
 0x44f   :  { %v3753_v57 = vadd.f32 %v3752_v59, %v3704_v15  ;;  %3898 = vmatmul.bf16.gmra.mxu0 %v9898_v4  ;;  %4226 = vmatpush.bf16.msrb.mxu3 %v6333_v38 }
 0x450   :  { %v3842_v39 = vpop.f32.mrf.mxu3  ;;  %3996 = vmatmul.bf16.gmra.mxu2 %v9236_v62  ;;  %4128 = vmatpush.bf16.msrb.mxu1 %v6077_v48  ;;  %v6060_v48 = vld [vmem:[#allocation2 + $0x168] sm:$0xf] }
 0x451   :  { %v3843_v32 = vadd.f32 %v3842_v39, %v3794_v54  ;;  %3947 = vmatmul.bf16.gmra.mxu1 %v9899_v44 }
 0x453   :  { %v4472_v29 = vmax.f32 %v3843_v32, 0.0  ;;  %v3801_v27 = vpop.f32.mrf.mxu2 }
 0x454   :  { %v3802_v28 = vadd.f32 %v3801_v27, %v3753_v57  ;;  %v3705_v20 = vpop.f32.mrf.mxu0  ;;  %v6188_v27 = vld [vmem:[#allocation2 + $0x268] sm:$0xf] }
 0x455   :  { %v9415_v33 = vpack.c.bf16 %v4472_v29, %v4468_v50  ;;  %4040 = vmatmul.bf16.gmra.mxu3 %v9340_v35  ;;  %v3706_v54 = vadd.f32 %v3705_v20, %v9395_v8  ;;  %v6189_v36 = vor.u32 %v6789_v12, %v6188_v27 }
 0x456   :  { %v3754_v6 = vpop.f32.mrf.mxu1 }
 0x457   :  { %v3755_v30 = vadd.f32 %v3754_v6, %v3706_v54  ;;  %v5932_v54 = vld [vmem:[#allocation2 + $0x68] sm:$0xf]  ;;  %v6725_v6 = vld [vmem:[#allocation2 + $0x74] sm:$0xf0]  ;;  %4178 = vmatpush.bf16.msrb.mxu2 %v6189_v36 }
 0x458   :  { %v3845_v0 = vpop.f32.mrf.mxu3  ;;  %v6172_v36 = vld [vmem:[#allocation2 + $0x248] sm:$0xf] }
 0x459   :  { %v3846_v22 = vadd.f32 %v3845_v0, %v3797_v46  ;;  %v6821_v0 = vld [vmem:[#allocation2 + $0x374] sm:$0xf0] }
 0x45a   :  { %v6317_v47 = vor.u32 %v6821_v0, %v6316_v42  ;;  %v6300_v0 = vld [vmem:[#allocation2 + $0x348] sm:$0xf] }
 0x45b   :  { %v3803_v15 = vpop.f32.mrf.mxu2  ;;  %v4476_v2 = vmax.f32 %v3846_v22, 0.0 }
 0x45c   :  { %v3804_v59 = vadd.f32 %v3803_v15, %v3755_v30  ;;  %v3708_v57 = vpop.f32.mrf.mxu0  ;;  %v5933_v30 = vor.u32 %v6725_v6, %v5932_v54  ;;  %v6757_v15 = vld [vmem:[#allocation2 + $0x174] sm:$0xf0]  ;;  %4227 = vmatpush.bf16.msrb.mxu3 %v6317_v47 }
 0x45d   :  { %v3709_v39 = vadd.f32 %v3708_v57, %v9395_v8 }
 0x45e   :  { %v3757_v32 = vpop.f32.mrf.mxu1  ;;  %4080 = vmatpush.bf16.msrb.mxu0 %v5933_v30  ;;  %v6721_v30 = vld [vmem:[#allocation2 + $0x54] sm:$0xf0] }
 0x45f   :  { %v3758_v50 = vadd.f32 %v3757_v32, %v3709_v39  ;;  %3903 = vmatmul.bf16.gmra.mxu0 %v9900_v16  ;;  %v6061_v39 = vor.u32 %v6757_v15, %v6060_v48  ;;  %v6817_v48 = vld [vmem:[#allocation2 + $0x354] sm:$0xf0] }
 0x460   :  { %v3847_v29 = vpop.f32.mrf.mxu3  ;;  %4001 = vmatmul.bf16.gmra.mxu2 %v9251_v5  ;;  %v6301_v15 = vor.u32 %v6817_v48, %v6300_v0  ;;  %v6717_v48 = vld [vmem:[#allocation2 + $0x34] sm:$0xf0] }
 0x461   :  { %v3848_v23 = vadd.f32 %v3847_v29, %v3799_v52  ;;  %3952 = vmatmul.bf16.gmra.mxu1 %v9901_v61 }
 0x462   :  { %4129 = vmatpush.bf16.msrb.mxu1 %v6061_v39  ;;  %4228 = vmatpush.bf16.msrb.mxu3 %v6301_v15  ;;  %v6284_v15 = vld [vmem:[#allocation2 + $0x328] sm:$0xf] }
 0x463   :  { %v4480_v46 = vmax.f32 %v3848_v23, 0.0  ;;  %v3806_v20 = vpop.f32.mrf.mxu2 }
 0x464   :  { %v3807_v37 = vadd.f32 %v3806_v20, %v3758_v50  ;;  %v3710_v14 = vpop.f32.mrf.mxu0 }
 0x465   :  { %4045 = vmatmul.bf16.gmra.mxu3 %v9348_v7  ;;  %v9424_v17 = vpack.c.bf16 %v4480_v46, %v4476_v2  ;;  %v3711_v52 = vadd.f32 %v3710_v14, %v9395_v8  ;;  %v6785_v14 = vld [vmem:[#allocation2 + $0x254] sm:$0xf0] }
 0x466   :  { %v3759_v38 = vpop.f32.mrf.mxu1  ;;  %v6173_v6 = vor.u32 %v6785_v14, %v6172_v36 }
 0x467   :  { %v3760_v24 = vadd.f32 %v3759_v38, %v3711_v52  ;;  %v5916_v38 = vld [vmem:[#allocation2 + $0x48] sm:$0xf] }
 0x468   :  { %v3850_v22 = vpop.f32.mrf.mxu3  ;;  %4179 = vmatpush.bf16.msrb.mxu2 %v6173_v6 }
 0x469   :  { %v3851_v57 = vadd.f32 %v3850_v22, %v3802_v28  ;;  %v5917_v22 = vor.u32 %v6721_v30, %v5916_v38  ;;  %v6781_v38 = vld [vmem:[#allocation2 + $0x234] sm:$0xf0] }
 0x46b   :  { %v3808_v32 = vpop.f32.mrf.mxu2  ;;  %v4484_v20 = vmax.f32 %v3851_v57, 0.0  ;;  %4081 = vmatpush.bf16.msrb.mxu0 %v5917_v22  ;;  %v5900_v22 = vld [vmem:[#allocation2 + $0x28] sm:$0xf] }
 0x46c   :  { %v3809_v50 = vadd.f32 %v3808_v32, %v3760_v24  ;;  %v3713_v29 = vpop.f32.mrf.mxu0  ;;  %v6044_v32 = vld [vmem:[#allocation2 + $0x148] sm:$0xf] }
 0x46d   :  { %v3714_v23 = vadd.f32 %v3713_v29, %v9395_v8  ;;  %v6753_v29 = vld [vmem:[#allocation2 + $0x154] sm:$0xf0] }
 0x46e   :  { %v3762_v2 = vpop.f32.mrf.mxu1 }
 0x46f   :  { %v3763_v46 = vadd.f32 %v3762_v2, %v3714_v23  ;;  %3908 = vmatmul.bf16.gmra.mxu0 %v9902_v31  ;;  %v6045_v2 = vor.u32 %v6753_v29, %v6044_v32  ;;  %v5901_v32 = vor.u32 %v6717_v48, %v5900_v22  ;;  %v6813_v29 = vld [vmem:[#allocation2 + $0x334] sm:$0xf0] }
 0x470   :  { %v3852_v27 = vpop.f32.mrf.mxu3  ;;  %4006 = vmatmul.bf16.gmra.mxu2 %v9266_v11 }
 0x471   :  { %v3853_v12 = vadd.f32 %v3852_v27, %v3804_v59  ;;  %3957 = vmatmul.bf16.gmra.mxu1 %v9903_v58  ;;  %4082 = vmatpush.bf16.msrb.mxu0 %v5901_v32 }
 0x472   :  { %4130 = vmatpush.bf16.msrb.mxu1 %v6045_v2 }
 0x473   :  { %v4488_v28 = vmax.f32 %v3853_v12, 0.0  ;;  %v3811_v54 = vpop.f32.mrf.mxu2 }
 0x474   :  { %v3812_v42 = vadd.f32 %v3811_v54, %v3763_v46  ;;  %v3715_v52 = vpop.f32.mrf.mxu0 }
 0x475   :  { %4050 = vmatmul.bf16.gmra.mxu3 %v9356_v60  ;;  %v9432_v47 = vpack.c.bf16 %v4488_v28, %v4484_v20  ;;  %v3716_v59 = vadd.f32 %v3715_v52, %v9395_v8  ;;  %v6156_v52 = vld [vmem:[#allocation2 + $0x228] sm:$0xf] }
 0x476   :  { %v3764_v24 = vpop.f32.mrf.mxu1  ;;  %v6157_v0 = vor.u32 %v6781_v38, %v6156_v52 }
 0x477   :  { %v3765_v57 = vadd.f32 %v3764_v24, %v3716_v59 }
 0x478   :  { %v3855_v39 = vpop.f32.mrf.mxu3  ;;  %4180 = vmatpush.bf16.msrb.mxu2 %v6157_v0  ;;  %v6745_v0 = vld [vmem:[#allocation2 + $0x114] sm:$0xf0] }
 0x479   :  { %v3856_v23 = vadd.f32 %v3855_v39, %v3807_v37 }
 0x47b   :  { %v3813_v46 = vpop.f32.mrf.mxu2  ;;  %v4492_v6 = vmax.f32 %v3856_v23, 0.0  ;;  %v6285_v23 = vor.u32 %v6813_v29, %v6284_v15 }
 0x47c   :  { %v3814_v27 = vadd.f32 %v3813_v46, %v3765_v57  ;;  %v3718_v12 = vpop.f32.mrf.mxu0 }
 0x47d   :  { %v3719_v20 = vadd.f32 %v3718_v12, %v9395_v8  ;;  %v6028_v12 = vld [vmem:[#allocation2 + $0x128] sm:$0xf]  ;;  %4229 = vmatpush.bf16.msrb.mxu3 %v6285_v23 }
 0x47e   :  { %v3767_v28 = vpop.f32.mrf.mxu1 }
 0x47f   :  { %v3768_v36 = vadd.f32 %v3767_v28, %v3719_v20  ;;  %3913 = vmatmul.bf16.gmra.mxu0 %v9904_v43  ;;  %v6749_v20 = vld [vmem:[#allocation2 + $0x134] sm:$0xf0] }
 0x480   :  { %v3857_v14 = vpop.f32.mrf.mxu3  ;;  %4011 = vmatmul.bf16.gmra.mxu2 %v9283_v25 }
 0x481   :  { %v3858_v54 = vadd.f32 %v3857_v14, %v3809_v50  ;;  %3962 = vmatmul.bf16.gmra.mxu1 %v9905_v26 }
 0x483   :  { %v4496_v37 = vmax.f32 %v3858_v54, 0.0  ;;  %v3816_v30 = vpop.f32.mrf.mxu2  ;;  %v5884_v54 = vld [vmem:[#allocation2 + $0x8] sm:$0xf] }
 0x484   :  { %v3817_v59 = vadd.f32 %v3816_v30, %v3768_v36  ;;  %v3720_v24 = vpop.f32.mrf.mxu0  ;;  %v6029_v36 = vor.u32 %v6749_v20, %v6028_v12 }
 0x485   :  { %4055 = vmatmul.bf16.gmra.mxu3 %v9365_v9  ;;  %v9440_v57 = vpack.c.bf16 %v4496_v37, %v4492_v6  ;;  %v3721_v50 = vadd.f32 %v3720_v24, %v9395_v8  ;;  %v6713_v6 = vld [vmem:[#allocation2 + $0x14] sm:$0xf0]  ;;  %v6012_v37 = vld [vmem:[#allocation2 + $0x108] sm:$0xf] }
 0x486   :  { %v3769_v39 = vpop.f32.mrf.mxu1  ;;  %4131 = vmatpush.bf16.msrb.mxu1 %v6029_v36  ;;  %v5885_v30 = vor.u32 %v6713_v6, %v5884_v54  ;;  %v6140_v24 = vld [vmem:[#allocation2 + $0x208] sm:$0xf]  ;;  %v6013_v15 = vor.u32 %v6745_v0, %v6012_v37 }
 0x487   :  { %9909 = vst [vmem:[#allocation44_spill] sm:$0xff] %v9440_v57  ;;  %v3770_v2 = vadd.f32 %v3769_v39, %v3721_v50  ;;  %v6777_v50 = vld [vmem:[#allocation2 + $0x214] sm:$0xf0]  ;;  %v6268_v36 = vld [vmem:[#allocation2 + $0x308] sm:$0xf] }
 0x488   :  { %v3860_v46 = vpop.f32.mrf.mxu3  ;;  %4083 = vmatpush.bf16.msrb.mxu0 %v5885_v30  ;;  %v6141_v39 = vor.u32 %v6777_v50, %v6140_v24 }
 0x489   :  { %v3861_v28 = vadd.f32 %v3860_v46, %v3812_v42 }
 0x48a   :  { %4132 = vmatpush.bf16.msrb.mxu1 %v6013_v15  ;;  %4181 = vmatpush.bf16.msrb.mxu2 %v6141_v39 }
 0x48b   :  { %v3818_v14 = vpop.f32.mrf.mxu2  ;;  %v4500_v23 = vmax.f32 %v3861_v28, 0.0 }
 0x48c   :  { %v3819_v52 = vadd.f32 %v3818_v14, %v3770_v2  ;;  %v3723_v38 = vpop.f32.mrf.mxu0  ;;  %v6809_v14 = vld [vmem:[#allocation2 + $0x314] sm:$0xf0] }
 0x48d   :  { %v3724_v22 = vadd.f32 %v3723_v38, %v9395_v8 }
 0x48e   :  { %v3772_v48 = vpop.f32.mrf.mxu1 }
 0x48f   :  { %v3773_v42 = vadd.f32 %v3772_v48, %v3724_v22  ;;  %3918 = vmatmul.bf16.gmra.mxu0 %v9906_v45 }
 0x490   :  { %v3862_v32 = vpop.f32.mrf.mxu3  ;;  %4016 = vmatmul.bf16.gmra.mxu2 %v9300_v13 }
 0x491   :  { %v3863_v29 = vadd.f32 %v3862_v32, %v3814_v27  ;;  %3967 = vmatmul.bf16.gmra.mxu1 %v9907_v3  ;;  %v6269_v27 = vor.u32 %v6809_v14, %v6268_v36  ;;  %v6739_v14 = vld [vmem:[#allocation2 + $0xec] sm:$0xf] }
 0x493   :  { %v4504_v2 = vmax.f32 %v3863_v29, 0.0  ;;  %v3821_v46 = vpop.f32.mrf.mxu2  ;;  %4230 = vmatpush.bf16.msrb.mxu3 %v6269_v27 }
 0x494   :  { %v3822_v12 = vadd.f32 %v3821_v46, %v3773_v42  ;;  %v3725_v20 = vpop.f32.mrf.mxu0 }
 0x495   :  { %4060 = vmatmul.bf16.gmra.mxu3 %v9374_v10  ;;  %v9448_v54 = vpack.c.bf16 %v4504_v2, %v4500_v23  ;;  %v3726_v6 = vadd.f32 %v3725_v20, %v9395_v8  ;;  %v6803_v23 = vld [vmem:[#allocation2 + $0x2ec] sm:$0xf]  ;;  %v6254_v2 = vld [vmem:[#allocation2 + $0x2f8] sm:$0xf0] }
 0x496   :  { %v3774_v37 = vpop.f32.mrf.mxu1  ;;  %v6257_v46 = vor.u32 %v6803_v23, %v6254_v2  ;;  %v9460_v23 = vperm.slane %v9392_v63, 1 }
 0x497   :  { %9910 = vst [vmem:[#allocation22_spill] sm:$0xff] %v9448_v54  ;;  %v3775_v38 = vadd.f32 %v3774_v37, %v3726_v6  ;;  %v5998_v6 = vld [vmem:[#allocation2 + $0xf8] sm:$0xf0]  ;;  %v6835_v37 = vld [vmem:[#allocation2 + $0x3ec] sm:$0xf] }
 0x498   :  { %v3865_v30 = vpop.f32.mrf.mxu3  ;;  %4370 = vmatpush.bf16.msra.mxu2 %v6257_v46 }
 0x499   :  { %v3866_v0 = vadd.f32 %v3865_v30, %v3817_v59  ;;  %v6001_v30 = vor.u32 %v6739_v14, %v5998_v6 }
 0x49b   :  { %v3823_v24 = vpop.f32.mrf.mxu2  ;;  %v4508_v32 = vmax.f32 %v3866_v0, 0.0  ;;  %v6382_v0 = vld [vmem:[#allocation2 + $0x3f8] sm:$0xf0]  ;;  %4272 = vmatpush.bf16.msra.mxu0 %v6001_v30 }
 0x49c   :  { %v3824_v28 = vadd.f32 %v3823_v24, %v3775_v38  ;;  %v3728_v22 = vpop.f32.mrf.mxu0  ;;  %v6385_v24 = vor.u32 %v6835_v37, %v6382_v0  ;;  %v6238_v30 = vld [vmem:[#allocation2 + $0x2d8] sm:$0xf0]  ;;  %v6735_v0 = vld [vmem:[#allocation2 + $0xcc] sm:$0xf] }
 0x49d   :  { %v3729_v48 = vadd.f32 %v3728_v22, %v9395_v8 }
 0x49e   :  { %v3777_v15 = vpop.f32.mrf.mxu1  ;;  %4419 = vmatpush.bf16.msra.mxu3 %v6385_v24 }
 0x49f   :  { %v3778_v50 = vadd.f32 %v3777_v15, %v3729_v48  ;;  %3923 = vmatmul.bf16.gmra.mxu0 %v9908_v21  ;;  %v6771_v15 = vld [vmem:[#allocation2 + $0x1ec] sm:$0xf] }
 0x4a0   :  { %v3867_v39 = vpop.f32.mrf.mxu3  ;;  %4021 = vmatmul.bf16.gmra.mxu2 %v9317_v49 }
 0x4a1   :  { %v3868_v42 = vadd.f32 %v3867_v39, %v3819_v52  ;;  %3972 = vmatmul.bf16.gmra.mxu1 %v8990_v1 }
 0x4a3   :  { %v4512_v29 = vmax.f32 %v3868_v42, 0.0  ;;  %v3826_v59 = vpop.f32.mrf.mxu2 }
 0x4a4   :  { %v3827_v20 = vadd.f32 %v3826_v59, %v3778_v50  ;;  %v3730_v36 = vpop.f32.mrf.mxu0  ;;  %v6126_v50 = vld [vmem:[#allocation2 + $0x1f8] sm:$0xf0] }
 0x4a5   :  { %4065 = vmatmul.bf16.gmra.mxu3 %v9383_v53  ;;  %v9456_v27 = vpack.c.bf16 %v4512_v29, %v4508_v32  ;;  %v3731_v52 = vadd.f32 %v3730_v36, %v9395_v8  ;;  %v6129_v42 = vor.u32 %v6771_v15, %v6126_v50  ;;  %v5982_v15 = vld [vmem:[#allocation2 + $0xd8] sm:$0xf0]  ;;  %v6831_v50 = vld [vmem:[#allocation2 + $0x3cc] sm:$0xf] }
 0x4a6   :  { %v3779_v38 = vpop.f32.mrf.mxu1 }
 0x4a7   :  { %9911 = vst [vmem:[#allocation24_spill] sm:$0xff] %v9456_v27  ;;  %v3780_v22 = vadd.f32 %v3779_v38, %v3731_v52  ;;  %4321 = vmatpush.bf16.msra.mxu1 %v6129_v42  ;;  %v6799_v38 = vld [vmem:[#allocation2 + $0x2cc] sm:$0xf]  ;;  %v6366_v42 = vld [vmem:[#allocation2 + $0x3d8] sm:$0xf0] }
 0x4a8   :  { %v3870_v48 = vpop.f32.mrf.mxu3 }
 0x4a9   :  { %v3871_v39 = vadd.f32 %v3870_v48, %v3822_v12 }
 0x4ab   :  { %v3828_v32 = vpop.f32.mrf.mxu2  ;;  %v4516_v12 = vmax.f32 %v3871_v39, 0.0  ;;  %v6369_v39 = vor.u32 %v6831_v50, %v6366_v42 }
 0x4ac   :  { %v3829_v29 = vadd.f32 %v3828_v32, %v3780_v22  ;;  %v3889_v8 = vpop.f32.mrf.mxu0  ;;  %v5985_v32 = vor.u32 %v6735_v0, %v5982_v15 }
 0x4ad   :  { %v3890_v2 = vadd.f32 %v3889_v8, %v9460_v23  ;;  %4420 = vmatpush.bf16.msra.mxu3 %v6369_v39  ;;  %v6731_v39 = vld [vmem:[#allocation2 + $0xac] sm:$0xf] }
 0x4ae   :  { %v3938_v59 = vpop.f32.mrf.mxu1  ;;  %4273 = vmatpush.bf16.msra.mxu0 %v5985_v32 }
 0x4af   :  { %v3939_v46 = vadd.f32 %v3938_v59, %v3890_v2  ;;  %4084 = vmatmul.bf16.vlgmr.msrb.gmra.mxu0 %v9894_v19  ;;  %v6767_v59 = vld [vmem:[#allocation2 + $0x1cc] sm:$0xf] }
 0x4b0   :  { %v3872_v36 = vpop.f32.mrf.mxu3  ;;  %4182 = vmatmul.bf16.vlgmr.msrb.gmra.mxu2 %v9206_v56 }
 0x4b1   :  { %v3873_v14 = vadd.f32 %v3872_v36, %v3824_v28  ;;  %4133 = vmatmul.bf16.vlgmr.msrb.gmra.mxu1 %v9895_v51  ;;  %v6241_v28 = vor.u32 %v6799_v38, %v6238_v30 }
 0x4b3   :  { %v4520_v6 = vmax.f32 %v3873_v14, 0.0  ;;  %v3987_v63 = vpop.f32.mrf.mxu2  ;;  %4371 = vmatpush.bf16.msra.mxu2 %v6241_v28  ;;  %v6222_v28 = vld [vmem:[#allocation2 + $0x2b8] sm:$0xf0] }
 0x4b4   :  { %v3988_v37 = vadd.f32 %v3987_v63, %v3939_v46  ;;  %v3891_v52 = vpop.f32.mrf.mxu0  ;;  %v6110_v46 = vld [vmem:[#allocation2 + $0x1d8] sm:$0xf0] }
 0x4b5   :  { %4070 = vmatmul.bf16.gmra.mxu3 %v9401_v18  ;;  %v9467_v24 = vpack.c.bf16 %v4520_v6, %v4516_v12  ;;  %v3892_v22 = vadd.f32 %v3891_v52, %v9460_v23  ;;  %v6113_v14 = vor.u32 %v6767_v59, %v6110_v46 }
 0x4b6   :  { %v3940_v48 = vpop.f32.mrf.mxu1 }
 0x4b7   :  { %9912 = vst [vmem:[#allocation25_spill] sm:$0xff] %v9467_v24  ;;  %v3941_v8 = vadd.f32 %v3940_v48, %v3892_v22  ;;  %4322 = vmatpush.bf16.msra.mxu1 %v6113_v14  ;;  %v6795_v48 = vld [vmem:[#allocation2 + $0x2ac] sm:$0xf] }
 0x4b8   :  { %v3875_v2 = vpop.f32.mrf.mxu3  ;;  %v6225_v50 = vor.u32 %v6795_v48, %v6222_v28 }
 0x4b9   :  { %v3876_v36 = vadd.f32 %v3875_v2, %v3827_v20  ;;  %v6827_v2 = vld [vmem:[#allocation2 + $0x3ac] sm:$0xf] }
 0x4ba   :  { %4372 = vmatpush.bf16.msra.mxu2 %v6225_v50 }
 0x4bb   :  { %v3989_v12 = vpop.f32.mrf.mxu2  ;;  %v4524_v20 = vmax.f32 %v3876_v36, 0.0  ;;  %v6350_v36 = vld [vmem:[#allocation2 + $0x3b8] sm:$0xf0] }
 0x4bc   :  { %v3990_v6 = vadd.f32 %v3989_v12, %v3941_v8  ;;  %v3894_v63 = vpop.f32.mrf.mxu0  ;;  %v5966_v8 = vld [vmem:[#allocation2 + $0xb8] sm:$0xf0]  ;;  %v6353_v14 = vor.u32 %v6827_v2, %v6350_v36  ;;  %v6791_v2 = vld [vmem:[#allocation2 + $0x28c] sm:$0xf] }
 0x4bd   :  { %v3895_v52 = vadd.f32 %v3894_v63, %v9460_v23  ;;  %v5969_v46 = vor.u32 %v6731_v39, %v5966_v8 }
 0x4be   :  { %v3943_v38 = vpop.f32.mrf.mxu1  ;;  %4421 = vmatpush.bf16.msra.mxu3 %v6353_v14 }
 0x4bf   :  { %v3944_v30 = vadd.f32 %v3943_v38, %v3895_v52  ;;  %4089 = vmatmul.bf16.gmra.mxu0 %v9896_v34  ;;  %v6763_v52 = vld [vmem:[#allocation2 + $0x1ac] sm:$0xf]  ;;  %v6094_v38 = vld [vmem:[#allocation2 + $0x1b8] sm:$0xf0] }
 0x4c0   :  { %v3877_v24 = vpop.f32.mrf.mxu3  ;;  %4187 = vmatmul.bf16.gmra.mxu2 %v9221_v40  ;;  %4274 = vmatpush.bf16.msra.mxu0 %v5969_v46 }
 0x4c1   :  { %v3878_v0 = vadd.f32 %v3877_v24, %v3829_v29  ;;  %4138 = vmatmul.bf16.gmra.mxu1 %v9897_v55 }
 0x4c3   :  { %v4528_v22 = vmax.f32 %v3878_v0, 0.0  ;;  %v3992_v15 = vpop.f32.mrf.mxu2  ;;  %v6097_v0 = vor.u32 %v6763_v52, %v6094_v38  ;;  %v5950_v52 = vld [vmem:[#allocation2 + $0x98] sm:$0xf0]  ;;  %v6823_v38 = vld [vmem:[#allocation2 + $0x38c] sm:$0xf] }
 0x4c4   :  { %v3993_v42 = vadd.f32 %v3992_v15, %v3944_v30  ;;  %v3896_v32 = vpop.f32.mrf.mxu0 }
 0x4c5   :  { %4231 = vmatmul.bf16.vlgmr.msrb.gmra.mxu3 %v9332_v41  ;;  %v9475_v59 = vpack.c.bf16 %v4528_v22, %v4524_v20  ;;  %v3897_v29 = vadd.f32 %v3896_v32, %v9460_v23  ;;  %4323 = vmatpush.bf16.msra.mxu1 %v6097_v0 }
 0x4c6   :  { %v3945_v24 = vpop.f32.mrf.mxu1 }
 0x4c7   :  { %9913 = vst [vmem:[#allocation9_spill] sm:$0xff] %v9475_v59  ;;  %v3946_v12 = vadd.f32 %v3945_v24, %v3897_v29  ;;  %v6206_v29 = vld [vmem:[#allocation2 + $0x298] sm:$0xf0] }
 0x4c8   :  { %v4036_v63 = vpop.f32.mrf.mxu3  ;;  %v6209_v46 = vor.u32 %v6791_v2, %v6206_v29 }
 0x4c9   :  { %v4037_v30 = vadd.f32 %v4036_v63, %v3988_v37  ;;  %v6727_v63 = vld [vmem:[#allocation2 + $0x8c] sm:$0xf] }
 0x4ca   :  { %4373 = vmatpush.bf16.msra.mxu2 %v6209_v46 }
 0x4cb   :  { %v3994_v48 = vpop.f32.mrf.mxu2  ;;  %v4469_v8 = vmax.f32 %v4037_v30, 0.0  ;;  %v6334_v30 = vld [vmem:[#allocation2 + $0x398] sm:$0xf0] }
 0x4cc   :  { %v3995_v28 = vadd.f32 %v3994_v48, %v3946_v12  ;;  %v3899_v20 = vpop.f32.mrf.mxu0  ;;  %v5953_v48 = vor.u32 %v6727_v63, %v5950_v52 }
 0x4cd   :  { %v3900_v22 = vadd.f32 %v3899_v20, %v9460_v23  ;;  %v6337_v20 = vor.u32 %v6823_v38, %v6334_v30  ;;  %v6787_v38 = vld [vmem:[#allocation2 + $0x26c] sm:$0xf] }
 0x4ce   :  { %v3948_v15 = vpop.f32.mrf.mxu1  ;;  %4275 = vmatpush.bf16.msra.mxu0 %v5953_v48 }
 0x4cf   :  { %v3949_v32 = vadd.f32 %v3948_v15, %v3900_v22  ;;  %4094 = vmatmul.bf16.gmra.mxu0 %v9898_v4  ;;  %4422 = vmatpush.bf16.msra.mxu3 %v6337_v20 }
 0x4d0   :  { %v4038_v50 = vpop.f32.mrf.mxu3  ;;  %4192 = vmatmul.bf16.gmra.mxu2 %v9236_v62 }
 0x4d1   :  { %v4039_v39 = vadd.f32 %v4038_v50, %v3990_v6  ;;  %4143 = vmatmul.bf16.gmra.mxu1 %v9899_v44  ;;  %v6759_v50 = vld [vmem:[#allocation2 + $0x18c] sm:$0xf] }
 0x4d3   :  { %v4473_v37 = vmax.f32 %v4039_v39, 0.0  ;;  %v3997_v24 = vpop.f32.mrf.mxu2  ;;  %v6078_v39 = vld [vmem:[#allocation2 + $0x198] sm:$0xf0] }
 0x4d4   :  { %v3998_v14 = vadd.f32 %v3997_v24, %v3949_v32  ;;  %v3901_v12 = vpop.f32.mrf.mxu0  ;;  %v6081_v32 = vor.u32 %v6759_v50, %v6078_v39  ;;  %v6819_v50 = vld [vmem:[#allocation2 + $0x36c] sm:$0xf] }
 0x4d5   :  { %v9482_v36 = vpack.c.bf16 %v4473_v37, %v4469_v8  ;;  %4236 = vmatmul.bf16.gmra.mxu3 %v9340_v35  ;;  %v3902_v6 = vadd.f32 %v3901_v12, %v9460_v23 }
 0x4d6   :  { %v3950_v0 = vpop.f32.mrf.mxu1  ;;  %4324 = vmatpush.bf16.msra.mxu1 %v6081_v32 }
 0x4d7   :  { %v3951_v22 = vadd.f32 %v3950_v0, %v3902_v6  ;;  %v6190_v6 = vld [vmem:[#allocation2 + $0x278] sm:$0xf0] }
 0x4d8   :  { %v4041_v15 = vpop.f32.mrf.mxu3  ;;  %v6193_v48 = vor.u32 %v6787_v38, %v6190_v6 }
 0x4d9   :  { %v4042_v8 = vadd.f32 %v4041_v15, %v3993_v42  ;;  %v5934_v15 = vld [vmem:[#allocation2 + $0x78] sm:$0xf0] }
 0x4da   :  { %4374 = vmatpush.bf16.msra.mxu2 %v6193_v48 }
 0x4db   :  { %v3999_v37 = vpop.f32.mrf.mxu2  ;;  %v4477_v52 = vmax.f32 %v4042_v8, 0.0  ;;  %v6318_v8 = vld [vmem:[#allocation2 + $0x378] sm:$0xf0] }
 0x4dc   :  { %v4000_v2 = vadd.f32 %v3999_v37, %v3951_v22  ;;  %v3904_v29 = vpop.f32.mrf.mxu0  ;;  %v6723_v22 = vld [vmem:[#allocation2 + $0x6c] sm:$0xf] }
 0x4dd   :  { %v3905_v24 = vadd.f32 %v3904_v29, %v9460_v23  ;;  %v5937_v37 = vor.u32 %v6723_v22, %v5934_v15  ;;  %v6321_v29 = vor.u32 %v6819_v50, %v6318_v8  ;;  %v6783_v50 = vld [vmem:[#allocation2 + $0x24c] sm:$0xf] }
 0x4de   :  { %v3953_v12 = vpop.f32.mrf.mxu1 }
 0x4df   :  { %v3954_v59 = vadd.f32 %v3953_v12, %v3905_v24  ;;  %4099 = vmatmul.bf16.gmra.mxu0 %v9900_v16  ;;  %4423 = vmatpush.bf16.msra.mxu3 %v6321_v29 }
 0x4e0   :  { %v4043_v46 = vpop.f32.mrf.mxu3  ;;  %4197 = vmatmul.bf16.gmra.mxu2 %v9251_v5  ;;  %4276 = vmatpush.bf16.msra.mxu0 %v5937_v37 }
 0x4e1   :  { %v4044_v63 = vadd.f32 %v4043_v46, %v3995_v28  ;;  %4148 = vmatmul.bf16.gmra.mxu1 %v9901_v61  ;;  %v6755_v46 = vld [vmem:[#allocation2 + $0x16c] sm:$0xf] }
 0x4e3   :  { %v4481_v42 = vmax.f32 %v4044_v63, 0.0  ;;  %v4002_v0 = vpop.f32.mrf.mxu2 }
 0x4e4   :  { %v4003_v30 = vadd.f32 %v4002_v0, %v3954_v59  ;;  %v3906_v20 = vpop.f32.mrf.mxu0  ;;  %v6062_v59 = vld [vmem:[#allocation2 + $0x178] sm:$0xf0] }
 0x4e5   :  { %4241 = vmatmul.bf16.gmra.mxu3 %v9348_v7  ;;  %v9491_v39 = vpack.c.bf16 %v4481_v42, %v4477_v52  ;;  %v3907_v28 = vadd.f32 %v3906_v20, %v9460_v23  ;;  %v6065_v38 = vor.u32 %v6755_v46, %v6062_v59  ;;  %v6815_v46 = vld [vmem:[#allocation2 + $0x34c] sm:$0xf] }
 0x4e6   :  { %v3955_v32 = vpop.f32.mrf.mxu1 }
 0x4e7   :  { %v3956_v24 = vadd.f32 %v3955_v32, %v3907_v28  ;;  %4325 = vmatpush.bf16.msra.mxu1 %v6065_v38  ;;  %v6174_v28 = vld [vmem:[#allocation2 + $0x258] sm:$0xf0] }
 0x4e8   :  { %v4046_v12 = vpop.f32.mrf.mxu3  ;;  %v6177_v37 = vor.u32 %v6783_v50, %v6174_v28 }
 0x4e9   :  { %v4047_v63 = vadd.f32 %v4046_v12, %v3998_v14  ;;  %v5918_v12 = vld [vmem:[#allocation2 + $0x58] sm:$0xf0] }
 0x4ea   :  { %4375 = vmatpush.bf16.msra.mxu2 %v6177_v37 }
 0x4eb   :  { %v4004_v6 = vpop.f32.mrf.mxu2  ;;  %v4485_v15 = vmax.f32 %v4047_v63, 0.0  ;;  %v6302_v63 = vld [vmem:[#allocation2 + $0x358] sm:$0xf0] }
 0x4ec   :  { %v4005_v0 = vadd.f32 %v4004_v6, %v3956_v24  ;;  %v3909_v52 = vpop.f32.mrf.mxu0  ;;  %v6719_v24 = vld [vmem:[#allocation2 + $0x4c] sm:$0xf] }
 0x4ed   :  { %v3910_v42 = vadd.f32 %v3909_v52, %v9460_v23  ;;  %v5921_v6 = vor.u32 %v6719_v24, %v5918_v12  ;;  %v6305_v52 = vor.u32 %v6815_v46, %v6302_v63  ;;  %v6779_v46 = vld [vmem:[#allocation2 + $0x22c] sm:$0xf] }
 0x4ee   :  { %v3958_v20 = vpop.f32.mrf.mxu1 }
 0x4ef   :  { %v3959_v27 = vadd.f32 %v3958_v20, %v3910_v42  ;;  %4104 = vmatmul.bf16.gmra.mxu0 %v9902_v31  ;;  %4424 = vmatpush.bf16.msra.mxu3 %v6305_v52 }
 0x4f0   :  { %v4048_v48 = vpop.f32.mrf.mxu3  ;;  %4202 = vmatmul.bf16.gmra.mxu2 %v9266_v11  ;;  %4277 = vmatpush.bf16.msra.mxu0 %v5921_v6 }
 0x4f1   :  { %v4049_v22 = vadd.f32 %v4048_v48, %v4000_v2  ;;  %4153 = vmatmul.bf16.gmra.mxu1 %v9903_v58  ;;  %v6751_v48 = vld [vmem:[#allocation2 + $0x14c] sm:$0xf] }
 0x4f3   :  { %v4489_v14 = vmax.f32 %v4049_v22, 0.0  ;;  %v4007_v32 = vpop.f32.mrf.mxu2 }
 0x4f4   :  { %v4008_v8 = vadd.f32 %v4007_v32, %v3959_v27  ;;  %v3911_v29 = vpop.f32.mrf.mxu0  ;;  %v6046_v27 = vld [vmem:[#allocation2 + $0x158] sm:$0xf0] }
 0x4f5   :  { %4246 = vmatmul.bf16.gmra.mxu3 %v9356_v60  ;;  %v9499_v59 = vpack.c.bf16 %v4489_v14, %v4485_v15  ;;  %v3912_v2 = vadd.f32 %v3911_v29, %v9460_v23  ;;  %v6049_v50 = vor.u32 %v6751_v48, %v6046_v27  ;;  %v6811_v48 = vld [vmem:[#allocation2 + $0x32c] sm:$0xf] }
 0x4f6   :  { %v3960_v38 = vpop.f32.mrf.mxu1 }
 0x4f7   :  { %v3961_v42 = vadd.f32 %v3960_v38, %v3912_v2  ;;  %4326 = vmatpush.bf16.msra.mxu1 %v6049_v50  ;;  %v6158_v2 = vld [vmem:[#allocation2 + $0x238] sm:$0xf0] }
 0x4f8   :  { %v4051_v20 = vpop.f32.mrf.mxu3  ;;  %v6161_v6 = vor.u32 %v6779_v46, %v6158_v2 }
 0x4f9   :  { %v4052_v22 = vadd.f32 %v4051_v20, %v4003_v30  ;;  %v5902_v20 = vld [vmem:[#allocation2 + $0x38] sm:$0xf0] }
 0x4fa   :  { %4376 = vmatpush.bf16.msra.mxu2 %v6161_v6  ;;  %v6014_v6 = vld [vmem:[#allocation2 + $0x118] sm:$0xf0] }
 0x4fb   :  { %v4009_v28 = vpop.f32.mrf.mxu2  ;;  %v4493_v12 = vmax.f32 %v4052_v22, 0.0  ;;  %v6286_v22 = vld [vmem:[#allocation2 + $0x338] sm:$0xf0] }
 0x4fc   :  { %v4010_v32 = vadd.f32 %v4009_v28, %v3961_v42  ;;  %v3914_v15 = vpop.f32.mrf.mxu0  ;;  %v6715_v42 = vld [vmem:[#allocation2 + $0x2c] sm:$0xf] }
 0x4fd   :  { %v3915_v14 = vadd.f32 %v3914_v15, %v9460_v23  ;;  %v5905_v28 = vor.u32 %v6715_v42, %v5902_v20  ;;  %v6289_v15 = vor.u32 %v6811_v48, %v6286_v22  ;;  %v6775_v42 = vld [vmem:[#allocation2 + $0x20c] sm:$0xf] }
 0x4fe   :  { %v3963_v29 = vpop.f32.mrf.mxu1 }
 0x4ff   :  { %v3964_v54 = vadd.f32 %v3963_v29, %v3915_v14  ;;  %4109 = vmatmul.bf16.gmra.mxu0 %v9904_v43  ;;  %4425 = vmatpush.bf16.msra.mxu3 %v6289_v15 }
 0x500   :  { %v4053_v37 = vpop.f32.mrf.mxu3  ;;  %4207 = vmatmul.bf16.gmra.mxu2 %v9283_v25  ;;  %4278 = vmatpush.bf16.msra.mxu0 %v5905_v28 }
 0x501   :  { %v4054_v24 = vadd.f32 %v4053_v37, %v4005_v0  ;;  %4158 = vmatmul.bf16.gmra.mxu1 %v9905_v26  ;;  %v6747_v37 = vld [vmem:[#allocation2 + $0x12c] sm:$0xf] }
 0x503   :  { %v4497_v30 = vmax.f32 %v4054_v24, 0.0  ;;  %v4012_v38 = vpop.f32.mrf.mxu2 }
 0x504   :  { %v4013_v63 = vadd.f32 %v4012_v38, %v3964_v54  ;;  %v3916_v52 = vpop.f32.mrf.mxu0  ;;  %v6030_v54 = vld [vmem:[#allocation2 + $0x138] sm:$0xf0]  ;;  %v6711_v38 = vld [vmem:[#allocation2 + $0xc] sm:$0xf] }
 0x505   :  { %4251 = vmatmul.bf16.gmra.mxu3 %v9365_v9  ;;  %v9507_v27 = vpack.c.bf16 %v4497_v30, %v4493_v12  ;;  %v3917_v0 = vadd.f32 %v3916_v52, %v9460_v23  ;;  %v6033_v46 = vor.u32 %v6747_v37, %v6030_v54  ;;  %v5886_v12 = vld [vmem:[#allocation2 + $0x18] sm:$0xf0]  ;;  %v6743_v30 = vld [vmem:[#allocation2 + $0x10c] sm:$0xf] }
 0x506   :  { %v3965_v50 = vpop.f32.mrf.mxu1  ;;  %v5889_v57 = vor.u32 %v6711_v38, %v5886_v12 }
 0x507   :  { %9914 = vst [vmem:[#allocation30_spill] sm:$0xff] %v9507_v27  ;;  %v3966_v14 = vadd.f32 %v3965_v50, %v3917_v0  ;;  %4327 = vmatpush.bf16.msra.mxu1 %v6033_v46  ;;  %v6017_v0 = vor.u32 %v6743_v30, %v6014_v6  ;;  %v6142_v50 = vld [vmem:[#allocation2 + $0x218] sm:$0xf0] }
 0x508   :  { %v4056_v29 = vpop.f32.mrf.mxu3  ;;  %4279 = vmatpush.bf16.msra.mxu0 %v5889_v57  ;;  %v6145_v28 = vor.u32 %v6775_v42, %v6142_v50  ;;  %v6807_v57 = vld [vmem:[#allocation2 + $0x30c] sm:$0xf] }
 0x509   :  { %v4057_v24 = vadd.f32 %v4056_v29, %v4008_v8 }
 0x50a   :  { %4377 = vmatpush.bf16.msra.mxu2 %v6145_v28 }
 0x50b   :  { %v4014_v2 = vpop.f32.mrf.mxu2  ;;  %4328 = vmatpush.bf16.msra.mxu1 %v6017_v0 }
 0x50c   :  { %v4015_v27 = vadd.f32 %v4014_v2, %v3966_v14  ;;  %v3919_v52 = vpop.f32.mrf.mxu0  ;;  %v4501_v14 = vmax.f32 %v4057_v24, 0.0  ;;  %v6270_v2 = vld [vmem:[#allocation2 + $0x318] sm:$0xf0] }
 0x50d   :  { %v3920_v20 = vadd.f32 %v3919_v52, %v9460_v23 }
 0x50e   :  { %v3968_v48 = vpop.f32.mrf.mxu1 }
 0x50f   :  { %v3969_v8 = vadd.f32 %v3968_v48, %v3920_v20  ;;  %4114 = vmatmul.bf16.gmra.mxu0 %v9906_v45 }
 0x510   :  { %v4058_v22 = vpop.f32.mrf.mxu3  ;;  %4212 = vmatmul.bf16.gmra.mxu2 %v9300_v13 }
 0x511   :  { %v4059_v15 = vadd.f32 %v4058_v22, %v4010_v32  ;;  %4163 = vmatmul.bf16.gmra.mxu1 %v9907_v3  ;;  %v6273_v32 = vor.u32 %v6807_v57, %v6270_v2 }
 0x513   :  { %v4505_v29 = vmax.f32 %v4059_v15, 0.0  ;;  %v4017_v37 = vpop.f32.mrf.mxu2  ;;  %4426 = vmatpush.bf16.msra.mxu3 %v6273_v32 }
 0x514   :  { %v4018_v54 = vadd.f32 %v4017_v37, %v3969_v8  ;;  %v3921_v46 = vpop.f32.mrf.mxu0 }
 0x515   :  { %4256 = vmatmul.bf16.gmra.mxu3 %v9374_v10  ;;  %v9515_v38 = vpack.c.bf16 %v4505_v29, %v4501_v14  ;;  %v3922_v12 = vadd.f32 %v3921_v46, %v9460_v23 }
 0x516   :  { %v3970_v30 = vpop.f32.mrf.mxu1 }
 0x517   :  { %v3971_v52 = vadd.f32 %v3970_v30, %v3922_v12 }
 0x518   :  { %v4061_v6 = vpop.f32.mrf.mxu3 }
 0x519   :  { %v4062_v42 = vadd.f32 %v4061_v6, %v4013_v63 }
 0x51b   :  { %v4019_v20 = vpop.f32.mrf.mxu2  ;;  %v4509_v15 = vmax.f32 %v4062_v42, 0.0 }
 0x51c   :  { %v4020_v24 = vadd.f32 %v4019_v20, %v3971_v52  ;;  %v3924_v48 = vpop.f32.mrf.mxu0 }
 0x51d   :  { %v3925_v0 = vadd.f32 %v3924_v48, %v9460_v23 }
 0x51e   :  { %v3973_v50 = vpop.f32.mrf.mxu1 }
 0x51f   :  { %v3974_v28 = vadd.f32 %v3973_v50, %v3925_v0  ;;  %4119 = vmatmul.bf16.gmra.mxu0 %v9908_v21 }
 0x520   :  { %v4063_v8 = vpop.f32.mrf.mxu3  ;;  %4217 = vmatmul.bf16.gmra.mxu2 %v9317_v49 }
 0x521   :  { %v4064_v22 = vadd.f32 %v4063_v8, %v4015_v27  ;;  %4168 = vmatmul.bf16.gmra.mxu1 %v8990_v1  ;;  %v9529_v27 = vld [vmem:[%s9695_s4] sm:$0xf] }
 0x522   :  { %v9532_v52 = vperm.slane %v9529_v27, 2 }
 0x523   :  { %v4513_v14 = vmax.f32 %v4064_v22, 0.0  ;;  %v4022_v29 = vpop.f32.mrf.mxu2 }
 0x524   :  { %v4023_v37 = vadd.f32 %v4022_v29, %v3974_v28  ;;  %v3926_v63 = vpop.f32.mrf.mxu0  ;;  %v6861_v29 = vld [vmem:[#allocation4 + $0xb8] sm:$0xff] }
 0x525   :  { %4261 = vmatmul.bf16.gmra.mxu3 %v9383_v53  ;;  %v9523_v46 = vpack.c.bf16 %v4513_v14, %v4509_v15  ;;  %v3927_v57 = vadd.f32 %v3926_v63, %v9460_v23  ;;  %4922 = vmatpush.bf16.msrb.mxu2 %v6861_v29  ;;  %v6860_v29 = vld [vmem:[#allocation4 + $0xb0] sm:$0xff] }
 0x526   :  { %v3975_v2 = vpop.f32.mrf.mxu1 }
 0x527   :  { %v3976_v12 = vadd.f32 %v3975_v2, %v3927_v57 }
 0x528   :  { %v4066_v30 = vpop.f32.mrf.mxu3 }
 0x529   :  { %v4067_v32 = vadd.f32 %v4066_v30, %v4018_v54  ;;  %4923 = vmatpush.bf16.msrb.mxu2 %v6860_v29 }
 0x52b   :  { %v4024_v6 = vpop.f32.mrf.mxu2  ;;  %v4517_v54 = vmax.f32 %v4067_v32, 0.0 }
 0x52c   :  { %v4025_v42 = vadd.f32 %v4024_v6, %v3976_v12  ;;  %v4085_v20 = vpop.f32.mrf.mxu0  ;;  %v6845_v12 = vld [vmem:[#allocation4 + $0x38] sm:$0xff] }
 0x52d   :  { %v4086_v48 = vadd.f32 %v4085_v20, %v9532_v52  ;;  %4824 = vmatpush.bf16.msrb.mxu0 %v6845_v12 }
 0x52e   :  { %v4134_v0 = vpop.f32.mrf.mxu1 }
 0x52f   :  { %v4135_v50 = vadd.f32 %v4134_v0, %v4086_v48  ;;  %4280 = vmatmul.bf16.vlgmr.msra.gmra.mxu0 %v9894_v19 }
 0x530   :  { %v4068_v23 = vpop.f32.mrf.mxu3  ;;  %4378 = vmatmul.bf16.vlgmr.msra.gmra.mxu2 %v9206_v56  ;;  %v6853_v56 = vld [vmem:[#allocation4 + $0x78] sm:$0xff] }
 0x531   :  { %v4069_v28 = vadd.f32 %v4068_v23, %v4020_v24  ;;  %4329 = vmatmul.bf16.vlgmr.msra.gmra.mxu1 %v9895_v51  ;;  %v6869_v51 = vld [vmem:[#allocation4 + $0xf8] sm:$0xff] }
 0x532   :  { %4971 = vmatpush.bf16.msrb.mxu3 %v6869_v51  ;;  %4873 = vmatpush.bf16.msrb.mxu1 %v6853_v56 }
 0x533   :  { %v4521_v8 = vmax.f32 %v4069_v28, 0.0  ;;  %v4183_v22 = vpop.f32.mrf.mxu2 }
 0x534   :  { %v4184_v15 = vadd.f32 %v4183_v22, %v4135_v50  ;;  %v4087_v14 = vpop.f32.mrf.mxu0 }
 0x535   :  { %4266 = vmatmul.bf16.gmra.mxu3 %v9401_v18  ;;  %v9539_v63 = vpack.c.bf16 %v4521_v8, %v4517_v54  ;;  %v4088_v57 = vadd.f32 %v4087_v14, %v9532_v52 }
 0x536   :  { %v4136_v2 = vpop.f32.mrf.mxu1 }
 0x537   :  { %v4137_v19 = vadd.f32 %v4136_v2, %v4088_v57 }
 0x538   :  { %v4071_v24 = vpop.f32.mrf.mxu3 }
 0x539   :  { %v4072_v30 = vadd.f32 %v4071_v24, %v4023_v37  ;;  %v6844_v24 = vld [vmem:[#allocation4 + $0x30] sm:$0xff] }
 0x53a   :  { %4825 = vmatpush.bf16.msrb.mxu0 %v6844_v24 }
 0x53b   :  { %v4185_v32 = vpop.f32.mrf.mxu2  ;;  %v4525_v37 = vmax.f32 %v4072_v30, 0.0 }
 0x53c   :  { %v4186_v6 = vadd.f32 %v4185_v32, %v4137_v19  ;;  %v4090_v20 = vpop.f32.mrf.mxu0 }
 0x53d   :  { %v4091_v48 = vadd.f32 %v4090_v20, %v9532_v52 }
 0x53e   :  { %v4139_v0 = vpop.f32.mrf.mxu1 }
 0x53f   :  { %v4140_v50 = vadd.f32 %v4139_v0, %v4091_v48  ;;  %4285 = vmatmul.bf16.gmra.mxu0 %v9896_v34 }
 0x540   :  { %v4073_v23 = vpop.f32.mrf.mxu3  ;;  %4383 = vmatmul.bf16.gmra.mxu2 %v9221_v40  ;;  %v6852_v40 = vld [vmem:[#allocation4 + $0x70] sm:$0xff] }
 0x541   :  { %v4074_v28 = vadd.f32 %v4073_v23, %v4025_v42  ;;  %4334 = vmatmul.bf16.gmra.mxu1 %v9897_v55  ;;  %v6868_v55 = vld [vmem:[#allocation4 + $0xf0] sm:$0xff] }
 0x542   :  { %4972 = vmatpush.bf16.msrb.mxu3 %v6868_v55  ;;  %4874 = vmatpush.bf16.msrb.mxu1 %v6852_v40 }
 0x543   :  { %v4529_v54 = vmax.f32 %v4074_v28, 0.0  ;;  %v4188_v8 = vpop.f32.mrf.mxu2 }
 0x544   :  { %v4189_v22 = vadd.f32 %v4188_v8, %v4140_v50  ;;  %v4092_v14 = vpop.f32.mrf.mxu0  ;;  %v6859_v8 = vld [vmem:[#allocation4 + $0xa8] sm:$0xff] }
 0x545   :  { %4427 = vmatmul.bf16.vlgmr.msra.gmra.mxu3 %v9332_v41  ;;  %v9547_v57 = vpack.c.bf16 %v4529_v54, %v4525_v37  ;;  %v4093_v2 = vadd.f32 %v4092_v14, %v9532_v52  ;;  %4924 = vmatpush.bf16.msrb.mxu2 %v6859_v8 }
 0x546   :  { %v4141_v19 = vpop.f32.mrf.mxu1 }
 0x547   :  { %v4142_v34 = vadd.f32 %v4141_v19, %v4093_v2  ;;  %v6843_v2 = vld [vmem:[#allocation4 + $0x28] sm:$0xff] }
 0x548   :  { %v4232_v42 = vpop.f32.mrf.mxu3  ;;  %4826 = vmatpush.bf16.msrb.mxu0 %v6843_v2 }
 0x549   :  { %v4233_v12 = vadd.f32 %v4232_v42, %v4184_v15 }
 0x54b   :  { %v4190_v51 = vpop.f32.mrf.mxu2  ;;  %v4470_v15 = vmax.f32 %v4233_v12, 0.0 }
 0x54c   :  { %v4191_v30 = vadd.f32 %v4190_v51, %v4142_v34  ;;  %v4095_v56 = vpop.f32.mrf.mxu0 }
 0x54d   :  { %v4096_v41 = vadd.f32 %v4095_v56, %v9532_v52 }
 0x54e   :  { %v4144_v32 = vpop.f32.mrf.mxu1 }
 0x54f   :  { %v4145_v20 = vadd.f32 %v4144_v32, %v4096_v41  ;;  %4290 = vmatmul.bf16.gmra.mxu0 %v9898_v4 }
 0x550   :  { %v4234_v48 = vpop.f32.mrf.mxu3  ;;  %4388 = vmatmul.bf16.gmra.mxu2 %v9236_v62  ;;  %v6851_v62 = vld [vmem:[#allocation4 + $0x68] sm:$0xff] }
 0x551   :  { %v4235_v0 = vadd.f32 %v4234_v48, %v4186_v6  ;;  %4339 = vmatmul.bf16.gmra.mxu1 %v9899_v44  ;;  %v6867_v44 = vld [vmem:[#allocation4 + $0xe8] sm:$0xff]  ;;  %v6858_v48 = vld [vmem:[#allocation4 + $0xa0] sm:$0xff] }
 0x552   :  { %4973 = vmatpush.bf16.msrb.mxu3 %v6867_v44  ;;  %4875 = vmatpush.bf16.msrb.mxu1 %v6851_v62 }
 0x553   :  { %v4474_v50 = vmax.f32 %v4235_v0, 0.0  ;;  %v4193_v23 = vpop.f32.mrf.mxu2  ;;  %4925 = vmatpush.bf16.msrb.mxu2 %v6858_v48 }
 0x554   :  { %v4194_v37 = vadd.f32 %v4193_v23, %v4145_v20  ;;  %v4097_v54 = vpop.f32.mrf.mxu0  ;;  %v6842_v23 = vld [vmem:[#allocation4 + $0x20] sm:$0xff] }
 0x555   :  { %v9554_v28 = vpack.c.bf16 %v4474_v50, %v4470_v15  ;;  %4432 = vmatmul.bf16.gmra.mxu3 %v9340_v35  ;;  %v4098_v14 = vadd.f32 %v4097_v54, %v9532_v52  ;;  %4827 = vmatpush.bf16.msrb.mxu0 %v6842_v23 }
 0x556   :  { %v4146_v29 = vpop.f32.mrf.mxu1 }
 0x557   :  { %v4147_v4 = vadd.f32 %v4146_v29, %v4098_v14 }
 0x558   :  { %v4237_v6 = vpop.f32.mrf.mxu3 }
 0x559   :  { %v4238_v19 = vadd.f32 %v4237_v6, %v4189_v22 }
 0x55b   :  { %v4195_v34 = vpop.f32.mrf.mxu2  ;;  %v4478_v22 = vmax.f32 %v4238_v19, 0.0 }
 0x55c   :  { %v4196_v42 = vadd.f32 %v4195_v34, %v4147_v4  ;;  %v4100_v24 = vpop.f32.mrf.mxu0 }
 0x55d   :  { %v4101_v35 = vadd.f32 %v4100_v24, %v9532_v52 }
 0x55e   :  { %v4149_v55 = vpop.f32.mrf.mxu1 }
 0x55f   :  { %v4150_v12 = vadd.f32 %v4149_v55, %v4101_v35  ;;  %4295 = vmatmul.bf16.gmra.mxu0 %v9900_v16  ;;  %v6857_v35 = vld [vmem:[#allocation4 + $0x98] sm:$0xff] }
 0x560   :  { %v4239_v40 = vpop.f32.mrf.mxu3  ;;  %4393 = vmatmul.bf16.gmra.mxu2 %v9251_v5  ;;  %v6850_v5 = vld [vmem:[#allocation4 + $0x60] sm:$0xff] }
 0x561   :  { %v4240_v51 = vadd.f32 %v4239_v40, %v4191_v30  ;;  %4344 = vmatmul.bf16.gmra.mxu1 %v9901_v61  ;;  %v6866_v61 = vld [vmem:[#allocation4 + $0xe0] sm:$0xff]  ;;  %4926 = vmatpush.bf16.msrb.mxu2 %v6857_v35 }
 0x562   :  { %4974 = vmatpush.bf16.msrb.mxu3 %v6866_v61  ;;  %4876 = vmatpush.bf16.msrb.mxu1 %v6850_v5  ;;  %v6856_v5 = vld [vmem:[#allocation4 + $0x90] sm:$0xff]  ;;  %v6846_v35 = vld [vmem:[#allocation4 + $0x40] sm:$0xff] }
 0x563   :  { %v4482_v56 = vmax.f32 %v4240_v51, 0.0  ;;  %v4198_v41 = vpop.f32.mrf.mxu2  ;;  %v6841_v51 = vld [vmem:[#allocation4 + $0x18] sm:$0xff] }
 0x564   :  { %v4199_v32 = vadd.f32 %v4198_v41, %v4150_v12  ;;  %v4102_v20 = vpop.f32.mrf.mxu0  ;;  %4828 = vmatpush.bf16.msrb.mxu0 %v6841_v51 }
 0x565   :  { %4437 = vmatmul.bf16.gmra.mxu3 %v9348_v7  ;;  %v9563_v0 = vpack.c.bf16 %v4482_v56, %v4478_v22  ;;  %v4103_v15 = vadd.f32 %v4102_v20, %v9532_v52  ;;  %4927 = vmatpush.bf16.msrb.mxu2 %v6856_v5 }
 0x566   :  { %v4151_v50 = vpop.f32.mrf.mxu1 }
 0x567   :  { %v4152_v16 = vadd.f32 %v4151_v50, %v4103_v15 }
 0x568   :  { %v4242_v30 = vpop.f32.mrf.mxu3 }
 0x569   :  { %v4243_v54 = vadd.f32 %v4242_v30, %v4194_v37 }
 0x56b   :  { %v4200_v8 = vpop.f32.mrf.mxu2  ;;  %v4486_v37 = vmax.f32 %v4243_v54, 0.0 }
 0x56c   :  { %v4201_v14 = vadd.f32 %v4200_v8, %v4152_v16  ;;  %v4105_v29 = vpop.f32.mrf.mxu0  ;;  %v6840_v8 = vld [vmem:[#allocation4 + $0x10] sm:$0xff] }
 0x56d   :  { %v4106_v7 = vadd.f32 %v4105_v29, %v9532_v52  ;;  %v6848_v29 = vld [vmem:[#allocation4 + $0x50] sm:$0xff]  ;;  %4829 = vmatpush.bf16.msrb.mxu0 %v6840_v8 }
 0x56e   :  { %v4154_v4 = vpop.f32.mrf.mxu1 }
 0x56f   :  { %v4155_v6 = vadd.f32 %v4154_v4, %v4106_v7  ;;  %4300 = vmatmul.bf16.gmra.mxu0 %v9902_v31 }
 0x570   :  { %v4244_v2 = vpop.f32.mrf.mxu3  ;;  %4398 = vmatmul.bf16.gmra.mxu2 %v9266_v11  ;;  %v6849_v11 = vld [vmem:[#allocation4 + $0x58] sm:$0xff] }
 0x571   :  { %v4245_v44 = vadd.f32 %v4244_v2, %v4196_v42  ;;  %4349 = vmatmul.bf16.gmra.mxu1 %v9903_v58  ;;  %v6865_v58 = vld [vmem:[#allocation4 + $0xd8] sm:$0xff]  ;;  %v6839_v2 = vld [vmem:[#allocation4 + $0x8] sm:$0xff] }
 0x572   :  { %4975 = vmatpush.bf16.msrb.mxu3 %v6865_v58  ;;  %4877 = vmatpush.bf16.msrb.mxu1 %v6849_v11 }
 0x573   :  { %v4490_v19 = vmax.f32 %v4245_v44, 0.0  ;;  %v4203_v62 = vpop.f32.mrf.mxu2  ;;  %v6847_v44 = vld [vmem:[#allocation4 + $0x48] sm:$0xff]  ;;  %4830 = vmatpush.bf16.msrb.mxu0 %v6839_v2 }
 0x574   :  { %v4204_v34 = vadd.f32 %v4203_v62, %v4155_v6  ;;  %v4107_v24 = vpop.f32.mrf.mxu0 }
 0x575   :  { %4442 = vmatmul.bf16.gmra.mxu3 %v9356_v60  ;;  %v9571_v55 = vpack.c.bf16 %v4490_v19, %v4486_v37  ;;  %v4108_v12 = vadd.f32 %v4107_v24, %v9532_v52  ;;  %v6855_v37 = vld [vmem:[#allocation4 + $0x88] sm:$0xff]  ;;  %v6838_v24 = vld [vmem:[#allocation4] sm:$0xff] }
 0x576   :  { %v4156_v40 = vpop.f32.mrf.mxu1  ;;  %4878 = vmatpush.bf16.msrb.mxu1 %v6848_v29  ;;  %4928 = vmatpush.bf16.msrb.mxu2 %v6855_v37 }
 0x577   :  { %v4157_v31 = vadd.f32 %v4156_v40, %v4108_v12  ;;  %v6854_v12 = vld [vmem:[#allocation4 + $0x80] sm:$0xff]  ;;  %4831 = vmatpush.bf16.msrb.mxu0 %v6838_v24 }
 0x578   :  { %v4247_v42 = vpop.f32.mrf.mxu3 }
 0x579   :  { %v4248_v22 = vadd.f32 %v4247_v42, %v4199_v32 }
 0x57a   :  { %4879 = vmatpush.bf16.msrb.mxu1 %v6847_v44  ;;  %4929 = vmatpush.bf16.msrb.mxu2 %v6854_v12 }
 0x57b   :  { %v4205_v56 = vpop.f32.mrf.mxu2  ;;  %v4494_v32 = vmax.f32 %v4248_v22, 0.0 }
 0x57c   :  { %v4206_v41 = vadd.f32 %v4205_v56, %v4157_v31  ;;  %v4110_v20 = vpop.f32.mrf.mxu0 }
 0x57d   :  { %v4111_v60 = vadd.f32 %v4110_v20, %v9532_v52 }
 0x57e   :  { %v4159_v48 = vpop.f32.mrf.mxu1  ;;  %4880 = vmatpush.bf16.msrb.mxu1 %v6846_v35 }
 0x57f   :  { %v4160_v15 = vadd.f32 %v4159_v48, %v4111_v60  ;;  %4305 = vmatmul.bf16.gmra.mxu0 %v9904_v43 }
 0x580   :  { %v4249_v50 = vpop.f32.mrf.mxu3  ;;  %4403 = vmatmul.bf16.gmra.mxu2 %v9283_v25  ;;  %v6864_v25 = vld [vmem:[#allocation4 + $0xd0] sm:$0xff] }
 0x581   :  { %v4250_v16 = vadd.f32 %v4249_v50, %v4201_v14  ;;  %4354 = vmatmul.bf16.gmra.mxu1 %v9905_v26  ;;  %4976 = vmatpush.bf16.msrb.mxu3 %v6864_v25 }
 0x583   :  { %v4498_v30 = vmax.f32 %v4250_v16, 0.0  ;;  %v4208_v23 = vpop.f32.mrf.mxu2  ;;  %v6863_v16 = vld [vmem:[#allocation4 + $0xc8] sm:$0xff] }
 0x584   :  { %v4209_v61 = vadd.f32 %v4208_v23, %v4160_v15  ;;  %v4112_v54 = vpop.f32.mrf.mxu0 }
 0x585   :  { %4447 = vmatmul.bf16.gmra.mxu3 %v9365_v9  ;;  %v9579_v7 = vpack.c.bf16 %v4498_v30, %v4494_v32  ;;  %v4113_v4 = vadd.f32 %v4112_v54, %v9532_v52 }
 0x586   :  { %v4161_v43 = vpop.f32.mrf.mxu1  ;;  %4977 = vmatpush.bf16.msrb.mxu3 %v6863_v16 }
 0x587   :  { %v4162_v26 = vadd.f32 %v4161_v43, %v4113_v4 }
 0x588   :  { %v4252_v14 = vpop.f32.mrf.mxu3 }
 0x589   :  { %v4253_v6 = vadd.f32 %v4252_v14, %v4204_v34 }
 0x58b   :  { %v4210_v9 = vpop.f32.mrf.mxu2  ;;  %v4502_v58 = vmax.f32 %v4253_v6, 0.0 }
 0x58c   :  { %v4211_v19 = vadd.f32 %v4210_v9, %v4162_v26  ;;  %v4115_v62 = vpop.f32.mrf.mxu0 }
 0x58d   :  { %v4116_v40 = vadd.f32 %v4115_v62, %v9532_v52 }
 0x58e   :  { %v4164_v31 = vpop.f32.mrf.mxu1 }
 0x58f   :  { %v4165_v42 = vadd.f32 %v4164_v31, %v4116_v40  ;;  %4310 = vmatmul.bf16.gmra.mxu0 %v9906_v45 }
 0x590   :  { %v4254_v34 = vpop.f32.mrf.mxu3  ;;  %4408 = vmatmul.bf16.gmra.mxu2 %v9300_v13 }
 0x591   :  { %v4255_v51 = vadd.f32 %v4254_v34, %v4206_v41  ;;  %4359 = vmatmul.bf16.gmra.mxu1 %v9907_v3 }
 0x593   :  { %v4506_v22 = vmax.f32 %v4255_v51, 0.0  ;;  %v4213_v11 = vpop.f32.mrf.mxu2 }
 0x594   :  { %v4214_v56 = vadd.f32 %v4213_v11, %v4165_v42  ;;  %v4117_v20 = vpop.f32.mrf.mxu0 }
 0x595   :  { %4452 = vmatmul.bf16.gmra.mxu3 %v9374_v10  ;;  %v9587_v60 = vpack.c.bf16 %v4506_v22, %v4502_v58  ;;  %v4118_v48 = vadd.f32 %v4117_v20, %v9532_v52 }
 0x596   :  { %v4166_v15 = vpop.f32.mrf.mxu1 }
 0x597   :  { %v4167_v50 = vadd.f32 %v4166_v15, %v4118_v48 }
 0x598   :  { %v4257_v45 = vpop.f32.mrf.mxu3 }
 0x599   :  { %v4258_v41 = vadd.f32 %v4257_v45, %v4209_v61 }
 0x59b   :  { %v4215_v3 = vpop.f32.mrf.mxu2  ;;  %v4510_v8 = vmax.f32 %v4258_v41, 0.0 }
 0x59c   :  { %v4216_v32 = vadd.f32 %v4215_v3, %v4167_v50  ;;  %v4120_v13 = vpop.f32.mrf.mxu0 }
 0x59d   :  { %v4121_v30 = vadd.f32 %v4120_v13, %v9532_v52 }
 0x59e   :  { %v4169_v23 = vpop.f32.mrf.mxu1 }
 0x59f   :  { %v4170_v54 = vadd.f32 %v4169_v23, %v4121_v30  ;;  %4315 = vmatmul.bf16.gmra.mxu0 %v9908_v21  ;;  %v6862_v21 = vld [vmem:[#allocation4 + $0xc0] sm:$0xff] }
 0x5a0   :  { %v4259_v5 = vpop.f32.mrf.mxu3  ;;  %4413 = vmatmul.bf16.gmra.mxu2 %v9317_v49  ;;  %4978 = vmatpush.bf16.msrb.mxu3 %v6862_v21 }
 0x5a1   :  { %v4260_v10 = vadd.f32 %v4259_v5, %v4211_v19  ;;  %4364 = vmatmul.bf16.gmra.mxu1 %v8990_v1 }
 0x5a3   :  { %v4514_v29 = vmax.f32 %v4260_v10, 0.0  ;;  %v4218_v4 = vpop.f32.mrf.mxu2 }
 0x5a4   :  { %v4219_v61 = vadd.f32 %v4218_v4, %v4170_v54  ;;  %v4122_v43 = vpop.f32.mrf.mxu0 }
 0x5a5   :  { %4457 = vmatmul.bf16.gmra.mxu3 %v9383_v53  ;;  %v9595_v26 = vpack.c.bf16 %v4514_v29, %v4510_v8  ;;  %v4123_v14 = vadd.f32 %v4122_v43, %v9532_v52 }
 0x5a6   :  { %v4171_v25 = vpop.f32.mrf.mxu1 }
 0x5a7   :  { %v4172_v6 = vadd.f32 %v4171_v25, %v4123_v14 }
 0x5a8   :  { %v4262_v2 = vpop.f32.mrf.mxu3 }
 0x5a9   :  { %v4263_v44 = vadd.f32 %v4262_v2, %v4214_v56 }
 0x5ab   :  { %v4220_v1 = vpop.f32.mrf.mxu2  ;;  %v4518_v53 = vmax.f32 %v4263_v44, 0.0 }
 0x5ac   :  { %v4221_v37 = vadd.f32 %v4220_v1, %v4172_v6  ;;  %v4281_v49 = vpop.f32.mrf.mxu0  ;;  %v9915_v1 = vld [vmem:[#allocation44_spill] sm:$0xff] }
 0x5ae   :  { %v4330_v9 = vpop.f32.mrf.mxu1 }
 0x5af   :  { %4832 = vmatmul.bf16.vlgmr.msrb.gmra.mxu0 %v9415_v33 }
 0x5b0   :  { %v4264_v19 = vpop.f32.mrf.mxu3  ;;  %4930 = vmatmul.bf16.vlgmr.msrb.gmra.mxu2 %v9554_v28  ;;  %v9608_v28 = vperm.slane %v9529_v27, 3 }
 0x5b1   :  { %v4265_v62 = vadd.f32 %v4264_v19, %v4216_v32  ;;  %4881 = vmatmul.bf16.vlgmr.msrb.gmra.mxu1 %v9482_v36 }
 0x5b2   :  { %v4282_v15 = vadd.f32 %v4281_v49, %v9608_v28  ;;  %v9916_v49 = vld [vmem:[#allocation30_spill] sm:$0xff] }
 0x5b3   :  { %v4522_v52 = vmax.f32 %v4265_v62, 0.0  ;;  %v4379_v24 = vpop.f32.mrf.mxu2 }
 0x5b4   :  { %v4283_v35 = vpop.f32.mrf.mxu0  ;;  %v4331_v45 = vadd.f32 %v4330_v9, %v4282_v15 }
 0x5b5   :  { %4462 = vmatmul.bf16.gmra.mxu3 %v9401_v18  ;;  %v9602_v12 = vpack.c.bf16 %v4522_v52, %v4518_v53 }
 0x5b6   :  { %v4332_v40 = vpop.f32.mrf.mxu1 }
 0x5b8   :  { %v4267_v31 = vpop.f32.mrf.mxu3 }
 0x5b9   :  { %v4268_v42 = vadd.f32 %v4267_v31, %v4219_v61 }
 0x5bb   :  { %v4381_v34 = vpop.f32.mrf.mxu2  ;;  %v4526_v18 = vmax.f32 %v4268_v42, 0.0 }
 0x5bc   :  { %v4286_v51 = vpop.f32.mrf.mxu0 }
 0x5bd   :  { %v4287_v4 = vadd.f32 %v4286_v51, %v9608_v28 }
 0x5be   :  { %v4335_v58 = vpop.f32.mrf.mxu1 }
 0x5bf   :  { %4837 = vmatmul.bf16.gmra.mxu0 %v9424_v17  ;;  %v4284_v17 = vadd.f32 %v4283_v35, %v9608_v28  ;;  %v4336_v14 = vadd.f32 %v4335_v58, %v4287_v4 }
 0x5c0   :  { %v4269_v33 = vpop.f32.mrf.mxu3  ;;  %4935 = vmatmul.bf16.gmra.mxu2 %v9563_v0 }
 0x5c1   :  { %v4270_v36 = vadd.f32 %v4269_v33, %v4221_v37  ;;  %4886 = vmatmul.bf16.gmra.mxu1 %v9491_v39  ;;  %v4380_v39 = vadd.f32 %v4379_v24, %v4331_v45  ;;  %v4333_v41 = vadd.f32 %v4332_v40, %v4284_v17 }
 0x5c3   :  { %v4530_v22 = vmax.f32 %v4270_v36, 0.0  ;;  %v4384_v11 = vpop.f32.mrf.mxu2  ;;  %v4382_v27 = vadd.f32 %v4381_v34, %v4333_v41 }
 0x5c4   :  { %v4288_v56 = vpop.f32.mrf.mxu0 }
 0x5c5   :  { %v9610_v20 = vpack.c.bf16 %v4530_v22, %v4526_v18  ;;  %v4289_v43 = vadd.f32 %v4288_v56, %v9608_v28 }
 0x5c6   :  { %v4337_v48 = vpop.f32.mrf.mxu1 }
 0x5c7   :  { %v4338_v6 = vadd.f32 %v4337_v48, %v4289_v43 }
 0x5c8   :  { %v4428_v50 = vpop.f32.mrf.mxu3 }
 0x5c9   :  { %v4429_v32 = vadd.f32 %v4428_v50, %v4380_v39 }
 0x5cb   :  { %v4386_v16 = vpop.f32.mrf.mxu2  ;;  %v4471_v23 = vmax.f32 %v4429_v32, 0.0 }
 0x5cc   :  { %v4291_v0 = vpop.f32.mrf.mxu0  ;;  %v4387_v21 = vadd.f32 %v4386_v16, %v4338_v6 }
 0x5cd   :  { %v4292_v35 = vadd.f32 %v4291_v0, %v9608_v28 }
 0x5ce   :  { %v4340_v3 = vpop.f32.mrf.mxu1 }
 0x5cf   :  { %4842 = vmatmul.bf16.gmra.mxu0 %v9432_v47  ;;  %v4385_v47 = vadd.f32 %v4384_v11, %v4336_v14  ;;  %v4341_v42 = vadd.f32 %v4340_v3, %v4292_v35  ;;  %v9917_v11 = vld [vmem:[#allocation22_spill] sm:$0xff] }
 0x5d0   :  { %v4430_v13 = vpop.f32.mrf.mxu3  ;;  %4940 = vmatmul.bf16.gmra.mxu2 %v9571_v55 }
 0x5d1   :  { %v4431_v30 = vadd.f32 %v4430_v13, %v4382_v27  ;;  %4891 = vmatmul.bf16.gmra.mxu1 %v9499_v59 }
 0x5d3   :  { %v4475_v54 = vmax.f32 %v4431_v30, 0.0  ;;  %v4389_v5 = vpop.f32.mrf.mxu2 }
 0x5d4   :  { %v4293_v8 = vpop.f32.mrf.mxu0  ;;  %v4390_v51 = vadd.f32 %v4389_v5, %v4341_v42  ;;  %v9918_v5 = vld [vmem:[#allocation24_spill] sm:$0xff] }
 0x5d5   :  { %v4535_v10 = vpack.c.bf16 %v4475_v54, %v4471_v23  ;;  %v4294_v31 = vadd.f32 %v4293_v8, %v9608_v28 }
 0x5d6   :  { %v4342_v29 = vpop.f32.mrf.mxu1 }
 0x5d7   :  { %4979 = vmatmul.bf16.vlgmr.msrb.gmra.mxu3 %v4535_v10  ;;  %v4343_v58 = vadd.f32 %v4342_v29, %v4294_v31 }
 0x5d8   :  { %v4433_v61 = vpop.f32.mrf.mxu3 }
 0x5d9   :  { %v4434_v55 = vadd.f32 %v4433_v61, %v4385_v47 }
 0x5db   :  { %v4391_v25 = vpop.f32.mrf.mxu2  ;;  %v4479_v9 = vmax.f32 %v4434_v55, 0.0 }
 0x5dc   :  { %v4296_v2 = vpop.f32.mrf.mxu0  ;;  %v4392_v18 = vadd.f32 %v4391_v25, %v4343_v58 }
 0x5dd   :  { %v4297_v39 = vadd.f32 %v4296_v2, %v9608_v28 }
 0x5de   :  { %v4345_v59 = vpop.f32.mrf.mxu1 }
 0x5df   :  { %4847 = vmatmul.bf16.gmra.mxu0 %v9915_v1  ;;  %v4346_v3 = vadd.f32 %v4345_v59, %v4297_v39 }
 0x5e0   :  { %v4435_v44 = vpop.f32.mrf.mxu3  ;;  %4945 = vmatmul.bf16.gmra.mxu2 %v9579_v7 }
 0x5e1   :  { %v4436_v37 = vadd.f32 %v4435_v44, %v4387_v21  ;;  %4896 = vmatmul.bf16.gmra.mxu1 %v9916_v49  ;;  %v9919_v49 = vld [vmem:[#allocation25_spill] sm:$0xff] }
 0x5e3   :  { %v4483_v19 = vmax.f32 %v4436_v37, 0.0  ;;  %v4394_v62 = vpop.f32.mrf.mxu2 }
 0x5e4   :  { %v4298_v53 = vpop.f32.mrf.mxu0  ;;  %v4395_v32 = vadd.f32 %v4394_v62, %v4346_v3 }
 0x5e5   :  { %v4539_v52 = vpack.c.bf16 %v4483_v19, %v4479_v9  ;;  %v4299_v0 = vadd.f32 %v4298_v53, %v9608_v28 }
 0x5e6   :  { %v4347_v24 = vpop.f32.mrf.mxu1 }
 0x5e7   :  { %4984 = vmatmul.bf16.gmra.mxu3 %v4539_v52  ;;  %v4348_v13 = vadd.f32 %v4347_v24, %v4299_v0 }
 0x5e8   :  { %v4438_v40 = vpop.f32.mrf.mxu3 }
 0x5e9   :  { %v4439_v7 = vadd.f32 %v4438_v40, %v4390_v51 }
 0x5eb   :  { %v4396_v34 = vpop.f32.mrf.mxu2  ;;  %v4487_v48 = vmax.f32 %v4439_v7, 0.0  ;;  %v9920_v7 = vld [vmem:[#allocation9_spill] sm:$0xff] }
 0x5ec   :  { %v4301_v33 = vpop.f32.mrf.mxu0  ;;  %v4397_v23 = vadd.f32 %v4396_v34, %v4348_v13 }
 0x5ed   :  { %v4302_v25 = vadd.f32 %v4301_v33, %v9608_v28 }
 0x5ee   :  { %v4350_v36 = vpop.f32.mrf.mxu1 }
 0x5ef   :  { %4852 = vmatmul.bf16.gmra.mxu0 %v9917_v11  ;;  %v4351_v2 = vadd.f32 %v4350_v36, %v4302_v25 }
 0x5f0   :  { %v4440_v22 = vpop.f32.mrf.mxu3  ;;  %4950 = vmatmul.bf16.gmra.mxu2 %v9587_v60 }
 0x5f1   :  { %v4441_v56 = vadd.f32 %v4440_v22, %v4392_v18  ;;  %4901 = vmatmul.bf16.gmra.mxu1 %v9515_v38 }
 0x5f3   :  { %v4491_v15 = vmax.f32 %v4441_v56, 0.0  ;;  %v4399_v50 = vpop.f32.mrf.mxu2 }
 0x5f4   :  { %v4303_v17 = vpop.f32.mrf.mxu0  ;;  %v4400_v21 = vadd.f32 %v4399_v50, %v4351_v2 }
 0x5f5   :  { %v4543_v45 = vpack.c.bf16 %v4491_v15, %v4487_v48  ;;  %v4304_v6 = vadd.f32 %v4303_v17, %v9608_v28 }
 0x5f6   :  { %v4352_v16 = vpop.f32.mrf.mxu1 }
 0x5f7   :  { %4989 = vmatmul.bf16.gmra.mxu3 %v4543_v45  ;;  %v4353_v55 = vadd.f32 %v4352_v16, %v4304_v6 }
 0x5f8   :  { %v4443_v41 = vpop.f32.mrf.mxu3 }
 0x5f9   :  { %v4444_v60 = vadd.f32 %v4443_v41, %v4395_v32 }
 0x5fb   :  { %v4401_v27 = vpop.f32.mrf.mxu2  ;;  %v4495_v8 = vmax.f32 %v4444_v60, 0.0 }
 0x5fc   :  { %v4306_v30 = vpop.f32.mrf.mxu0 }
 0x5fd   :  { %v4307_v35 = vadd.f32 %v4306_v30, %v9608_v28 }
 0x5fe   :  { %v4355_v38 = vpop.f32.mrf.mxu1 }
 0x5ff   :  { %4857 = vmatmul.bf16.gmra.mxu0 %v9918_v5  ;;  %v4356_v34 = vadd.f32 %v4355_v38, %v4307_v35 }
 0x600   :  { %v4445_v54 = vpop.f32.mrf.mxu3  ;;  %4955 = vmatmul.bf16.gmra.mxu2 %v9595_v26 }
 0x601   :  { %v4446_v10 = vadd.f32 %v4445_v54, %v4397_v23  ;;  %4906 = vmatmul.bf16.gmra.mxu1 %v9523_v46  ;;  %v4402_v46 = vadd.f32 %v4401_v27, %v4353_v55 }
 0x603   :  { %v4499_v29 = vmax.f32 %v4446_v10, 0.0  ;;  %v4404_v4 = vpop.f32.mrf.mxu2 }
 0x604   :  { %v4308_v61 = vpop.f32.mrf.mxu0  ;;  %v4405_v58 = vadd.f32 %v4404_v4, %v4356_v34 }
 0x605   :  { %v4547_v43 = vpack.c.bf16 %v4499_v29, %v4495_v8  ;;  %v4309_v31 = vadd.f32 %v4308_v61, %v9608_v28 }
 0x606   :  { %v4357_v14 = vpop.f32.mrf.mxu1 }
 0x607   :  { %4994 = vmatmul.bf16.gmra.mxu3 %v4547_v43  ;;  %v4358_v33 = vadd.f32 %v4357_v14, %v4309_v31 }
 0x608   :  { %v4448_v47 = vpop.f32.mrf.mxu3 }
 0x609   :  { %v4449_v1 = vadd.f32 %v4448_v47, %v4400_v21 }
 0x60b   :  { %v4406_v59 = vpop.f32.mrf.mxu2  ;;  %v4503_v19 = vmax.f32 %v4449_v1, 0.0 }
 0x60c   :  { %v4311_v44 = vpop.f32.mrf.mxu0 }
 0x60d   :  { %v4312_v17 = vadd.f32 %v4311_v44, %v9608_v28 }
 0x60e   :  { %v4360_v26 = vpop.f32.mrf.mxu1 }
 0x60f   :  { %4862 = vmatmul.bf16.gmra.mxu0 %v9919_v49  ;;  %v4361_v41 = vadd.f32 %v4360_v26, %v4312_v17 }
 0x610   :  { %v4450_v37 = vpop.f32.mrf.mxu3  ;;  %4960 = vmatmul.bf16.gmra.mxu2 %v9602_v12 }
 0x611   :  { %v4451_v9 = vadd.f32 %v4450_v37, %v4402_v46  ;;  %4911 = vmatmul.bf16.gmra.mxu1 %v9539_v63  ;;  %v4407_v63 = vadd.f32 %v4406_v59, %v4358_v33 }
 0x613   :  { %v4507_v62 = vmax.f32 %v4451_v9, 0.0  ;;  %v4409_v53 = vpop.f32.mrf.mxu2 }
 0x614   :  { %v4313_v24 = vpop.f32.mrf.mxu0  ;;  %v4410_v0 = vadd.f32 %v4409_v53, %v4361_v41 }
 0x615   :  { %v4551_v52 = vpack.c.bf16 %v4507_v62, %v4503_v19  ;;  %v4314_v39 = vadd.f32 %v4313_v24, %v9608_v28  ;;  %v9649_v62 = vld [vmem:[%s9697_s6] ss:$0 sm:$0xff] }
 0x616   :  { %v4362_v42 = vpop.f32.mrf.mxu1 }
 0x617   :  { %4999 = vmatmul.bf16.gmra.mxu3 %v4551_v52  ;;  %v4363_v3 = vadd.f32 %v4362_v42, %v4314_v39 }
 0x618   :  { %v4453_v40 = vpop.f32.mrf.mxu3 }
 0x619   :  { %v4454_v18 = vadd.f32 %v4453_v40, %v4405_v58 }
 0x61b   :  { %v4411_v51 = vpop.f32.mrf.mxu2  ;;  %v4511_v11 = vmax.f32 %v4454_v18, 0.0 }
 0x61c   :  { %v4316_v36 = vpop.f32.mrf.mxu0 }
 0x61d   :  { %v4317_v5 = vadd.f32 %v4316_v36, %v9608_v28 }
 0x61e   :  { %v4365_v56 = vpop.f32.mrf.mxu1 }
 0x61f   :  { %4867 = vmatmul.bf16.gmra.mxu0 %v9920_v7  ;;  %v4366_v61 = vadd.f32 %v4365_v56, %v4317_v5 }
 0x620   :  { %v4455_v12 = vpop.f32.mrf.mxu3  ;;  %4965 = vmatmul.bf16.gmra.mxu2 %v9610_v20 }
 0x621   :  { %v4456_v22 = vadd.f32 %v4455_v12, %v4407_v63  ;;  %4916 = vmatmul.bf16.gmra.mxu1 %v9547_v57  ;;  %v4412_v57 = vadd.f32 %v4411_v51, %v4363_v3 }
 0x623   :  { %v4515_v48 = vmax.f32 %v4456_v22, 0.0  ;;  %v4414_v15 = vpop.f32.mrf.mxu2 }
 0x624   :  { %v4318_v45 = vpop.f32.mrf.mxu0  ;;  %v4415_v14 = vadd.f32 %v4414_v15, %v4366_v61 }
 0x625   :  { %v4555_v50 = vpack.c.bf16 %v4515_v48, %v4511_v11  ;;  %v4319_v4 = vadd.f32 %v4318_v45, %v9608_v28 }
 0x626   :  { %v4367_v27 = vpop.f32.mrf.mxu1 }
 0x627   :  { %5004 = vmatmul.bf16.gmra.mxu3 %v4555_v50  ;;  %v4368_v25 = vadd.f32 %v4367_v27, %v4319_v4 }
 0x628   :  { %v4458_v16 = vpop.f32.mrf.mxu3 }
 0x629   :  { %v4459_v13 = vadd.f32 %v4458_v16, %v4410_v0 }
 0x62b   :  { %v4416_v32 = vpop.f32.mrf.mxu2  ;;  %v4519_v23 = vmax.f32 %v4459_v13, 0.0 }
 0x62c   :  { %v4833_v38 = vpop.f32.mrf.mxu0  ;;  %v4417_v47 = vadd.f32 %v4416_v32, %v4368_v25 }
 0x62d   :  { %v4834_v24 = vadd.f32 %v9649_v62, %v4833_v38 }
 0x62e   :  { %v4882_v10 = vpop.f32.mrf.mxu1 }
 0x62f   :  { %v4883_v40 = vadd.f32 %v4882_v10, %v4834_v24 }
 0x630   :  { %v4460_v20 = vpop.f32.mrf.mxu3 }
 0x631   :  { %v4461_v30 = vadd.f32 %v4460_v20, %v4412_v57 }
 0x633   :  { %v4523_v60 = vmax.f32 %v4461_v30, 0.0  ;;  %v4931_v8 = vpop.f32.mrf.mxu2 }
 0x634   :  { %v4835_v43 = vpop.f32.mrf.mxu0  ;;  %v4932_v51 = vadd.f32 %v4931_v8, %v4883_v40 }
 0x635   :  { %v4559_v54 = vpack.c.bf16 %v4523_v60, %v4519_v23  ;;  %v4836_v35 = vadd.f32 %v9649_v62, %v4835_v43 }
 0x636   :  { %v4884_v59 = vpop.f32.mrf.mxu1 }
 0x637   :  { %5009 = vmatmul.bf16.gmra.mxu3 %v4559_v54  ;;  %v4885_v31 = vadd.f32 %v4884_v59, %v4836_v35 }
 0x638   :  { %v4463_v29 = vpop.f32.mrf.mxu3 }
 0x639   :  { %v4464_v6 = vadd.f32 %v4463_v29, %v4415_v14 }
 0x63b   :  { %v4933_v55 = vpop.f32.mrf.mxu2  ;;  %v4527_v44 = vmax.f32 %v4464_v6, 0.0 }
 0x63c   :  { %v4838_v26 = vpop.f32.mrf.mxu0  ;;  %v4934_v58 = vadd.f32 %v4933_v55, %v4885_v31 }
 0x63d   :  { %v4839_v56 = vadd.f32 %v9649_v62, %v4838_v26 }
 0x63e   :  { %v4887_v37 = vpop.f32.mrf.mxu1 }
 0x63f   :  { %v4888_v50 = vadd.f32 %v4887_v37, %v4839_v56 }
 0x640   :  { %v4465_v2 = vpop.f32.mrf.mxu3 }
 0x641   :  { %v4466_v21 = vadd.f32 %v4465_v2, %v4417_v47 }
 0x643   :  { %v4531_v46 = vmax.f32 %v4466_v21, 0.0  ;;  %v4936_v49 = vpop.f32.mrf.mxu2 }
 0x644   :  { %v4840_v9 = vpop.f32.mrf.mxu0  ;;  %v4937_v45 = vadd.f32 %v4936_v49, %v4888_v50 }
 0x645   :  { %v4563_v1 = vpack.c.bf16 %v4531_v46, %v4527_v44  ;;  %v4841_v48 = vadd.f32 %v9649_v62, %v4840_v9 }
 0x646   :  { %v4889_v19 = vpop.f32.mrf.mxu1 }
 0x647   :  { %5014 = vmatmul.bf16.gmra.mxu3 %v4563_v1  ;;  %v4890_v17 = vadd.f32 %v4889_v19, %v4841_v48 }
 0x64b   :  { %v4938_v28 = vpop.f32.mrf.mxu2 }
 0x64c   :  { %v4843_v53 = vpop.f32.mrf.mxu0  ;;  %v4939_v16 = vadd.f32 %v4938_v28, %v4890_v17 }
 0x64d   :  { %v4844_v20 = vadd.f32 %v9649_v62, %v4843_v53 }
 0x64e   :  { %v4892_v42 = vpop.f32.mrf.mxu1 }
 0x64f   :  { %v4893_v60 = vadd.f32 %v4892_v42, %v4844_v20 }
 0x653   :  { %v4941_v34 = vpop.f32.mrf.mxu2 }
 0x654   :  { %v4845_v18 = vpop.f32.mrf.mxu0  ;;  %v4942_v5 = vadd.f32 %v4941_v34, %v4893_v60 }
 0x655   :  { %v4846_v30 = vadd.f32 %v9649_v62, %v4845_v18 }
 0x656   :  { %v4894_v7 = vpop.f32.mrf.mxu1 }
 0x657   :  { %v4895_v54 = vadd.f32 %v4894_v7, %v4846_v30 }
 0x65a   :  { %v4980_v52 = vpop.f32.mrf.mxu3 }
 0x65b   :  { %v4981_v36 = vadd.f32 %v4980_v52, %v4932_v51  ;;  %v4943_v22 = vpop.f32.mrf.mxu2 }
 0x65c   :  { %v4848_v15 = vpop.f32.mrf.mxu0  ;;  %v4944_v10 = vadd.f32 %v4943_v22, %v4895_v54 }
 0x65d   :  { %v4849_v6 = vadd.f32 %v9649_v62, %v4848_v15 }
 0x65e   :  { %v4897_v41 = vpop.f32.mrf.mxu1 }
 0x65f   :  { %v4898_v21 = vadd.f32 %v4897_v41, %v4849_v6 }
 0x662   :  { %v4982_v33 = vpop.f32.mrf.mxu3 }
 0x663   :  { %v4983_v63 = vadd.f32 %v4982_v33, %v4934_v58  ;;  %v4946_v27 = vpop.f32.mrf.mxu2 }
 0x664   :  { %v4850_v57 = vpop.f32.mrf.mxu0  ;;  %v4947_v44 = vadd.f32 %v4946_v27, %v4898_v21 }
 0x665   :  { %v6873_v12 = vpack.c.bf16 %v4983_v63, %v4981_v36  ;;  %v4851_v2 = vadd.f32 %v9649_v62, %v4850_v57 }
 0x666   :  { %v4899_v38 = vpop.f32.mrf.mxu1 }
 0x667   :  { %6874 = vst [vmem:[%s9698_s7] sm:$0xff] %v6873_v12   ;;  %v4900_v55 = vadd.f32 %v4899_v38, %v4851_v2 }
 0x66a   :  { %v4985_v11 = vpop.f32.mrf.mxu3 }
 0x66b   :  { %v4986_v0 = vadd.f32 %v4985_v11, %v4937_v45  ;;  %v4948_v23 = vpop.f32.mrf.mxu2 }
 0x66c   :  { %v4853_v8 = vpop.f32.mrf.mxu0  ;;  %v4949_v46 = vadd.f32 %v4948_v23, %v4900_v55 }
 0x66d   :  { %v4854_v52 = vadd.f32 %v9649_v62, %v4853_v8 }
 0x66e   :  { %v4902_v14 = vpop.f32.mrf.mxu1 }
 0x66f   :  { %v4903_v31 = vadd.f32 %v4902_v14, %v4854_v52 }
 0x672   :  { %v4987_v39 = vpop.f32.mrf.mxu3 }
 0x673   :  { %v4988_v3 = vadd.f32 %v4987_v39, %v4939_v16  ;;  %v4951_v25 = vpop.f32.mrf.mxu2 }
 0x674   :  { %v4855_v59 = vpop.f32.mrf.mxu0  ;;  %v4952_v51 = vadd.f32 %v4951_v25, %v4903_v31 }
 0x675   :  { %v6878_v32 = vpack.c.bf16 %v4988_v3, %v4986_v0  ;;  %v4856_v24 = vadd.f32 %v9649_v62, %v4855_v59 }
 0x676   :  { %v4904_v1 = vpop.f32.mrf.mxu1 }
 0x677   :  { %6910 = vst [vmem:[%s9698_s7 + $0x8] sm:$0xff] %v6878_v32   ;;  %v4905_v42 = vadd.f32 %v4904_v1, %v4856_v24 }
 0x67a   :  { %v4990_v13 = vpop.f32.mrf.mxu3 }
 0x67b   :  { %v4991_v4 = vadd.f32 %v4990_v13, %v4942_v5  ;;  %v4953_v26 = vpop.f32.mrf.mxu2 }
 0x67c   :  { %v4858_v28 = vpop.f32.mrf.mxu0  ;;  %v4954_v58 = vadd.f32 %v4953_v26, %v4905_v42 }
 0x67d   :  { %v4859_v56 = vadd.f32 %v9649_v62, %v4858_v28 }
 0x67e   :  { %v4907_v35 = vpop.f32.mrf.mxu1 }
 0x67f   :  { %v4908_v15 = vadd.f32 %v4907_v35, %v4859_v56 }
 0x682   :  { %v4992_v29 = vpop.f32.mrf.mxu3 }
 0x683   :  { %v4993_v61 = vadd.f32 %v4992_v29, %v4944_v10  ;;  %v4956_v40 = vpop.f32.mrf.mxu2 }
 0x684   :  { %v4860_v34 = vpop.f32.mrf.mxu0  ;;  %v4957_v16 = vadd.f32 %v4956_v40, %v4908_v15 }
 0x685   :  { %v6883_v43 = vpack.c.bf16 %v4993_v61, %v4991_v4  ;;  %v4861_v48 = vadd.f32 %v9649_v62, %v4860_v34 }
 0x686   :  { %v4909_v18 = vpop.f32.mrf.mxu1 }
 0x687   :  { %6911 = vst [vmem:[%s9698_s7 + $0x10] sm:$0xff] %v6883_v43   ;;  %v4910_v50 = vadd.f32 %v4909_v18, %v4861_v48 }
 0x68a   :  { %v4995_v47 = vpop.f32.mrf.mxu3 }
 0x68b   :  { %v4996_v49 = vadd.f32 %v4995_v47, %v4947_v44  ;;  %v4958_v7 = vpop.f32.mrf.mxu2 }
 0x68c   :  { %v4863_v22 = vpop.f32.mrf.mxu0  ;;  %v4959_v39 = vadd.f32 %v4958_v7, %v4910_v50 }
 0x68d   :  { %v4864_v30 = vadd.f32 %v9649_v62, %v4863_v22 }
 0x68e   :  { %v4912_v17 = vpop.f32.mrf.mxu1 }
 0x68f   :  { %v4913_v60 = vadd.f32 %v4912_v17, %v4864_v30 }
 0x692   :  { %v4997_v37 = vpop.f32.mrf.mxu3 }
 0x693   :  { %v4998_v9 = vadd.f32 %v4997_v37, %v4949_v46  ;;  %v4961_v45 = vpop.f32.mrf.mxu2 }
 0x694   :  { %v4865_v27 = vpop.f32.mrf.mxu0  ;;  %v4962_v5 = vadd.f32 %v4961_v45, %v4913_v60 }
 0x695   :  { %v6888_v19 = vpack.c.bf16 %v4998_v9, %v4996_v49  ;;  %v4866_v38 = vadd.f32 %v9649_v62, %v4865_v27 }
 0x696   :  { %v4914_v57 = vpop.f32.mrf.mxu1 }
 0x697   :  { %6912 = vst [vmem:[%s9698_s7 + $0x18] sm:$0xff] %v6888_v19   ;;  %v4915_v54 = vadd.f32 %v4914_v57, %v4866_v38 }
 0x69a   :  { %v5000_v53 = vpop.f32.mrf.mxu3 }
 0x69b   :  { %v5001_v36 = vadd.f32 %v5000_v53, %v4952_v51  ;;  %v4963_v13 = vpop.f32.mrf.mxu2 }
 0x69c   :  { %v4868_v23 = vpop.f32.mrf.mxu0  ;;  %v4964_v10 = vadd.f32 %v4963_v13, %v4915_v54 }
 0x69d   :  { %v4869_v6 = vadd.f32 %v9649_v62, %v4868_v23 }
 0x69e   :  { %v4917_v61 = vpop.f32.mrf.mxu1 }
 0x69f   :  { %v4918_v55 = vadd.f32 %v4917_v61, %v4869_v6 }
 0x6a2   :  { %v5002_v33 = vpop.f32.mrf.mxu3 }
 0x6a3   :  { %v5003_v63 = vadd.f32 %v5002_v33, %v4954_v58  ;;  %v4966_v43 = vpop.f32.mrf.mxu2 }
 0x6a4   :  { %v4870_v25 = vpop.f32.mrf.mxu0  ;;  %v4967_v46 = vadd.f32 %v4966_v43, %v4918_v55 }
 0x6a5   :  { %v6893_v12 = vpack.c.bf16 %v5003_v63, %v5001_v36  ;;  %v4871_v2 = vadd.f32 %v9649_v62, %v4870_v25 }
 0x6a6   :  { %v4919_v59 = vpop.f32.mrf.mxu1 }
 0x6a7   :  { %6913 = vst [vmem:[%s9698_s7 + $0x20] sm:$0xff] %v6893_v12   ;;  %v4920_v44 = vadd.f32 %v4919_v59, %v4871_v2 }
 0x6aa   :  { %v5005_v11 = vpop.f32.mrf.mxu3 }
 0x6ab   :  { %v5006_v0 = vadd.f32 %v5005_v11, %v4957_v16  ;;  %v4968_v21 = vpop.f32.mrf.mxu2 }
 0x6ac   :  { %v4969_v1 = vadd.f32 %v4968_v21, %v4920_v44 }
 0x6b2   :  { %v5007_v41 = vpop.f32.mrf.mxu3 }
 0x6b3   :  { %v5008_v3 = vadd.f32 %v5007_v41, %v4959_v39 }
 0x6b5   :  { %v6898_v32 = vpack.c.bf16 %v5008_v3, %v5006_v0 }
 0x6b7   :  { %6914 = vst [vmem:[%s9698_s7 + $0x28] sm:$0xff] %v6898_v32  }
 0x6ba   :  { %v5010_v20 = vpop.f32.mrf.mxu3 }
 0x6bb   :  { %v5011_v29 = vadd.f32 %v5010_v20, %v4962_v5 }
 0x6c2   :  { %v5012_v8 = vpop.f32.mrf.mxu3 }
 0x6c3   :  { %v5013_v4 = vadd.f32 %v5012_v8, %v4964_v10 }
 0x6c5   :  { %v6903_v14 = vpack.c.bf16 %v5013_v4, %v5011_v29 }
 0x6c7   :  { %6915 = vst [vmem:[%s9698_s7 + $0x30] sm:$0xff] %v6903_v14  }
 0x6ca   :  { %v5015_v47 = vpop.f32.mrf.mxu3 }
 0x6cb   :  { %v5016_v37 = vadd.f32 %v5015_v47, %v4967_v46 }
 0x6d2   :  { %v5017_v26 = vpop.f32.mrf.mxu3 }
 0x6d3   :  { %v5018_v49 = vadd.f32 %v5017_v26, %v4969_v1 }
 0x6d5   :  { %v6908_v9 = vpack.c.bf16 %v5018_v49, %v5016_v37 }
 0x6d7   :  { %6916 = vst [vmem:[%s9698_s7 + $0x38] sm:$0xff] %v6908_v9  }
 0x6d8   :  { %5056 = vsyncpa [#allocation3], 1 }
 0x6d9   :  { %5057 = vsyncpa [#allocation5], 1 }

</bundles_post_ra>
